<compile_context>
chip_gen: v6e
topology: v6e:2x2x1
jax: 0.10.0
libtpu: 0.0.40
codegen_flags: <defaults>
</compile_context>

<pallas_src>
import math

import jax
import jax.numpy as jnp
from jax.experimental import pallas as pl
from jax.experimental.pallas import tpu as pltpu

LN_EPS = 1e-5


def _pick_row_tile(n_rows, bytes_per_row, cap=16, budget=6 * 1024 * 1024):
    """Largest divisor of n_rows that is <= cap and keeps row blocks under budget."""
    cap = max(1, min(cap, n_rows, budget // max(bytes_per_row, 1)))
    t = cap
    while n_rows % t:
        t -= 1
    return t


# -----------------------------------------------------------------------------
# Pallas kernel 1: fused (x + pos_embed) -> LayerNorm -> single-head attention
# over the concatenated sequence [x_hid ; x_ref] -> output projection (+bias).
# Only the x_hid queries (first half of the sequence) are computed / written,
# matching res[:, :S//2, :] in the PyTorch module.  One grid step processes TN
# rows entirely in VMEM.
# -----------------------------------------------------------------------------
def _make_attn_kernel(channels):
    scale = 1.0 / math.sqrt(channels)          # heads = 1 -> dim_head = channels

    def kernel(xh_ref, xr_ref, peh_ref, per_ref, g_ref, b_ref,
               wq_ref, wkv_ref, wo_ref, bo_ref, o_ref):
        g = g_ref[...]
        b = b_ref[...]

        def layernorm(x):
            mean = jnp.mean(x, axis=-1, keepdims=True)
            var = jnp.mean(jnp.square(x - mean), axis=-1, keepdims=True)
            return ((x - mean) * jax.lax.rsqrt(var + LN_EPS)) * g + b

        # pos-embed + LayerNorm per half (LN is per-token, so halves are independent)
        xh = layernorm(xh_ref[...] + peh_ref[...]).astype(jnp.bfloat16)   # (TN, Sq, C)
        xr = layernorm(xr_ref[...] + per_ref[...]).astype(jnp.bfloat16)   # (TN, Sq, C)

        dn = (((2,), (0,)), ((), ()))            # contract channels with weight rows

        # fused k/v projection for both halves -> (TN, Sq, 2C) each
        kvh = jax.lax.dot_general(xh, wkv_ref[...], dn,
                                  preferred_element_type=jnp.float32)
        kvr = jax.lax.dot_general(xr, wkv_ref[...], dn,
                                  preferred_element_type=jnp.float32)
        kh = kvh[..., :channels].astype(jnp.bfloat16)
        vh = kvh[..., channels:].astype(jnp.bfloat16)
        kr = kvr[..., :channels].astype(jnp.bfloat16)
        vr = kvr[..., channels:].astype(jnp.bfloat16)

        # queries only for the kept (first-half) tokens
        q = jax.lax.dot_general(xh, wq_ref[...], dn,
                                preferred_element_type=jnp.float32)
        q = (q * scale).astype(jnp.bfloat16)

        # joint softmax over the concatenated key axis, computed split-wise
        sh = jnp.einsum('bqc,bkc->bqk', q, kh,
                        preferred_element_type=jnp.float32)            # (TN,Sq,Sq)
        sr = jnp.einsum('bqc,bkc->bqk', q, kr,
                        preferred_element_type=jnp.float32)            # (TN,Sq,Sq)
        m = jnp.maximum(jnp.max(sh, axis=-1, keepdims=True),
                        jnp.max(sr, axis=-1, keepdims=True))
        ph = jnp.exp(sh - m)
        pr = jnp.exp(sr - m)
        l = jnp.sum(ph, axis=-1, keepdims=True) + jnp.sum(pr, axis=-1, keepdims=True)
        o_un = (jnp.einsum('bqk,bkc->bqc', ph.astype(jnp.bfloat16), vh,
                           preferred_element_type=jnp.float32)
                + jnp.einsum('bqk,bkc->bqc', pr.astype(jnp.bfloat16), vr,
                             preferred_element_type=jnp.float32))
        attn = o_un * pl.reciprocal(l, approx=True)                    # (TN,Sq,C)

        # output projection (with bias)
        out = jax.lax.dot_general(attn.astype(jnp.bfloat16), wo_ref[...], dn,
                                  preferred_element_type=jnp.float32)
        o_ref[...] = (out + bo_ref[...]).astype(o_ref.dtype)

    return kernel


def attn_block(x_hid, x_ref, pe, gamma, beta, wq, wkv, wo, bo, *, row_tile_cap=16):
    """x_hid, x_ref: (N, Sq, C).  Attention over [x_hid ; x_ref] (length 2*Sq),
    only the x_hid queries are kept -> output (N, Sq, C)."""
    n, sq, c = x_hid.shape
    bytes_per_row = 3 * sq * c * 4 * 2          # 2 inputs + 1 output, f32, double-buffered
    tn = _pick_row_tile(n, bytes_per_row, cap=row_tile_cap)
    pe_h = pe[:sq]
    pe_r = pe[sq:2 * sq]
    bf = jnp.bfloat16
    kernel = _make_attn_kernel(c)
    return pl.pallas_call(
        kernel,
        out_shape=jax.ShapeDtypeStruct((n, sq, c), x_hid.dtype),
        grid=(n // tn,),
        in_specs=[
            pl.BlockSpec((tn, sq, c), lambda i: (i, 0, 0)),   # hidden-half rows
            pl.BlockSpec((tn, sq, c), lambda i: (i, 0, 0)),   # reference-half rows
            pl.BlockSpec((sq, c), lambda i: (0, 0)),          # pos embed, first half
            pl.BlockSpec((sq, c), lambda i: (0, 0)),          # pos embed, second half
            pl.BlockSpec((1, c), lambda i: (0, 0)),           # ln gamma
            pl.BlockSpec((1, c), lambda i: (0, 0)),           # ln beta
            pl.BlockSpec((c, c), lambda i: (0, 0)),           # wq  (bf16)
            pl.BlockSpec((c, 2 * c), lambda i: (0, 0)),       # wkv (bf16)
            pl.BlockSpec((c, c), lambda i: (0, 0)),           # wo  (bf16)
            pl.BlockSpec((1, c), lambda i: (0, 0)),           # out-proj bias
        ],
        out_specs=pl.BlockSpec((tn, sq, c), lambda i: (i, 0, 0)),
        compiler_params=pltpu.CompilerParams(
            dimension_semantics=("parallel",)),
    )(x_hid, x_ref, pe_h, pe_r, gamma, beta,
      wq.astype(bf), wkv.astype(bf), wo.astype(bf), bo)


# -----------------------------------------------------------------------------
# Pallas kernel 2: zero-init 3x3 conv (9 in-kernel tap matmuls over a padded
# NHWC block) + bias + residual add.  No XLA-side im2col.
# -----------------------------------------------------------------------------
def _make_conv_kernel(h, w, c):
    def kernel(xpad_ref, hid_ref, w_ref, b_ref, o_ref):
        # xpad_ref: (1, H+2, W+2, C); hid_ref / o_ref: (1, H, W, C)
        acc = jnp.zeros((h, w, c), jnp.float32)
        for ky in range(3):
            for kx in range(3):
                tap = xpad_ref[0, ky:ky + h, kx:kx + w, :].astype(jnp.bfloat16)
                acc = acc + jax.lax.dot_general(
                    tap, w_ref[ky * 3 + kx],
                    (((2,), (0,)), ((), ())),
                    preferred_element_type=jnp.float32)
        out = hid_ref[0] + acc + b_ref[...]
        o_ref[0] = out.astype(o_ref.dtype)

    return kernel


def conv3x3_residual_nhwc(hid_nhwc, x_nhwc, w_taps, bias):
    """out = hid + conv3x3(x) (padding=1), NHWC in / NHWC out."""
    b, h, w, c = x_nhwc.shape
    xpad = jnp.pad(x_nhwc, ((0, 0), (1, 1), (1, 1), (0, 0)))
    kernel = _make_conv_kernel(h, w, c)
    # TODO(synk): for very large H*W*C tile the H axis with a halo (manual DMA)
    # so each block stays well under v7x's 64 MiB VMEM.
    return pl.pallas_call(
        kernel,
        out_shape=jax.ShapeDtypeStruct((b, h, w, c), hid_nhwc.dtype),
        grid=(b,),
        in_specs=[
            pl.BlockSpec((1, h + 2, w + 2, c), lambda i: (i, 0, 0, 0)),  # padded x
            pl.BlockSpec((1, h, w, c), lambda i: (i, 0, 0, 0)),          # residual
            pl.BlockSpec((9, c, c), lambda i: (0, 0, 0)),                # taps (bf16)
            pl.BlockSpec((1, c), lambda i: (0, 0)),                      # bias
        ],
        out_specs=pl.BlockSpec((1, h, w, c), lambda i: (i, 0, 0, 0)),
        compiler_params=pltpu.CompilerParams(
            dimension_semantics=("parallel",)),
    )(xpad, hid_nhwc, w_taps.astype(jnp.bfloat16), bias)


# -----------------------------------------------------------------------------
# Glue: sinusoidal positional embedding + parameters + full forward
# -----------------------------------------------------------------------------
def sinusoidal_pe(seq_len, dim):
    position = jnp.arange(seq_len, dtype=jnp.float32)[:, None]
    div_term = jnp.exp(jnp.arange(0, dim, 2, dtype=jnp.float32)
                       * (-math.log(10000.0) / dim))
    pe = jnp.zeros((seq_len, dim), jnp.float32)
    pe = pe.at[:, 0::2].set(jnp.sin(position * div_term))
    pe = pe.at[:, 1::2].set(jnp.cos(position * div_term))
    return pe


def init_params(key, channels):
    k1, k2, k3, k4, k5, k6, k7, k8 = jax.random.split(key, 8)

    def lin(k):
        # stored as (in, out); equivalent to torch's (out, in) applied as x @ W.T
        return (0.02 * jax.random.normal(k, (channels, channels))).astype(jnp.float32)

    params = {
        "norm": {"gamma": jnp.ones((1, channels), jnp.float32),
                 "beta": jnp.zeros((1, channels), jnp.float32)},
        "attn1": {"wq": lin(k1),
                  "wkv": jnp.concatenate([lin(k2), lin(k3)], axis=1),  # (C, 2C)
                  "wo": lin(k4),
                  "bo": jnp.zeros((1, channels), jnp.float32)},
        "attn2": {"wq": lin(k5),
                  "wkv": jnp.concatenate([lin(k6), lin(k7)], axis=1),
                  "wo": lin(k8),
                  "bo": jnp.zeros((1, channels), jnp.float32)},
        # zero_module(nn.Conv2d(C, C, 3, padding=1)) -> all-zero weight & bias.
        # Weight stored as (9, C_in, C_out), tap index = ky*3 + kx.
        "proj": {"w": jnp.zeros((9, channels, channels), jnp.float32),
                 "b": jnp.zeros((1, channels), jnp.float32)},
    }
    return params


def sk_reference_attention_forward(params, hidden_states, ref_stats, num_frames):
    # hidden_states / ref_stats are NCHW (B, C, H, W), like PyTorch.
    B, C, H, W = hidden_states.shape
    if ref_stats.shape[0] != B:
        ref_stats = jnp.repeat(ref_stats, num_frames, axis=0)   # repeat_interleave(dim=0)

    # NCHW -> NHWC once; everything stays channels-last until the end.
    hid = jnp.transpose(hidden_states, (0, 2, 3, 1))     # (B, H, W, C)
    ref = jnp.transpose(ref_stats, (0, 2, 3, 1))         # (B, H, W, C)

    norm = params["norm"]
    a1, a2 = params["attn1"], params["attn2"]

    # --- pass 1: attend over width, sequence = [hid ; ref] (concat fused in-kernel) ---
    pe1 = sinusoidal_pe(2 * W, C)
    res1 = attn_block(hid.reshape(B * H, W, C), ref.reshape(B * H, W, C),
                      pe1, norm["gamma"], norm["beta"],
                      a1["wq"], a1["wkv"], a1["wo"], a1["bo"])         # (B*H, W, C)
    res1 = res1.reshape(B, H, W, C)

    # --- pass 2: attend over height, sequence = [res1 ; ref] (concat fused in-kernel) ---
    pe2 = sinusoidal_pe(2 * H, C)
    res1_t = jnp.transpose(res1, (0, 2, 1, 3)).reshape(B * W, H, C)
    ref_t = jnp.transpose(ref, (0, 2, 1, 3)).reshape(B * W, H, C)
    res2 = attn_block(res1_t, ref_t, pe2, norm["gamma"], norm["beta"],
                      a2["wq"], a2["wkv"], a2["wo"], a2["bo"])         # (B*W, H, C)
    res2 = jnp.transpose(res2.reshape(B, W, H, C), (0, 2, 1, 3))       # (B, H, W, C)

    # --- residual + zero-init 3x3 conv projection (NHWC kernel) ---
    out_nhwc = conv3x3_residual_nhwc(hid, res2,
                                     params["proj"]["w"], params["proj"]["b"])
    return jnp.transpose(out_nhwc, (0, 3, 1, 2))                       # NCHW out


if __name__ == "__main__":
    B, C, H, W = 2, 32, 16, 16
    num_frames = 2

    key = jax.random.PRNGKey(0)
    k_param, k_hid, k_ref = jax.random.split(key, 3)

    params = init_params(k_param, C)
    hidden_states = jax.random.normal(k_hid, (B, C, H, W), jnp.float32)
    # ref_stats batch != hidden batch -> exercises the repeat_interleave path
    ref_stats = jax.random.normal(k_ref, (B // num_frames, C, H, W), jnp.float32)

    out = sk_reference_attention_forward(params, hidden_states, ref_stats, num_frames)
    out = jax.block_until_ready(out)
    assert out.shape == (B, C, H, W)
    print("KERNEL_OK")
</pallas_src>

<mosaic_0001>
module attributes {stable_mosaic.version = 11 : i64} {
  func.func @kernel(%arg0: i32, %arg1: memref<16x16x32xf32, #tpu.memory_space<vmem>>, %arg2: memref<16x16x32xf32, #tpu.memory_space<vmem>>, %arg3: memref<16x32xf32, #tpu.memory_space<vmem>>, %arg4: memref<16x32xf32, #tpu.memory_space<vmem>>, %arg5: memref<1x32xf32, #tpu.memory_space<vmem>>, %arg6: memref<1x32xf32, #tpu.memory_space<vmem>>, %arg7: memref<32x32xbf16, #tpu.memory_space<vmem>>, %arg8: memref<32x64xbf16, #tpu.memory_space<vmem>>, %arg9: memref<32x32xbf16, #tpu.memory_space<vmem>>, %arg10: memref<1x32xf32, #tpu.memory_space<vmem>>, %arg11: memref<16x16x32xf32, #tpu.memory_space<vmem>>) attributes {dimension_semantics = [#tpu.dimension_semantics<parallel>], iteration_bounds = array<i64: 2>, scalar_prefetch = 0 : i64, scratch_operands = 0 : i64, tpu.core_type = #tpu.core_type<tc>, window_params = [{transform_indices = @transform_0, window_bounds = array<i64: 16, 16, 32>}, {transform_indices = @transform_1, window_bounds = array<i64: 16, 16, 32>}, {pipeline_mode = #tpu.pipeline_mode<synchronous>, transform_indices = @transform_2, window_bounds = array<i64: 16, 32>}, {pipeline_mode = #tpu.pipeline_mode<synchronous>, transform_indices = @transform_3, window_bounds = array<i64: 16, 32>}, {pipeline_mode = #tpu.pipeline_mode<synchronous>, transform_indices = @transform_4, window_bounds = array<i64: 1, 32>}, {pipeline_mode = #tpu.pipeline_mode<synchronous>, transform_indices = @transform_5, window_bounds = array<i64: 1, 32>}, {pipeline_mode = #tpu.pipeline_mode<synchronous>, transform_indices = @transform_6, window_bounds = array<i64: 32, 32>}, {pipeline_mode = #tpu.pipeline_mode<synchronous>, transform_indices = @transform_7, window_bounds = array<i64: 32, 64>}, {pipeline_mode = #tpu.pipeline_mode<synchronous>, transform_indices = @transform_8, window_bounds = array<i64: 32, 32>}, {pipeline_mode = #tpu.pipeline_mode<synchronous>, transform_indices = @transform_9, window_bounds = array<i64: 1, 32>}, {transform_indices = @transform_10, window_bounds = array<i64: 16, 16, 32>}]} {
    %c0 = arith.constant 0 : index
    %c0_0 = arith.constant 0 : index
    %0 = vector.load %arg5[%c0, %c0_0] : memref<1x32xf32, #tpu.memory_space<vmem>>, vector<1x32xf32>
    %c0_1 = arith.constant 0 : index
    %c0_2 = arith.constant 0 : index
    %1 = vector.load %arg6[%c0_1, %c0_2] : memref<1x32xf32, #tpu.memory_space<vmem>>, vector<1x32xf32>
    %c0_3 = arith.constant 0 : index
    %c0_4 = arith.constant 0 : index
    %c0_5 = arith.constant 0 : index
    %2 = vector.load %arg1[%c0_3, %c0_4, %c0_5] : memref<16x16x32xf32, #tpu.memory_space<vmem>>, vector<16x16x32xf32>
    %c0_6 = arith.constant 0 : index
    %c0_7 = arith.constant 0 : index
    %3 = vector.load %arg3[%c0_6, %c0_7] : memref<16x32xf32, #tpu.memory_space<vmem>>, vector<16x32xf32>
    %4 = vector.shape_cast %3 : vector<16x32xf32> to vector<1x16x32xf32>
    %5 = vector.broadcast %4 : vector<1x16x32xf32> to vector<16x16x32xf32>
    %6 = arith.addf %2, %5 : vector<16x16x32xf32>
    %cst = arith.constant dense<0.000000e+00> : vector<16x16xf32>
    %7 = vector.multi_reduction <add>, %6, %cst [2] : vector<16x16x32xf32> to vector<16x16xf32>
    %8 = vector.shape_cast %7 : vector<16x16xf32> to vector<16x16x1xf32>
    %cst_8 = arith.constant 3.200000e+01 : f32
    %9 = vector.broadcast %cst_8 : f32 to vector<16x16x1xf32>
    %10 = arith.divf %8, %9 : vector<16x16x1xf32>
    %11 = vector.broadcast %10 : vector<16x16x1xf32> to vector<16x16x32xf32>
    %12 = arith.subf %6, %11 : vector<16x16x32xf32>
    %13 = arith.mulf %12, %12 : vector<16x16x32xf32>
    %cst_9 = arith.constant dense<0.000000e+00> : vector<16x16xf32>
    %14 = vector.multi_reduction <add>, %13, %cst_9 [2] : vector<16x16x32xf32> to vector<16x16xf32>
    %15 = vector.shape_cast %14 : vector<16x16xf32> to vector<16x16x1xf32>
    %cst_10 = arith.constant 3.200000e+01 : f32
    %16 = vector.broadcast %cst_10 : f32 to vector<16x16x1xf32>
    %17 = arith.divf %15, %16 : vector<16x16x1xf32>
    %18 = vector.broadcast %10 : vector<16x16x1xf32> to vector<16x16x32xf32>
    %19 = arith.subf %6, %18 : vector<16x16x32xf32>
    %cst_11 = arith.constant 9.99999974E-6 : f32
    %20 = vector.broadcast %cst_11 : f32 to vector<16x16x1xf32>
    %21 = arith.addf %17, %20 : vector<16x16x1xf32>
    %22 = math.rsqrt %21 : vector<16x16x1xf32>
    %23 = vector.broadcast %22 : vector<16x16x1xf32> to vector<16x16x32xf32>
    %24 = arith.mulf %19, %23 : vector<16x16x32xf32>
    %25 = vector.shape_cast %0 : vector<1x32xf32> to vector<1x1x32xf32>
    %26 = vector.broadcast %25 : vector<1x1x32xf32> to vector<16x16x32xf32>
    %27 = arith.mulf %24, %26 : vector<16x16x32xf32>
    %28 = vector.shape_cast %1 : vector<1x32xf32> to vector<1x1x32xf32>
    %29 = vector.broadcast %28 : vector<1x1x32xf32> to vector<16x16x32xf32>
    %30 = arith.addf %27, %29 : vector<16x16x32xf32>
    %31 = arith.truncf %30 : vector<16x16x32xf32> to vector<16x16x32xbf16>
    %c0_12 = arith.constant 0 : index
    %c0_13 = arith.constant 0 : index
    %c0_14 = arith.constant 0 : index
    %32 = vector.load %arg2[%c0_12, %c0_13, %c0_14] : memref<16x16x32xf32, #tpu.memory_space<vmem>>, vector<16x16x32xf32>
    %c0_15 = arith.constant 0 : index
    %c0_16 = arith.constant 0 : index
    %33 = vector.load %arg4[%c0_15, %c0_16] : memref<16x32xf32, #tpu.memory_space<vmem>>, vector<16x32xf32>
    %34 = vector.shape_cast %33 : vector<16x32xf32> to vector<1x16x32xf32>
    %35 = vector.broadcast %34 : vector<1x16x32xf32> to vector<16x16x32xf32>
    %36 = arith.addf %32, %35 : vector<16x16x32xf32>
    %cst_17 = arith.constant dense<0.000000e+00> : vector<16x16xf32>
    %37 = vector.multi_reduction <add>, %36, %cst_17 [2] : vector<16x16x32xf32> to vector<16x16xf32>
    %38 = vector.shape_cast %37 : vector<16x16xf32> to vector<16x16x1xf32>
    %cst_18 = arith.constant 3.200000e+01 : f32
    %39 = vector.broadcast %cst_18 : f32 to vector<16x16x1xf32>
    %40 = arith.divf %38, %39 : vector<16x16x1xf32>
    %41 = vector.broadcast %40 : vector<16x16x1xf32> to vector<16x16x32xf32>
    %42 = arith.subf %36, %41 : vector<16x16x32xf32>
    %43 = arith.mulf %42, %42 : vector<16x16x32xf32>
    %cst_19 = arith.constant dense<0.000000e+00> : vector<16x16xf32>
    %44 = vector.multi_reduction <add>, %43, %cst_19 [2] : vector<16x16x32xf32> to vector<16x16xf32>
    %45 = vector.shape_cast %44 : vector<16x16xf32> to vector<16x16x1xf32>
    %cst_20 = arith.constant 3.200000e+01 : f32
    %46 = vector.broadcast %cst_20 : f32 to vector<16x16x1xf32>
    %47 = arith.divf %45, %46 : vector<16x16x1xf32>
    %48 = vector.broadcast %40 : vector<16x16x1xf32> to vector<16x16x32xf32>
    %49 = arith.subf %36, %48 : vector<16x16x32xf32>
    %cst_21 = arith.constant 9.99999974E-6 : f32
    %50 = vector.broadcast %cst_21 : f32 to vector<16x16x1xf32>
    %51 = arith.addf %47, %50 : vector<16x16x1xf32>
    %52 = math.rsqrt %51 : vector<16x16x1xf32>
    %53 = vector.broadcast %52 : vector<16x16x1xf32> to vector<16x16x32xf32>
    %54 = arith.mulf %49, %53 : vector<16x16x32xf32>
    %55 = vector.shape_cast %0 : vector<1x32xf32> to vector<1x1x32xf32>
    %56 = vector.broadcast %55 : vector<1x1x32xf32> to vector<16x16x32xf32>
    %57 = arith.mulf %54, %56 : vector<16x16x32xf32>
    %58 = vector.shape_cast %1 : vector<1x32xf32> to vector<1x1x32xf32>
    %59 = vector.broadcast %58 : vector<1x1x32xf32> to vector<16x16x32xf32>
    %60 = arith.addf %57, %59 : vector<16x16x32xf32>
    %61 = arith.truncf %60 : vector<16x16x32xf32> to vector<16x16x32xbf16>
    %c0_22 = arith.constant 0 : index
    %c0_23 = arith.constant 0 : index
    %62 = vector.load %arg8[%c0_22, %c0_23] : memref<32x64xbf16, #tpu.memory_space<vmem>>, vector<32x64xbf16>
    %cst_24 = arith.constant dense<0.000000e+00> : vector<16x16x64xf32>
    %63 = tpu.matmul %31, %62, %cst_24 {dimension_numbers = #tpu.dot_dimension_numbers<[2], [0], [0, 1], [1], [0, 0, 0, 1, 1, 1], [], []>} : vector<16x16x32xbf16>, vector<32x64xbf16>, vector<16x16x64xf32> -> vector<16x16x64xf32>
    %c0_25 = arith.constant 0 : index
    %c0_26 = arith.constant 0 : index
    %64 = vector.load %arg8[%c0_25, %c0_26] : memref<32x64xbf16, #tpu.memory_space<vmem>>, vector<32x64xbf16>
    %cst_27 = arith.constant dense<0.000000e+00> : vector<16x16x64xf32>
    %65 = tpu.matmul %61, %64, %cst_27 {dimension_numbers = #tpu.dot_dimension_numbers<[2], [0], [0, 1], [1], [0, 0, 0, 1, 1, 1], [], []>} : vector<16x16x32xbf16>, vector<32x64xbf16>, vector<16x16x64xf32> -> vector<16x16x64xf32>
    %66 = vector.extract_strided_slice %63 {offsets = [0, 0, 0], sizes = [16, 16, 32], strides = [1, 1, 1]} : vector<16x16x64xf32> to vector<16x16x32xf32>
    %67 = arith.truncf %66 : vector<16x16x32xf32> to vector<16x16x32xbf16>
    %68 = vector.extract_strided_slice %63 {offsets = [0, 0, 32], sizes = [16, 16, 32], strides = [1, 1, 1]} : vector<16x16x64xf32> to vector<16x16x32xf32>
    %69 = arith.truncf %68 : vector<16x16x32xf32> to vector<16x16x32xbf16>
    %70 = vector.extract_strided_slice %65 {offsets = [0, 0, 0], sizes = [16, 16, 32], strides = [1, 1, 1]} : vector<16x16x64xf32> to vector<16x16x32xf32>
    %71 = arith.truncf %70 : vector<16x16x32xf32> to vector<16x16x32xbf16>
    %72 = vector.extract_strided_slice %65 {offsets = [0, 0, 32], sizes = [16, 16, 32], strides = [1, 1, 1]} : vector<16x16x64xf32> to vector<16x16x32xf32>
    %73 = arith.truncf %72 : vector<16x16x32xf32> to vector<16x16x32xbf16>
    %c0_28 = arith.constant 0 : index
    %c0_29 = arith.constant 0 : index
    %74 = vector.load %arg7[%c0_28, %c0_29] : memref<32x32xbf16, #tpu.memory_space<vmem>>, vector<32x32xbf16>
    %cst_30 = arith.constant dense<0.000000e+00> : vector<16x16x32xf32>
    %75 = tpu.matmul %31, %74, %cst_30 {dimension_numbers = #tpu.dot_dimension_numbers<[2], [0], [0, 1], [1], [0, 0, 0, 1, 1, 1], [], []>} : vector<16x16x32xbf16>, vector<32x32xbf16>, vector<16x16x32xf32> -> vector<16x16x32xf32>
    %cst_31 = arith.constant 0.176776692 : f32
    %76 = vector.broadcast %cst_31 : f32 to vector<16x16x32xf32>
    %77 = arith.mulf %75, %76 : vector<16x16x32xf32>
    %78 = arith.truncf %77 : vector<16x16x32xf32> to vector<16x16x32xbf16>
    "tpu.trace_start"() <{level = 10 : i32, message = "bqc,bkc->bqk"}> : () -> ()
    %cst_32 = arith.constant dense<0.000000e+00> : vector<16x16x16xf32>
    %79 = tpu.matmul %78, %67, %cst_32 {dimension_numbers = #tpu.dot_dimension_numbers<[2], [2], [1], [1], [0, 0, 0, 1, 1, 1], [0], [0]>} : vector<16x16x32xbf16>, vector<16x16x32xbf16>, vector<16x16x16xf32> -> vector<16x16x16xf32>
    %cst_33 = arith.constant dense<0.000000e+00> : vector<16x16x16xf32>
    %80 = tpu.matmul %78, %71, %cst_33 {dimension_numbers = #tpu.dot_dimension_numbers<[2], [2], [1], [1], [0, 0, 0, 1, 1, 1], [0], [0]>} : vector<16x16x32xbf16>, vector<16x16x32xbf16>, vector<16x16x16xf32> -> vector<16x16x16xf32>
    "tpu.trace_stop"() : () -> ()
    %cst_34 = arith.constant dense<0xFF800000> : vector<16x16xf32>
    %81 = vector.multi_reduction <maximumf>, %79, %cst_34 [2] : vector<16x16x16xf32> to vector<16x16xf32>
    %82 = vector.shape_cast %81 : vector<16x16xf32> to vector<16x16x1xf32>
    %cst_35 = arith.constant dense<0xFF800000> : vector<16x16xf32>
    %83 = vector.multi_reduction <maximumf>, %80, %cst_35 [2] : vector<16x16x16xf32> to vector<16x16xf32>
    %84 = vector.shape_cast %83 : vector<16x16xf32> to vector<16x16x1xf32>
    %85 = arith.maximumf %82, %84 : vector<16x16x1xf32>
    %86 = vector.broadcast %85 : vector<16x16x1xf32> to vector<16x16x16xf32>
    %87 = arith.subf %79, %86 : vector<16x16x16xf32>
    %88 = math.exp %87 : vector<16x16x16xf32>
    %89 = vector.broadcast %85 : vector<16x16x1xf32> to vector<16x16x16xf32>
    %90 = arith.subf %80, %89 : vector<16x16x16xf32>
    %91 = math.exp %90 : vector<16x16x16xf32>
    %cst_36 = arith.constant dense<0.000000e+00> : vector<16x16xf32>
    %92 = vector.multi_reduction <add>, %88, %cst_36 [2] : vector<16x16x16xf32> to vector<16x16xf32>
    %93 = vector.shape_cast %92 : vector<16x16xf32> to vector<16x16x1xf32>
    %cst_37 = arith.constant dense<0.000000e+00> : vector<16x16xf32>
    %94 = vector.multi_reduction <add>, %91, %cst_37 [2] : vector<16x16x16xf32> to vector<16x16xf32>
    %95 = vector.shape_cast %94 : vector<16x16xf32> to vector<16x16x1xf32>
    %96 = arith.addf %93, %95 : vector<16x16x1xf32>
    %97 = arith.truncf %88 : vector<16x16x16xf32> to vector<16x16x16xbf16>
    "tpu.trace_start"() <{level = 10 : i32, message = "bqk,bkc->bqc"}> : () -> ()
    %cst_38 = arith.constant dense<0.000000e+00> : vector<16x16x32xf32>
    %98 = tpu.matmul %97, %69, %cst_38 {dimension_numbers = #tpu.dot_dimension_numbers<[2], [1], [1], [2], [0, 0, 0, 1, 1, 2], [0], [0]>} : vector<16x16x16xbf16>, vector<16x16x32xbf16>, vector<16x16x32xf32> -> vector<16x16x32xf32>
    "tpu.trace_stop"() : () -> ()
    %99 = arith.truncf %91 : vector<16x16x16xf32> to vector<16x16x16xbf16>
    "tpu.trace_start"() <{level = 10 : i32, message = "bqk,bkc->bqc"}> : () -> ()
    %cst_39 = arith.constant dense<0.000000e+00> : vector<16x16x32xf32>
    %100 = tpu.matmul %99, %73, %cst_39 {dimension_numbers = #tpu.dot_dimension_numbers<[2], [1], [1], [2], [0, 0, 0, 1, 1, 2], [0], [0]>} : vector<16x16x16xbf16>, vector<16x16x32xbf16>, vector<16x16x32xf32> -> vector<16x16x32xf32>
    "tpu.trace_stop"() : () -> ()
    %101 = arith.addf %98, %100 : vector<16x16x32xf32>
    %102 = tpu.reciprocal %96 {approx = true} : vector<16x16x1xf32> -> vector<16x16x1xf32>
    %103 = vector.broadcast %102 : vector<16x16x1xf32> to vector<16x16x32xf32>
    %104 = arith.mulf %101, %103 : vector<16x16x32xf32>
    %105 = arith.truncf %104 : vector<16x16x32xf32> to vector<16x16x32xbf16>
    %c0_40 = arith.constant 0 : index
    %c0_41 = arith.constant 0 : index
    %106 = vector.load %arg9[%c0_40, %c0_41] : memref<32x32xbf16, #tpu.memory_space<vmem>>, vector<32x32xbf16>
    %cst_42 = arith.constant dense<0.000000e+00> : vector<16x16x32xf32>
    %107 = tpu.matmul %105, %106, %cst_42 {dimension_numbers = #tpu.dot_dimension_numbers<[2], [0], [0, 1], [1], [0, 0, 0, 1, 1, 1], [], []>} : vector<16x16x32xbf16>, vector<32x32xbf16>, vector<16x16x32xf32> -> vector<16x16x32xf32>
    %c0_43 = arith.constant 0 : index
    %c0_44 = arith.constant 0 : index
    %108 = vector.load %arg10[%c0_43, %c0_44] : memref<1x32xf32, #tpu.memory_space<vmem>>, vector<1x32xf32>
    %109 = vector.shape_cast %108 : vector<1x32xf32> to vector<1x1x32xf32>
    %110 = vector.broadcast %109 : vector<1x1x32xf32> to vector<16x16x32xf32>
    %111 = arith.addf %107, %110 : vector<16x16x32xf32>
    %c0_45 = arith.constant 0 : index
    %c0_46 = arith.constant 0 : index
    %c0_47 = arith.constant 0 : index
    %112 = vector.load %arg11[%c0_45, %c0_46, %c0_47] : memref<16x16x32xf32, #tpu.memory_space<vmem>>, vector<16x16x32xf32>
    tpu.vector_store %arg11[%c0_45, %c0_46, %c0_47], %111 {strides = array<i32>} : memref<16x16x32xf32, #tpu.memory_space<vmem>>, vector<16x16x32xf32>,
    return
  }
  func.func @transform_0(%arg0: i32) -> (i32, i32, i32) {
    %c0_i32 = arith.constant 0 : i32
    %c0_i32_0 = arith.constant 0 : i32
    %c0_i32_1 = arith.constant 0 : i32
    return %arg0, %c0_i32, %c0_i32_0 : i32, i32, i32
  }
  func.func @transform_1(%arg0: i32) -> (i32, i32, i32) {
    %c0_i32 = arith.constant 0 : i32
    %c0_i32_0 = arith.constant 0 : i32
    %c0_i32_1 = arith.constant 0 : i32
    return %arg0, %c0_i32, %c0_i32_0 : i32, i32, i32
  }
  func.func @transform_2(%arg0: i32) -> (i32, i32) {
    %c0_i32 = arith.constant 0 : i32
    %c0_i32_0 = arith.constant 0 : i32
    %c0_i32_1 = arith.constant 0 : i32
    return %c0_i32, %c0_i32_0 : i32, i32
  }
  func.func @transform_3(%arg0: i32) -> (i32, i32) {
    %c0_i32 = arith.constant 0 : i32
    %c0_i32_0 = arith.constant 0 : i32
    %c0_i32_1 = arith.constant 0 : i32
    return %c0_i32, %c0_i32_0 : i32, i32
  }
  func.func @transform_4(%arg0: i32) -> (i32, i32) {
    %c0_i32 = arith.constant 0 : i32
    %c0_i32_0 = arith.constant 0 : i32
    %c0_i32_1 = arith.constant 0 : i32
    return %c0_i32, %c0_i32_0 : i32, i32
  }
  func.func @transform_5(%arg0: i32) -> (i32, i32) {
    %c0_i32 = arith.constant 0 : i32
    %c0_i32_0 = arith.constant 0 : i32
    %c0_i32_1 = arith.constant 0 : i32
    return %c0_i32, %c0_i32_0 : i32, i32
  }
  func.func @transform_6(%arg0: i32) -> (i32, i32) {
    %c0_i32 = arith.constant 0 : i32
    %c0_i32_0 = arith.constant 0 : i32
    %c0_i32_1 = arith.constant 0 : i32
    return %c0_i32, %c0_i32_0 : i32, i32
  }
  func.func @transform_7(%arg0: i32) -> (i32, i32) {
    %c0_i32 = arith.constant 0 : i32
    %c0_i32_0 = arith.constant 0 : i32
    %c0_i32_1 = arith.constant 0 : i32
    return %c0_i32, %c0_i32_0 : i32, i32
  }
  func.func @transform_8(%arg0: i32) -> (i32, i32) {
    %c0_i32 = arith.constant 0 : i32
    %c0_i32_0 = arith.constant 0 : i32
    %c0_i32_1 = arith.constant 0 : i32
    return %c0_i32, %c0_i32_0 : i32, i32
  }
  func.func @transform_9(%arg0: i32) -> (i32, i32) {
    %c0_i32 = arith.constant 0 : i32
    %c0_i32_0 = arith.constant 0 : i32
    %c0_i32_1 = arith.constant 0 : i32
    return %c0_i32, %c0_i32_0 : i32, i32
  }
  func.func @transform_10(%arg0: i32) -> (i32, i32, i32) {
    %c0_i32 = arith.constant 0 : i32
    %c0_i32_0 = arith.constant 0 : i32
    %c0_i32_1 = arith.constant 0 : i32
    return %arg0, %c0_i32, %c0_i32_0 : i32, i32, i32
  }
}

</mosaic_0001>

<bundles_post_ra>
// kernel: tpu_custom_call.1
= control target key start
LH: loop header
LB: loop body
LE: loop exit
PB: predicated region body
PF: predicated region fallthrough
CT: control target
= control target key end

     0   :  { %s11311_s0 = inlined_call_operand.hbm [shape: f32[32,16,32], index: 0, kind: input, shape index: {}]   ;;  %s11312_s1 = inlined_call_operand.hbm [shape: f32[32,16,32], index: 1, kind: input, shape index: {}]   ;;  %s11313_s2 = inlined_call_operand.hbm [shape: f32[16,32], index: 2, kind: input, shape index: {}]   ;;  %s11314_s3 = inlined_call_operand.hbm [shape: f32[16,32], index: 3, kind: input, shape index: {}]   ;;  %s11315_s4 = inlined_call_operand.vmem [shape: f32[1,32], index: 4, kind: input, shape index: {}]   ;;  %s11316_s5 = inlined_call_operand.vmem [shape: f32[1,32], index: 5, kind: input, shape index: {}]   ;;  %s11317_s6 = inlined_call_operand.hbm [shape: bf16[32,32], index: 6, kind: input, shape index: {}]   ;;  %s11318_s7 = inlined_call_operand.hbm [shape: bf16[32,64], index: 7, kind: input, shape index: {}]   ;;  %s11319_s8 = inlined_call_operand.hbm [shape: bf16[32,32], index: 8, kind: input, shape index: {}]   ;;  %s11320_s9 = inlined_call_operand.vmem [shape: f32[1,32], index: 9, kind: input, shape index: {}]   ;;  %s11321_s10 = inlined_call_operand.hbm [shape: f32[32,16,32], index: 10, kind: output, shape index: {}]  }
   0x1   :  { %11411 = sst [smem:[#allocation86_spill]] %s11311_s0 }
   0x2   :  { %11412 = sst [smem:[#allocation87_spill]] %s11313_s2 }
   0x3   :  { %11413 = sst [smem:[#allocation88_spill]] %s11314_s3 }
   0x4   :  { %11414 = sst [smem:[#allocation89_spill]] %s11317_s6 }
   0x5   :  { %11415 = sst [smem:[#allocation90_spill]] %s11318_s7 }
   0x6   :  { %11416 = sst [smem:[#allocation91_spill]] %s11319_s8 }
   0x7   :  { %15 = vsyncpa [#allocation3], 0 }
   0x8   :  { %17 = vsyncpa [#allocation3 + $0x1], 0 }
   0x9   :  { %18 = vsyncpa [#allocation6], 0 }
   0xa   :  { %20 = vsyncpa [#allocation6 + $0x1], 0 }
   0xb   :  { %21 = vsyncpa [#allocation9], 0 }
   0xc   :  { %22 = vsyncpa [#allocation12], 0 }
   0xd   :  { %23 = vsyncpa [#allocation4], 0 }
   0xe   :  { %25 = vsyncpa [#allocation4 + $0x1], 0  ;;  %s8181_s13 = smov 0   ;;  %s8183_s14 = smov 0  }
   0xf   :  { %s8185_s15 = smov 0   ;;  %s8187_s16 = smov 0  }
  0x10 LB: > { %11417 = sst [smem:[#allocation21_spill]] %s8103_s15  ;;  %s8109_s17 = smov [#allocation7]   ;;  %s8107_s16 = sphi %s8187_s16, %s11670_s16   ;;  %s8103_s15 = sphi %s8185_s15, %s11672_s15   ;;  %s8099_s14 = sphi %s8183_s14, %s11674_s14   ;;  %s8095_s13 = sphi %s8181_s13, %s11673_s13  }
  0x11   : > { %s294_s18 = sshll.u32 %s8109_s17, 4  ;;  %s8202_s19 = sadd.s32 4294967295, %s8107_s16   ;;  %s295_s18 = int_to_ptr.vmem [resolvable:$true] %s294_s18 }
  0x12   : > { %p6495_p0 = scmp.ge.s32.totalorder %s8107_s16, 1  ;;  %p11327_p1 = scmp.eq.s32.totalorder %s8202_s19, 0 }
  0x13   : > { %p282_p2 = scmp.lt.s32.totalorder %s8107_s16, 3  ;;  %s8110_s21 = smov [#allocation8]  }
  0x14   : > { %s307_s22 = sshll.u32 %s8110_s21, 4  ;;  %s8111_s24 = smov [#allocation11]   ;;  %s308_s22 = int_to_ptr.vmem [resolvable:$true] %s307_s22 }
  0x15   : > { %p8207_p3 = pnand %p6495_p0, %p282_p2  ;;  %s339_s25 = sshll.u32 %s8111_s24, 4  ;;  %s340_s25 = int_to_ptr.vmem [resolvable:$true] %s339_s25 }
  0x16   : > { %s7852_s27 = scalar_lea.vmem %s295_s18, 256  ;;  %p7860_p11 = scmp.lt.s32.totalorder %s295_s18, %s295_s18 }
  0x17   : > { %p7426_p5 = pneg %p8207_p3  ;;  %p7853_p8 = scmp.ne.s32.totalorder %s295_s18, %s7852_s27 }
  0x18   : > { %p7861_p12 = scmp.lt.s32.totalorder %s7852_s27, %s7852_s27 }
  0x19   : > { %p8216_p6 = pnand %p7426_p5, %p11327_p1 }
  0x1a   : > { %p7862_p13 = por %p7861_p12, %p7860_p11 }
  0x1b   : > { %p8222_p7 = pneg %p8216_p6 }
  0x1d   : > { %p7855_p9 = pnand %p7853_p8, %p8222_p7 }
  0x1f   : > { %p7856_p10 = pneg %p7855_p9 }
  0x21   : > { %p7863_p0 = pnand %p7862_p13, %p7856_p10 }
  0x23   : > { %7866 = shalt.err (!%p7863_p0)
}
  0x24   : > { %s11322_s28 = smov 128   ;;  %s11324_s29 = smov 8  }
  0x25   : > { %s11421_s2 = sld [smem:[#allocation87_spill]]  ;;  %s7878_s12 = scalar_lea.vmem %s308_s22, 256 }
  0x26   : > { %p7879_p2 = scmp.ne.s32.totalorder %s308_s22, %s7878_s12  ;;  %p7886_p9 = scmp.lt.s32.totalorder %s308_s22, %s308_s22 }
  0x27   : > { %p7887_p10 = scmp.lt.s32.totalorder %s7878_s12, %s7878_s12 }
  0x28   : > { %p7881_p5 = pnand %p7879_p2, %p8222_p7 }
  0x29   : > { %p7888_p11 = por %p7887_p10, %p7886_p9 }
  0x2a   : > { %p7882_p8 = pneg %p7881_p5 }
  0x2b   : > { %7429 = dma.hbm_to_vmem [thread:$0]  (!%p8216_p6), %s11421_s2, 256, %s295_s18, [#allocation6], %s11322_s28, %s11322_s28, %s11324_s29  }
  0x2c   : > { %p7889_p12 = pnand %p7888_p11, %p7882_p8 }
  0x2e   : > { %7892 = shalt.err (!%p7889_p12)
}
  0x2f   : > { %s11422_s3 = sld [smem:[#allocation88_spill]]  ;;  %s7904_s18 = scalar_lea.vmem %s340_s25, 256 }
  0x30   : > { %p7905_p13 = scmp.ne.s32.totalorder %s340_s25, %s7904_s18  ;;  %p7912_p5 = scmp.lt.s32.totalorder %s340_s25, %s340_s25 }
  0x31   : > { %p7913_p9 = scmp.lt.s32.totalorder %s7904_s18, %s7904_s18 }
  0x32   : > { %p7907_p0 = pnand %p7905_p13, %p8222_p7 }
  0x33   : > { %p7914_p8 = por %p7913_p9, %p7912_p5 }
  0x34   : > { %p7908_p2 = pneg %p7907_p0 }
  0x35   : > { %7432 = dma.hbm_to_vmem [thread:$0]  (!%p8216_p6), %s11422_s3, 256, %s308_s22, [#allocation9], %s11322_s28, %s11322_s28, %s11324_s29  }
  0x36   : > { %p7915_p10 = pnand %p7914_p8, %p7908_p2 }
  0x38   : > { %7918 = shalt.err (!%p7915_p10)
}
  0x39   : > { %s8114_s24 = smov 64   ;;  %s8115_s27 = smov 4  }
  0x3a   : > { %s11423_s7 = sld [smem:[#allocation90_spill]]  ;;  %s8116_s11 = smov [#allocation10]  }
  0x3b   : > { %s326_s12 = sshll.u32 %s8116_s11, 4  ;;  %s8117_s17 = smov [#allocation13]   ;;  %s327_s12 = int_to_ptr.vmem [resolvable:$true] %s326_s12 }
  0x3c   : > { %s352_s21 = sshll.u32 %s8117_s17, 4  ;;  %s7930_s18 = scalar_lea.vmem %s327_s12, 256  ;;  %s353_s21 = int_to_ptr.vmem [resolvable:$true] %s352_s21 }
  0x3d   : > { %p7931_p11 = scmp.ne.s32.totalorder %s327_s12, %s7930_s18  ;;  %p7938_p0 = scmp.lt.s32.totalorder %s327_s12, %s327_s12 }
  0x3e   : > { %p7939_p2 = scmp.lt.s32.totalorder %s7930_s18, %s7930_s18 }
  0x3f   : > { %p7933_p12 = pnand %p7931_p11, %p8222_p7 }
  0x40   : > { %7438 = dma.hbm_to_vmem [thread:$0]  (!%p8216_p6), %s11423_s7, 256, %s340_s25, [#allocation12], %s8114_s24, %s8114_s24, %s8115_s27  }
  0x41   : > { %p7934_p13 = pneg %p7933_p12  ;;  %p7940_p5 = por %p7939_p2, %p7938_p0 }
  0x43   : > { %p7941_p9 = pnand %p7940_p5, %p7934_p13 }
  0x45   : > { %7944 = shalt.err (!%p7941_p9)
}
  0x46   : > { %s11424_s6 = sld [smem:[#allocation89_spill]]  ;;  %s7956_s30 = scalar_lea.vmem %s353_s21, 256 }
  0x47   : > { %p7957_p8 = scmp.ne.s32.totalorder %s353_s21, %s7956_s30  ;;  %p7964_p12 = scmp.lt.s32.totalorder %s353_s21, %s353_s21 }
  0x48   : > { %p7965_p0 = scmp.lt.s32.totalorder %s7956_s30, %s7956_s30 }
  0x49   : > { %p7959_p10 = pnand %p7957_p8, %p8222_p7 }
  0x4a   : > { %p7966_p13 = por %p7965_p0, %p7964_p12 }
  0x4b   : > { %p7960_p11 = pneg %p7959_p10 }
  0x4c   : > { %7435 = dma.hbm_to_vmem [thread:$0]  (!%p8216_p6), %s11424_s6, 256, %s327_s12, [#allocation9], %s8114_s24, %s8114_s24, %s8115_s27  }
  0x4d   : > { %p7967_p2 = pnand %p7966_p13, %p7960_p11 }
  0x4f   : > { %7970 = shalt.err (!%p7967_p2)
}
  0x50   : > { %s11425_s8 = sld [smem:[#allocation91_spill]]  ;;  %s6494_s23 = sadd.s32 4294967294, %s8107_s16  }
  0x51   : > { %s8278_s26 = sadd.s32 1, %s8107_s16   ;;  %s38_s12 = sadd.s32 1, %s8103_s15 }
  0x52   : > { %11426 = sst [smem:[#allocation22_spill]] %s8278_s26  ;;  %s35_s18 = ssub.s32 %s8107_s16, %s8278_s26 }
  0x53   : > { %p45_p7 = scmp.ne.s32.totalorder %s8103_s15, %s8099_s14  ;;  %p36_p5 = scmp.eq.s32.totalorder %s35_s18, 0 }
  0x54   : > { %p46_p9 = scmp.eq.s32.totalorder %s8107_s16, 0  ;;  %p51_p8 = scmp.ne.s32.totalorder %s8099_s14, %s8095_s13 }
  0x55   : > { %p269_p10 = scmp.eq.s32.totalorder %s8202_s19, 1  ;;  %p275_p0 = scmp.eq.s32.totalorder %s6494_s23, 1 }
  0x56   : > { %7441 = dma.hbm_to_vmem [thread:$0]  (!%p8216_p6), %s11425_s8, 256, %s353_s21, [#allocation12], %s8114_s24, %s8114_s24, %s8115_s27  }
  0x57   : > { %s8290_s25 = scalar_select %p36_p5, %s8103_s15, %s38_s12  }
  0x58   : > { %p47_p11 = por %p46_p9, %p45_p7  ;;  %p8294_p12 = por %p11327_p1, %p51_p8 }
  0x59   : > { %11427 = sst [smem:[#allocation23_spill]] %s8290_s25  ;;  %p8298_p6 = por %p269_p10, %p45_p7 }
  0x5a   : > { %s11428_s22 = scalar_select %p8294_p12, 1, 0 }
  0x5b   : > { %s11429_s24 = scalar_select %p8298_p6, 1, 0 }
  0x5c   : > { %p7458_p13 = scmp.lt.s32.totalorder %s8107_s16, 2  ;;  %s369_s27 = sand.u32 1, %s8103_s15  }
  0x5d   : > { %p8304_p2 = por %p275_p0, %p51_p8  ;;  %s8308_s30 = sshll.u32 %s369_s27, 8 }
  0x5e   : > { %s6663_s11 = sshll.u32 %s8107_s16, 12  ;;  %s11431_s0 = sld [smem:[#allocation86_spill]] }
  0x5f   : > { %s11430_s21 = scalar_select %p8304_p2, 1, 0 }
  0x60   : > { %s373_s28 = scalar_lea.vmem [#allocation2], %s8308_s30  ;;  %p8317_p7 = pnand %p7458_p13, %p47_p11 }
  0x61   : > { %s381_s23 = sshll.u32 %s373_s28, 4  ;;  %s8326_s6 = scalar_lea.hbm %s11312_s1, %s6663_s11  ;;  %s8321_s23 = int_to_ptr.vmem [resolvable:$true] %s381_s23 }
  0x62   : > { %s8328_s17 = scalar_lea.sflag [#allocation3], %s369_s27  ;;  %p7973_p9 = pneg %p8317_p7 }
  0x64   : > { %s8314_s18 = scalar_lea.hbm %s11431_s0, %s6663_s11  ;;  %s7976_s8 = scalar_lea.hbm %s11431_s0, 8192 }
  0x65   : > { %s7971_s12 = scalar_lea.hbm %s8314_s18, 4096  ;;  %p7977_p11 = scmp.lt.s32.totalorder %s8314_s18, %s11431_s0 }
  0x66   : > { %p7972_p5 = scmp.ne.s32.totalorder %s8314_s18, %s7971_s12  ;;  %p7978_p0 = scmp.lt.s32.totalorder %s7976_s8, %s7971_s12 }
  0x68   : > { %p7974_p8 = pnand %p7973_p9, %p7972_p5  ;;  %p7979_p13 = por %p7978_p0, %p7977_p11 }
  0x6a   : > { %p7975_p10 = pneg %p7974_p8 }
  0x6c   : > { %p7980_p4 = pnand %p7979_p13, %p7975_p10 }
  0x6e   : > { %7983 = shalt.err (!%p7980_p4)
}
  0x6f   : > { %s7984_s2 = scalar_lea.vmem %s8321_s23, 4096  ;;  %s8118_s3 = smov [#allocation2]  }
  0x70   : > { %p7985_p1 = scmp.ne.s32.totalorder %s8321_s23, %s7984_s2  ;;  %s7989_s7 = sshll.u32 %s8118_s3, 4  ;;  %s7990_s7 = int_to_ptr.vmem [resolvable:$false] %s7989_s7 }
  0x71   : > { %s7991_s27 = scalar_lea.vmem %s7990_s7, 8192  ;;  %p7992_p2 = scmp.lt.s32.totalorder %s8321_s23, %s7990_s7 }
  0x72   : > { %p7987_p5 = pnand %p7985_p1, %p7973_p9  ;;  %p7993_p6 = scmp.lt.s32.totalorder %s7991_s27, %s7984_s2 }
  0x74   : > { %p7988_p8 = pneg %p7987_p5  ;;  %p7994_p12 = por %p7993_p6, %p7992_p2 }
  0x76   : > { %p7995_p11 = pnand %p7994_p12, %p7988_p8 }
  0x78   : > { %7998 = shalt.err (!%p7995_p11)
}
  0x79   : > { %s11433_s8 = smov 8   ;;  %s11434_s15 = smov 128  }
  0x7a   : > { %7445 = dma.hbm_to_vmem [thread:$0]  (!%p8317_p7), %s8314_s18, 4096, %s8321_s23, %s8328_s17, %s11434_s15, %s11434_s15, %s11433_s8  }
  0x7b   : > { %s395_s25 = scalar_lea.vmem [#allocation5], %s8308_s30  ;;  %s391_s12 = sand.u32 1, %s8107_s16  }
  0x7c   : > { %s403_s11 = sshll.u32 %s395_s25, 4  ;;  %s392_s28 = scalar_lea.sflag [#allocation6], %s391_s12  ;;  %s8360_s11 = int_to_ptr.vmem [resolvable:$true] %s403_s11 }
  0x7d   : > { %s7999_s2 = scalar_lea.hbm %s8326_s6, 4096  ;;  %s8004_s27 = scalar_lea.hbm %s11312_s1, 8192 }
  0x7e   : > { %p8000_p1 = scmp.ne.s32.totalorder %s8326_s6, %s7999_s2  ;;  %p8005_p6 = scmp.lt.s32.totalorder %s8326_s6, %s11312_s1 }
  0x7f   : > { %p8006_p2 = scmp.lt.s32.totalorder %s8004_s27, %s7999_s2 }
  0x80   : > { %p8002_p4 = pnand %p8000_p1, %p7973_p9 }
  0x81   : > { %p8007_p10 = por %p8006_p2, %p8005_p6 }
  0x82   : > { %p8003_p12 = pneg %p8002_p4 }
  0x84   : > { %p8008_p0 = pnand %p8007_p10, %p8003_p12 }
  0x86   : > { %8011 = shalt.err (!%p8008_p0)
}
  0x87   : > { %s8012_s30 = scalar_lea.vmem %s8360_s11, 4096  ;;  %s8119_s18 = smov [#allocation5]  }
  0x88   : > { %p8013_p13 = scmp.ne.s32.totalorder %s8360_s11, %s8012_s30  ;;  %s8017_s23 = sshll.u32 %s8119_s18, 4  ;;  %s8018_s23 = int_to_ptr.vmem [resolvable:$false] %s8017_s23 }
  0x89   : > { %s8019_s17 = scalar_lea.vmem %s8018_s23, 8192  ;;  %p8020_p11 = scmp.lt.s32.totalorder %s8360_s11, %s8018_s23 }
  0x8a   : > { %p8015_p5 = pnand %p8013_p13, %p7973_p9  ;;  %p8021_p1 = scmp.lt.s32.totalorder %s8019_s17, %s8012_s30 }
  0x8c   : > { %p8016_p8 = pneg %p8015_p5  ;;  %p8022_p4 = por %p8021_p1, %p8020_p11 }
  0x8e   : > { %p8023_p6 = pnand %p8022_p4, %p8016_p8 }
  0x90   : > { %8026 = shalt.err (!%p8023_p6)
}
  0x91   : > { %7448 = dma.hbm_to_vmem [thread:$0]  (!%p8317_p7), %s8326_s6, 4096, %s8360_s11, %s392_s28, %s11434_s15, %s11434_s15, %s11433_s8  }
  0x92   : > { %415 = sbr.rel (%p8207_p3) target bundleno = 1866 (0x74a), region = 60 }
  0x97   : > { %s8390_s0 = sand.u32 1, %s8099_s14   ;;  %p11435_p9 = scmp.ne.s32.totalorder %s11428_s22, 0 }
  0x98   : > { %s8393_s26 = sshll.u32 %s8390_s0, 8  ;;  %s418_s25 = scalar_lea.sflag [#allocation3], %s8390_s0 }
  0x99   : > { %s8397_s29 = scalar_lea.vmem [#allocation2], %s8393_s26 }
  0x9a   : > { %8070 = dma.done.wait (%p11435_p9), %s418_s25, 4096  }
  0x9b   : > { %8072 = vsyncadd (%p11435_p9), %s418_s25, 4294963200  ;;  %s426_s6 = sand.u32 1, %s8202_s19   ;;  %s8405_s8 = scalar_lea.vmem [#allocation5], %s8393_s26 }
  0x9c   : > { %s427_s20 = scalar_lea.sflag [#allocation6], %s426_s6 }
  0x9d   : > { %8074 = dma.done.wait (%p11435_p9), %s427_s20, 4096  }
  0x9e   : > { %8076 = vsyncadd (%p11435_p9), %s427_s20, 4294963200  ;;  %p11436_p3 = scmp.eq.s32.totalorder %s8202_s19, 0 }
  0xa0   : > { %8078 = dma.done.wait (%p11436_p3), [#allocation6], 256   ;;  %p11437_p7 = pmov %p11436_p3 }
  0xa1   : > { %p11438_p12 = pmov %p11436_p3 }
  0xa2   : > { %8080 = vsyncadd (%p11437_p7), [#allocation6], 4294967040 }
  0xa3   : > { %8082 = dma.done.wait (%p11438_p12), [#allocation9], 512   ;;  %p11439_p2 = pmov %p11436_p3 }
  0xa5   : > { %8084 = vsyncadd (%p11439_p2), [#allocation9], 4294966784  ;;  %p11440_p10 = pmov %p11439_p2 }
  0xa6   : > { %p11441_p0 = pmov %p11439_p2 }
  0xa7   : > { %8086 = dma.done.wait (%p11440_p10), [#allocation12], 512  }
  0xa8   : > { %8088 = vsyncadd (%p11441_p0), [#allocation12], 4294966784  ;;  %v498_v0 = vld [vmem:[%s8397_s29] sm:$0xff]  ;;  %vm564_vm0 = vcmask 261120   ;;  %v500_v2 = vld [vmem:[%s8397_s29 + $0x10] sm:$0xff]  ;;  %vm8121_vm1 = vmmov 0  }
  0xa9   : > { %v8424_v1 = vld [vmem:[#allocation7] sm:$0xff]  ;;  %v499_v5 = vld [vmem:[%s8397_s29 + $0x8] sm:$0xff]  ;;  %v501_v7 = vld [vmem:[%s8397_s29 + $0x18] sm:$0xff]  ;;  %s8122_s27 = smov 96   ;;  %vm3783_vm2 = vcmask 130048   ;;  %s11164_s23 = scalar_lea.vmem [#allocation14], %s8393_s26 }
  0xaa   : > { %v8428_v3 = vadd.f32 %v8424_v1, %v498_v0  ;;  %v8431_v4 = vadd.f32 %v8424_v1, %v500_v2  ;;  %v8434_v6 = vld [vmem:[#allocation7 + $0x8] sm:$0xff]  ;;  %v502_v10 = vld [vmem:[%s8397_s29 + $0x20] sm:$0xff]  ;;  %v504_v18 = vld [vmem:[%s8397_s29 + $0x30] sm:$0xff]  ;;  %s6667_s17 = sshll.u32 %s8202_s19, 12  ;;  %s6351_s26 = sshll.u32 %s11164_s23, 4  ;;  %s11263_s26 = int_to_ptr.vmem [resolvable:$true] %s6351_s26 }
  0xab   : > { %v8438_v8 = vadd.f32 %v8434_v6, %v499_v5  ;;  %v8441_v9 = vadd.f32 %v8434_v6, %v501_v7  ;;  %v503_v11 = vld [vmem:[%s8397_s29 + $0x28] sm:$0xff]  ;;  %v8454_v16 = vadd.f32 %v8424_v1, %v502_v10  ;;  %v505_v19 = vld [vmem:[%s8397_s29 + $0x38] sm:$0xff]  ;;  %v8466_v22 = vadd.f32 %v8424_v1, %v504_v18  ;;  %v506_v24 = vld [vmem:[%s8397_s29 + $0x40] sm:$0xff]  ;;  %s11261_s6 = scalar_lea.hbm %s11321_s10, %s6667_s17  ;;  %s6337_s19 = scalar_lea.sflag [#allocation4], %s8390_s0 }
  0xac   : > { %v565_v12 = vsel %vm564_vm0, %v8428_v3, 0.0  ;;  %v571_v13 = vsel %vm564_vm0, %v8431_v4, 0.0  ;;  %v8457_v17 = vadd.f32 %v8434_v6, %v503_v11  ;;  %v8469_v23 = vadd.f32 %v8434_v6, %v505_v19  ;;  %v507_v25 = vld [vmem:[%s8397_s29 + $0x48] sm:$0xff]  ;;  %v508_v26 = vld [vmem:[%s8397_s29 + $0x50] sm:$0xff]  ;;  %v509_v31 = vld [vmem:[%s8397_s29 + $0x58] sm:$0xff]  ;;  %s8027_s20 = scalar_lea.vmem %s11263_s26, 4096 }
  0xad   : > { %566 = vadd.xlane.f32.xlu0 %v565_v12  ;;  %572 = vadd.xlane.f32.xlu1 %v571_v13  ;;  %v568_v14 = vsel %vm564_vm0, %v8438_v8, 0.0  ;;  %v574_v15 = vsel %vm564_vm0, %v8441_v9, 0.0  ;;  %v577_v20 = vsel %vm564_vm0, %v8454_v16, 0.0  ;;  %v583_v27 = vsel %vm564_vm0, %v8466_v22, 0.0  ;;  %v510_v36 = vld [vmem:[%s8397_s29 + $0x60] sm:$0xff]  ;;  %v511_v37 = vld [vmem:[%s8397_s29 + $0x68] sm:$0xff]  ;;  %p8028_p13 = scmp.ne.s32.totalorder %s11263_s26, %s8027_s20 }
  0xae   : > { %v580_v21 = vsel %vm564_vm0, %v8457_v17, 0.0  ;;  %v586_v28 = vsel %vm564_vm0, %v8469_v23, 0.0  ;;  %v8479_v29 = vadd.f32 %v8424_v1, %v506_v24  ;;  %v8482_v30 = vadd.f32 %v8434_v6, %v507_v25  ;;  %v512_v42 = vld [vmem:[%s8397_s29 + $0x70] sm:$0xff]  ;;  %v513_v43 = vld [vmem:[%s8397_s29 + $0x78] sm:$0xff]  ;;  %v514_v48 = vld [vmem:[%s8397_s29 + $0x80] sm:$0xff]  ;;  %p11667_p5 = scmp.ne.s32.totalorder %s11429_s24, 0 }
  0xaf   : > { %v8490_v34 = vadd.f32 %v8424_v1, %v508_v26  ;;  %v8493_v35 = vadd.f32 %v8434_v6, %v509_v31  ;;  %v8502_v40 = vadd.f32 %v8424_v1, %v510_v36  ;;  %v8505_v41 = vadd.f32 %v8434_v6, %v511_v37  ;;  %v515_v49 = vld [vmem:[%s8397_s29 + $0x88] sm:$0xff]  ;;  %v516_v54 = vld [vmem:[%s8397_s29 + $0x90] sm:$0xff]  ;;  %v517_v55 = vld [vmem:[%s8397_s29 + $0x98] sm:$0xff] }
  0xb0   : > { %v589_v32 = vsel %vm564_vm0, %v8479_v29, 0.0  ;;  %v592_v33 = vsel %vm564_vm0, %v8482_v30, 0.0  ;;  %v8514_v46 = vadd.f32 %v8424_v1, %v512_v42  ;;  %v8517_v47 = vadd.f32 %v8434_v6, %v513_v43  ;;  %v518_v60 = vld [vmem:[%s8397_s29 + $0xa0] sm:$0xff]  ;;  %v519_v61 = vld [vmem:[%s8397_s29 + $0xa8] sm:$0xff]  ;;  %v520_v5 = vld [vmem:[%s8397_s29 + $0xb0] sm:$0xff]  ;;  %p8029_p8 = pnand %p8028_p13, %p11667_p5 }
  0xb1   : > { %569 = vadd.xlane.f32.xlu0 %v568_v14  ;;  %575 = vadd.xlane.f32.xlu1 %v574_v15  ;;  %v595_v38 = vsel %vm564_vm0, %v8490_v34, 0.0  ;;  %v598_v39 = vsel %vm564_vm0, %v8493_v35, 0.0  ;;  %v601_v44 = vsel %vm564_vm0, %v8502_v40, 0.0  ;;  %v604_v45 = vsel %vm564_vm0, %v8505_v41, 0.0  ;;  %v521_v7 = vld [vmem:[%s8397_s29 + $0xb8] sm:$0xff]  ;;  %v522_v14 = vld [vmem:[%s8397_s29 + $0xc0] sm:$0xff] }
  0xb2   : > { %v607_v50 = vsel %vm564_vm0, %v8514_v46, 0.0  ;;  %v610_v51 = vsel %vm564_vm0, %v8517_v47, 0.0  ;;  %v8526_v52 = vadd.f32 %v8424_v1, %v514_v48  ;;  %v8529_v53 = vadd.f32 %v8434_v6, %v515_v49  ;;  %v523_v15 = vld [vmem:[%s8397_s29 + $0xc8] sm:$0xff]  ;;  %v524_v24 = vld [vmem:[%s8397_s29 + $0xd0] sm:$0xff]  ;;  %v525_v25 = vld [vmem:[%s8397_s29 + $0xd8] sm:$0xff]  ;;  %p8030_p11 = pneg %p8029_p8 }
  0xb3   : > { %v8538_v58 = vadd.f32 %v8424_v1, %v516_v54  ;;  %v8541_v59 = vadd.f32 %v8434_v6, %v517_v55  ;;  %v8550_v0 = vadd.f32 %v8424_v1, %v518_v60  ;;  %v8553_v2 = vadd.f32 %v8434_v6, %v519_v61  ;;  %v528_v42 = vld [vmem:[%s8397_s29 + $0xf0] sm:$0xff]  ;;  %v529_v43 = vld [vmem:[%s8397_s29 + $0xf8] sm:$0xff]  ;;  %v1075_v54 = vld [vmem:[%s8405_s8 + $0x8] sm:$0xff] }
  0xb4   : > { %v613_v56 = vsel %vm564_vm0, %v8526_v52, 0.0  ;;  %v616_v57 = vsel %vm564_vm0, %v8529_v53, 0.0  ;;  %v8562_v12 = vadd.f32 %v8424_v1, %v520_v5  ;;  %v8565_v13 = vadd.f32 %v8434_v6, %v521_v7  ;;  %v8619_v55 = vld [vmem:[#allocation8 + $0x8] sm:$0xff] }
  0xb5   : > { %578 = vadd.xlane.f32.xlu0 %v577_v20  ;;  %581 = vadd.xlane.f32.xlu1 %v580_v21  ;;  %v619_v62 = vsel %vm564_vm0, %v8538_v58, 0.0  ;;  %v622_v63 = vsel %vm564_vm0, %v8541_v59, 0.0  ;;  %v625_v10 = vsel %vm564_vm0, %v8550_v0, 0.0  ;;  %v628_v11 = vsel %vm564_vm0, %v8553_v2, 0.0 }
  0xb6   : > { %v631_v18 = vsel %vm564_vm0, %v8562_v12, 0.0  ;;  %v634_v19 = vsel %vm564_vm0, %v8565_v13, 0.0  ;;  %v8574_v20 = vadd.f32 %v8424_v1, %v522_v14  ;;  %v8577_v21 = vadd.f32 %v8434_v6, %v523_v15 }
  0xb7   : > { %v8589_v31 = vadd.f32 %v8434_v6, %v525_v25  ;;  %v8610_v48 = vadd.f32 %v8424_v1, %v528_v42  ;;  %v8613_v49 = vadd.f32 %v8434_v6, %v529_v43 }
  0xb8   : > { %v637_v26 = vsel %vm564_vm0, %v8574_v20, 0.0 }
  0xb9   : > { %584 = vadd.xlane.f32.xlu0 %v583_v27  ;;  %587 = vadd.xlane.f32.xlu1 %v586_v28  ;;  %v640_v27 = vsel %vm564_vm0, %v8577_v21, 0.0  ;;  %v8586_v28 = vadd.f32 %v8424_v1, %v524_v24  ;;  %v646_v37 = vsel %vm564_vm0, %v8589_v31, 0.0 }
  0xbb   : > { %v643_v36 = vsel %vm564_vm0, %v8586_v28, 0.0 }
  0xbd   : > { %590 = vadd.xlane.f32.xlu0 %v589_v32  ;;  %593 = vadd.xlane.f32.xlu1 %v592_v33  ;;  %v526_v32 = vld [vmem:[%s8397_s29 + $0xe0] sm:$0xff]  ;;  %v527_v33 = vld [vmem:[%s8397_s29 + $0xe8] sm:$0xff] }
  0xc1   : > { %596 = vadd.xlane.f32.xlu0 %v595_v38  ;;  %599 = vadd.xlane.f32.xlu1 %v598_v39  ;;  %v8598_v38 = vadd.f32 %v8424_v1, %v526_v32  ;;  %v8601_v39 = vadd.f32 %v8434_v6, %v527_v33  ;;  %v8629_v6 = vadd.f32 %v8619_v55, %v1075_v54 }
  0xc3   : > { %v1143_v61 = vsel %vm564_vm0, %v8629_v6, 0.0 }
  0xc5   : > { %602 = vadd.xlane.f32.xlu0 %v601_v44  ;;  %605 = vadd.xlane.f32.xlu1 %v604_v45  ;;  %v649_v44 = vsel %vm564_vm0, %v8598_v38, 0.0  ;;  %v652_v45 = vsel %vm564_vm0, %v8601_v39, 0.0 }
  0xc9   : > { %608 = vadd.xlane.f32.xlu0 %v607_v50  ;;  %611 = vadd.xlane.f32.xlu1 %v610_v51  ;;  %v1074_v50 = vld [vmem:[%s8405_s8] sm:$0xff]  ;;  %v8616_v51 = vld [vmem:[#allocation8] sm:$0xff] }
  0xca   : > { %v8626_v1 = vadd.f32 %v8616_v51, %v1074_v50 }
  0xcc   : > { %v1140_v60 = vsel %vm564_vm0, %v8626_v1, 0.0 }
  0xcd   : > { %614 = vadd.xlane.f32.xlu0 %v613_v56  ;;  %617 = vadd.xlane.f32.xlu1 %v616_v57  ;;  %v655_v56 = vsel %vm564_vm0, %v8610_v48, 0.0  ;;  %v658_v57 = vsel %vm564_vm0, %v8613_v49, 0.0 }
  0xd1   : > { %620 = vadd.xlane.f32.xlu0 %v619_v62  ;;  %623 = vadd.xlane.f32.xlu1 %v622_v63 }
  0xd5   : > { %626 = vadd.xlane.f32.xlu0 %v625_v10  ;;  %629 = vadd.xlane.f32.xlu1 %v628_v11 }
  0xd9   : > { %632 = vadd.xlane.f32.xlu0 %v631_v18  ;;  %635 = vadd.xlane.f32.xlu1 %v634_v19 }
  0xdd   : > { %638 = vadd.xlane.f32.xlu0 %v637_v26  ;;  %641 = vadd.xlane.f32.xlu1 %v640_v27 }
  0xe1   : > { %644 = vadd.xlane.f32.xlu0 %v643_v36  ;;  %647 = vadd.xlane.f32.xlu1 %v646_v37 }
  0xe5   : > { %650 = vadd.xlane.f32.xlu0 %v649_v44  ;;  %653 = vadd.xlane.f32.xlu1 %v652_v45 }
  0xe9   : > { %656 = vadd.xlane.f32.xlu0 %v655_v56  ;;  %659 = vadd.xlane.f32.xlu1 %v658_v57 }
  0xed   : > { %1141 = vadd.xlane.f32.xlu0 %v1140_v60  ;;  %1144 = vadd.xlane.f32.xlu1 %v1143_v61 }
 0x136   : > { %v567_v62 = vpop.xlane.xlu0 %566  ;;  %v573_v63 = vpop.xlane.xlu1 %572 }
 0x137   : > { %v662_v5 = vmul.f32 0.03125, %v567_v62  ;;  %v664_v7 = vmul.f32 0.03125, %v573_v63 }
 0x139   : > { %v8636_v10 = vsub.f32 %v8428_v3, %v662_v5  ;;  %v8639_v11 = vsub.f32 %v8431_v4, %v664_v7 }
 0x13a   : > { %v570_v14 = vpop.xlane.xlu0 %569  ;;  %v576_v15 = vpop.xlane.xlu1 %575 }
 0x13b   : > { %v663_v18 = vmul.f32 0.03125, %v570_v14  ;;  %v665_v19 = vmul.f32 0.03125, %v576_v15  ;;  %v726_v24 = vmul.f32 %v8636_v10, %v8636_v10  ;;  %v728_v25 = vmul.f32 %v8639_v11, %v8639_v11 }
 0x13d   : > { %v8646_v26 = vsub.f32 %v8438_v8, %v663_v18  ;;  %v8649_v27 = vsub.f32 %v8441_v9, %v665_v19  ;;  %v758_v3 = vsel %vm564_vm0, %v726_v24, 0.0  ;;  %v764_v33 = vsel %vm564_vm0, %v728_v25, 0.0 }
 0x13e   : > { %759 = vadd.xlane.f32.xlu0 %v758_v3  ;;  %v579_v4 = vpop.xlane.xlu0 %578  ;;  %v582_v32 = vpop.xlane.xlu1 %581 }
 0x13f   : > { %v666_v36 = vmul.f32 0.03125, %v579_v4  ;;  %v667_v37 = vmul.f32 0.03125, %v582_v32  ;;  %v727_v42 = vmul.f32 %v8646_v26, %v8646_v26  ;;  %v729_v43 = vmul.f32 %v8649_v27, %v8649_v27 }
 0x141   : > { %v8658_v8 = vsub.f32 %v8454_v16, %v666_v36  ;;  %v8661_v9 = vsub.f32 %v8457_v17, %v667_v37  ;;  %v761_v44 = vsel %vm564_vm0, %v727_v42, 0.0  ;;  %v767_v54 = vsel %vm564_vm0, %v729_v43, 0.0 }
 0x142   : > { %765 = vadd.xlane.f32.xlu0 %v764_v33  ;;  %762 = vadd.xlane.f32.xlu1 %v761_v44  ;;  %v585_v45 = vpop.xlane.xlu0 %584  ;;  %v588_v50 = vpop.xlane.xlu1 %587 }
 0x143   : > { %v668_v56 = vmul.f32 0.03125, %v585_v45  ;;  %v669_v57 = vmul.f32 0.03125, %v588_v50  ;;  %v730_v60 = vmul.f32 %v8658_v8, %v8658_v8  ;;  %v731_v16 = vmul.f32 %v8661_v9, %v8661_v9 }
 0x145   : > { %v8670_v61 = vsub.f32 %v8466_v22, %v668_v56  ;;  %v8673_v17 = vsub.f32 %v8469_v23, %v669_v57  ;;  %v770_v62 = vsel %vm564_vm0, %v730_v60, 0.0  ;;  %v773_v7 = vsel %vm564_vm0, %v731_v16, 0.0 }
 0x146   : > { %768 = vadd.xlane.f32.xlu1 %v767_v54  ;;  %771 = vadd.xlane.f32.xlu0 %v770_v62  ;;  %v591_v63 = vpop.xlane.xlu0 %590  ;;  %v594_v5 = vpop.xlane.xlu1 %593 }
 0x147   : > { %v670_v14 = vmul.f32 0.03125, %v591_v63  ;;  %v671_v15 = vmul.f32 0.03125, %v594_v5  ;;  %v732_v18 = vmul.f32 %v8670_v61, %v8670_v61  ;;  %v733_v22 = vmul.f32 %v8673_v17, %v8673_v17 }
 0x149   : > { %v8682_v19 = vsub.f32 %v8479_v29, %v670_v14  ;;  %v8685_v23 = vsub.f32 %v8482_v30, %v671_v15  ;;  %v776_v24 = vsel %vm564_vm0, %v732_v18, 0.0  ;;  %v779_v4 = vsel %vm564_vm0, %v733_v22, 0.0 }
 0x14a   : > { %774 = vadd.xlane.f32.xlu1 %v773_v7  ;;  %777 = vadd.xlane.f32.xlu0 %v776_v24  ;;  %v597_v25 = vpop.xlane.xlu0 %596  ;;  %v600_v3 = vpop.xlane.xlu1 %599 }
 0x14b   : > { %v672_v32 = vmul.f32 0.03125, %v597_v25  ;;  %v673_v33 = vmul.f32 0.03125, %v600_v3  ;;  %v734_v36 = vmul.f32 %v8682_v19, %v8682_v19  ;;  %v735_v29 = vmul.f32 %v8685_v23, %v8685_v23 }
 0x14d   : > { %v8694_v37 = vsub.f32 %v8490_v34, %v672_v32  ;;  %v8697_v30 = vsub.f32 %v8493_v35, %v673_v33  ;;  %v782_v42 = vsel %vm564_vm0, %v734_v36, 0.0  ;;  %v785_v45 = vsel %vm564_vm0, %v735_v29, 0.0 }
 0x14e   : > { %780 = vadd.xlane.f32.xlu1 %v779_v4  ;;  %783 = vadd.xlane.f32.xlu0 %v782_v42  ;;  %v603_v43 = vpop.xlane.xlu0 %602  ;;  %v606_v44 = vpop.xlane.xlu1 %605  ;;  %v1077_v4 = vld [vmem:[%s8405_s8 + $0x18] sm:$0xff] }
 0x14f   : > { %v674_v50 = vmul.f32 0.03125, %v603_v43  ;;  %v675_v54 = vmul.f32 0.03125, %v606_v44  ;;  %v736_v56 = vmul.f32 %v8694_v37, %v8694_v37  ;;  %v737_v34 = vmul.f32 %v8697_v30, %v8697_v30  ;;  %v1079_v43 = vld [vmem:[%s8405_s8 + $0x28] sm:$0xff]  ;;  %v1080_v44 = vld [vmem:[%s8405_s8 + $0x30] sm:$0xff] }
 0x150   : > { %v8740_v29 = vadd.f32 %v8619_v55, %v1077_v4  ;;  %v1085_v4 = vld [vmem:[%s8405_s8 + $0x58] sm:$0xff] }
 0x151   : > { %v8706_v35 = vsub.f32 %v8502_v40, %v674_v50  ;;  %v8709_v57 = vsub.f32 %v8505_v41, %v675_v54  ;;  %v788_v60 = vsel %vm564_vm0, %v736_v56, 0.0  ;;  %v791_v63 = vsel %vm564_vm0, %v737_v34, 0.0  ;;  %v1076_v41 = vld [vmem:[%s8405_s8 + $0x10] sm:$0xff]  ;;  %v1081_v34 = vld [vmem:[%s8405_s8 + $0x38] sm:$0xff] }
 0x152   : > { %786 = vadd.xlane.f32.xlu1 %v785_v45  ;;  %789 = vadd.xlane.f32.xlu0 %v788_v60  ;;  %v609_v16 = vpop.xlane.xlu0 %608  ;;  %v612_v62 = vpop.xlane.xlu1 %611  ;;  %v1149_v45 = vsel %vm564_vm0, %v8740_v29, 0.0  ;;  %v8752_v54 = vadd.f32 %v8619_v55, %v1079_v43  ;;  %v8755_v56 = vadd.f32 %v8616_v51, %v1080_v44  ;;  %v1082_v60 = vld [vmem:[%s8405_s8 + $0x40] sm:$0xff]  ;;  %v1087_v44 = vld [vmem:[%s8405_s8 + $0x68] sm:$0xff] }
 0x153   : > { %v676_v5 = vmul.f32 0.03125, %v609_v16  ;;  %v677_v7 = vmul.f32 0.03125, %v612_v62  ;;  %v738_v14 = vmul.f32 %v8706_v35, %v8706_v35  ;;  %v739_v40 = vmul.f32 %v8709_v57, %v8709_v57  ;;  %v7511_v16 = vld [vmem:[#allocation11 + $0x8] sm:$0xff]  }
 0x154   : > { %v1155_v62 = vsel %vm564_vm0, %v8752_v54, 0.0  ;;  %6868 = vmatprep.subr.bf16.mxu0 %v7511_v16  ;;  %7396 = vmatprep.subr.bf16.mxu1 %v7511_v16 }
 0x155   : > { %v8719_v15 = vsub.f32 %v8514_v46, %v676_v5  ;;  %v8722_v18 = vsub.f32 %v8517_v47, %v677_v7  ;;  %v794_v22 = vsel %vm564_vm0, %v738_v14, 0.0  ;;  %v797_v24 = vsel %vm564_vm0, %v739_v40, 0.0  ;;  %v1078_v47 = vld [vmem:[%s8405_s8 + $0x20] sm:$0xff]  ;;  %v1083_v14 = vld [vmem:[%s8405_s8 + $0x48] sm:$0xff]  ;;  %v1084_v40 = vld [vmem:[%s8405_s8 + $0x50] sm:$0xff]  ;;  %6869 = vmatpush3.bf16.msra.mxu0 %v7511_v16  ;;  %7398 = vmatpush3.bf16.msra.mxu1 %v7511_v16 }
 0x156   : > { %792 = vadd.xlane.f32.xlu1 %v791_v63  ;;  %795 = vadd.xlane.f32.xlu0 %v794_v22  ;;  %v8731_v46 = vadd.f32 %v8616_v51, %v1076_v41  ;;  %v8743_v42 = vadd.f32 %v8616_v51, %v1078_v47  ;;  %v1158_v63 = vsel %vm564_vm0, %v8755_v56, 0.0  ;;  %v8764_v5 = vadd.f32 %v8619_v55, %v1081_v34  ;;  %v7512_v41 = vld [vmem:[#allocation11] sm:$0xff]   ;;  %v1086_v47 = vld [vmem:[%s8405_s8 + $0x60] sm:$0xff] }
 0x157   : > { %v740_v25 = vmul.f32 %v8719_v15, %v8719_v15  ;;  %v741_v3 = vmul.f32 %v8722_v18, %v8722_v18  ;;  %v8767_v7 = vadd.f32 %v8616_v51, %v1082_v60  ;;  %6870 = vmatprep.subr.bf16.mxu0 %v7512_v41  ;;  %7397 = vmatprep.subr.bf16.mxu1 %v7512_v41 }
 0x158   : > { %v1146_v36 = vsel %vm564_vm0, %v8731_v46, 0.0  ;;  %v1152_v50 = vsel %vm564_vm0, %v8743_v42, 0.0  ;;  %v1161_v22 = vsel %vm564_vm0, %v8764_v5, 0.0  ;;  %v8791_v43 = vadd.f32 %v8616_v51, %v1086_v47 }
 0x159   : > { %v800_v32 = vsel %vm564_vm0, %v740_v25, 0.0  ;;  %v803_v33 = vsel %vm564_vm0, %v741_v3, 0.0  ;;  %v8776_v25 = vadd.f32 %v8619_v55, %v1083_v14  ;;  %v8779_v3 = vadd.f32 %v8616_v51, %v1084_v40  ;;  %6871 = vmatpush3.bf16.msra.mxu0 %v7512_v41  ;;  %7399 = vmatpush3.bf16.msra.mxu1 %v7512_v41 }
 0x15a   : > { %798 = vadd.xlane.f32.xlu1 %v797_v24  ;;  %801 = vadd.xlane.f32.xlu0 %v800_v32  ;;  %v1164_v24 = vsel %vm564_vm0, %v8767_v7, 0.0  ;;  %11443 = vst [vmem:[#allocation25_spill] sm:$0xff] %v8791_v43  ;;  %v1176_v34 = vsel %vm564_vm0, %v8791_v43, 0.0  ;;  %v8800_v60 = vadd.f32 %v8619_v55, %v1087_v44 }
 0x15b   : > { %6904 = vmatprep.subr.bf16.mxu1 %v7511_v16  ;;  %v1167_v32 = vsel %vm564_vm0, %v8776_v25, 0.0 }
 0x15c   : > { %11444 = vst [vmem:[#allocation26_spill] sm:$0xff] %v8800_v60  ;;  %v1179_v14 = vsel %vm564_vm0, %v8800_v60, 0.0  ;;  %v1100_v60 = vld [vmem:[%s8405_s8 + $0xd0] sm:$0xff] }
 0x15d   : > { %v8881_v43 = vadd.f32 %v8616_v51, %v1100_v60 }
 0x15e   : > { %804 = vadd.xlane.f32.xlu1 %v803_v33  ;;  %1147 = vadd.xlane.f32.xlu0 %v1146_v36  ;;  %v1170_v33 = vsel %vm564_vm0, %v8779_v3, 0.0  ;;  %v8788_v36 = vadd.f32 %v8619_v55, %v1085_v4  ;;  %v1092_v4 = vld [vmem:[%s8405_s8 + $0x90] sm:$0xff] }
 0x15f   : > { %v8827_v44 = vadd.f32 %v8616_v51, %v1092_v4  ;;  %v1096_v4 = vld [vmem:[%s8405_s8 + $0xb0] sm:$0xff] }
 0x160   : > { %11442 = vst [vmem:[#allocation24_spill] sm:$0xff] %v8788_v36 }
 0x161   : > { %11449 = vst [vmem:[#allocation31_spill] sm:$0xff] %v8827_v44 }
 0x162   : > { %1150 = vadd.xlane.f32.xlu1 %v1149_v45  ;;  %1153 = vadd.xlane.f32.xlu0 %v1152_v50  ;;  %v1088_v45 = vld [vmem:[%s8405_s8 + $0x70] sm:$0xff]  ;;  %v1173_v50 = vsel %vm564_vm0, %v8788_v36, 0.0 }
 0x163   : > { %v8803_v16 = vadd.f32 %v8616_v51, %v1088_v45  ;;  %v1093_v45 = vld [vmem:[%s8405_s8 + $0x98] sm:$0xff] }
 0x165   : > { %11445 = vst [vmem:[#allocation27_spill] sm:$0xff] %v8803_v16  ;;  %v1182_v40 = vsel %vm564_vm0, %v8803_v16, 0.0  ;;  %v8866_v16 = vld [vmem:[#allocation10 + $0x8] sm:$0xff]  }
 0x166   : > { %1156 = vadd.xlane.f32.xlu1 %v1155_v62  ;;  %1159 = vadd.xlane.f32.xlu0 %v1158_v63  ;;  %v1089_v62 = vld [vmem:[%s8405_s8 + $0x78] sm:$0xff]  ;;  %v1090_v63 = vld [vmem:[%s8405_s8 + $0x80] sm:$0xff] }
 0x167   : > { %v8812_v41 = vadd.f32 %v8619_v55, %v1089_v62  ;;  %6940 = vmatprep.subr.bf16.mxu0 %v8866_v16 }
 0x169   : > { %11446 = vst [vmem:[#allocation28_spill] sm:$0xff] %v8812_v41  ;;  %v1185_v47 = vsel %vm564_vm0, %v8812_v41, 0.0 }
 0x16a   : > { %1162 = vadd.xlane.f32.xlu1 %v1161_v22  ;;  %1165 = vadd.xlane.f32.xlu0 %v1164_v24  ;;  %v8815_v22 = vadd.f32 %v8616_v51, %v1090_v63  ;;  %v1091_v24 = vld [vmem:[%s8405_s8 + $0x88] sm:$0xff]  ;;  %v1194_v63 = vsel %vm564_vm0, %v8827_v44, 0.0 }
 0x16c   : > { %11447 = vst [vmem:[#allocation29_spill] sm:$0xff] %v8815_v22 }
 0x16e   : > { %1168 = vadd.xlane.f32.xlu1 %v1167_v32  ;;  %1171 = vadd.xlane.f32.xlu0 %v1170_v33  ;;  %v1188_v32 = vsel %vm564_vm0, %v8815_v22, 0.0  ;;  %v8824_v33 = vadd.f32 %v8619_v55, %v1091_v24  ;;  %v1095_v24 = vld [vmem:[%s8405_s8 + $0xa8] sm:$0xff]  ;;  %v1098_v22 = vld [vmem:[%s8405_s8 + $0xc0] sm:$0xff] }
 0x16f   : > { %v8848_v44 = vadd.f32 %v8619_v55, %v1095_v24  ;;  %v8863_v24 = vadd.f32 %v8616_v51, %v1098_v22 }
 0x170   : > { %11448 = vst [vmem:[#allocation30_spill] sm:$0xff] %v8824_v33  ;;  %v1191_v62 = vsel %vm564_vm0, %v8824_v33, 0.0 }
 0x171   : > { %11452 = vst [vmem:[#allocation34_spill] sm:$0xff] %v8848_v44  ;;  %11455 = vst [vmem:[#allocation37_spill] sm:$0xff] %v8863_v24 }
 0x172   : > { %1174 = vadd.xlane.f32.xlu1 %v1173_v50  ;;  %1177 = vadd.xlane.f32.xlu0 %v1176_v34  ;;  %v1094_v50 = vld [vmem:[%s8405_s8 + $0xa0] sm:$0xff]  ;;  %v615_v34 = vpop.xlane.xlu0 %614 }
 0x176   : > { %1180 = vadd.xlane.f32.xlu1 %v1179_v14  ;;  %1183 = vadd.xlane.f32.xlu0 %v1182_v40  ;;  %v8836_v14 = vadd.f32 %v8619_v55, %v1093_v45  ;;  %v8839_v40 = vadd.f32 %v8616_v51, %v1094_v50  ;;  %v8851_v45 = vadd.f32 %v8616_v51, %v1096_v4  ;;  %v1097_v50 = vld [vmem:[%s8405_s8 + $0xb8] sm:$0xff]  ;;  %v621_v41 = vpop.xlane.xlu0 %620  ;;  %v1099_v4 = vld [vmem:[%s8405_s8 + $0xc8] sm:$0xff] }
 0x177   : > { %v680_v36 = vmul.f32 0.03125, %v621_v41 }
 0x178   : > { %11450 = vst [vmem:[#allocation32_spill] sm:$0xff] %v8836_v14  ;;  %11451 = vst [vmem:[#allocation33_spill] sm:$0xff] %v8839_v40  ;;  %v1200_v33 = vsel %vm564_vm0, %v8839_v40, 0.0  ;;  %v1206_v40 = vsel %vm564_vm0, %v8851_v45, 0.0 }
 0x179   : > { %11453 = vst [vmem:[#allocation35_spill] sm:$0xff] %v8851_v45  ;;  %v8873_v45 = vadd.f32 %v8619_v55, %v1099_v4  ;;  %v8895_v60 = vsub.f32 %v8538_v58, %v680_v36 }
 0x17a   : > { %1186 = vadd.xlane.f32.xlu1 %v1185_v47  ;;  %1189 = vadd.xlane.f32.xlu0 %v1188_v32  ;;  %v618_v47 = vpop.xlane.xlu1 %617  ;;  %v1197_v32 = vsel %vm564_vm0, %v8836_v14, 0.0  ;;  %v678_v14 = vmul.f32 0.03125, %v615_v34  ;;  %v627_v22 = vpop.xlane.xlu0 %626  ;;  %v1212_v34 = vsel %vm564_vm0, %v8863_v24, 0.0 }
 0x17e   : > { %1192 = vadd.xlane.f32.xlu1 %v1191_v62  ;;  %1195 = vadd.xlane.f32.xlu0 %v1194_v63  ;;  %v8856_v62 = vadd.f32 %v8619_v55, %v1097_v50  ;;  %v1203_v63 = vsel %vm564_vm0, %v8848_v44, 0.0  ;;  %v679_v50 = vmul.f32 0.03125, %v618_v47  ;;  %v8878_v44 = vsub.f32 %v8526_v52, %v678_v14 }
 0x17f   : > { %v1215_v47 = vsel %vm564_vm0, %v8873_v45, 0.0  ;;  %v1218_v52 = vsel %vm564_vm0, %v8881_v43, 0.0  ;;  %v682_v14 = vmul.f32 0.03125, %v627_v22  ;;  %v744_v22 = vmul.f32 %v8895_v60, %v8895_v60 }
 0x180   : > { %11454 = vst [vmem:[#allocation36_spill] sm:$0xff] %v8856_v62  ;;  %v742_v41 = vmul.f32 %v8878_v44, %v8878_v44 }
 0x181   : > { %v8908_v36 = vsub.f32 %v8550_v0, %v682_v14  ;;  %v812_v0 = vsel %vm564_vm0, %v744_v22, 0.0 }
 0x182   : > { %1198 = vadd.xlane.f32.xlu1 %v1197_v32  ;;  %1201 = vadd.xlane.f32.xlu0 %v1200_v33  ;;  %v624_v32 = vpop.xlane.xlu1 %623  ;;  %v1209_v33 = vsel %vm564_vm0, %v8856_v62, 0.0  ;;  %v806_v58 = vsel %vm564_vm0, %v742_v41, 0.0 }
 0x183   : > { %v681_v4 = vmul.f32 0.03125, %v624_v32  ;;  %11457 = vst [vmem:[#allocation39_spill] sm:$0xff] %v8908_v36 }
 0x186   : > { %1204 = vadd.xlane.f32.xlu1 %v1203_v63  ;;  %1207 = vadd.xlane.f32.xlu0 %v1206_v40  ;;  %v1101_v63 = vld [vmem:[%s8405_s8 + $0xd8] sm:$0xff]  ;;  %v8885_v40 = vsub.f32 %v8529_v53, %v679_v50  ;;  %v630_v24 = vpop.xlane.xlu1 %629  ;;  %v633_v53 = vpop.xlane.xlu0 %632 }
 0x187   : > { %v8890_v62 = vadd.f32 %v8619_v55, %v1101_v63  ;;  %v683_v50 = vmul.f32 0.03125, %v630_v24  ;;  %v684_v63 = vmul.f32 0.03125, %v633_v53  ;;  %v746_v53 = vmul.f32 %v8908_v36, %v8908_v36 }
 0x189   : > { %v1221_v32 = vsel %vm564_vm0, %v8890_v62, 0.0  ;;  %v8920_v41 = vsub.f32 %v8562_v12, %v684_v63  ;;  %v1102_v63 = vld [vmem:[%s8405_s8 + $0xe0] sm:$0xff] }
 0x18a   : > { %1210 = vadd.xlane.f32.xlu1 %v1209_v33  ;;  %1213 = vadd.xlane.f32.xlu0 %v1212_v34  ;;  %v8900_v33 = vsub.f32 %v8541_v59, %v681_v4  ;;  %v743_v34 = vmul.f32 %v8885_v40, %v8885_v40  ;;  %v8913_v59 = vsub.f32 %v8553_v2, %v683_v50 }
 0x18b   : > { %11459 = vst [vmem:[#allocation41_spill] sm:$0xff] %v8920_v41  ;;  %v748_v22 = vmul.f32 %v8920_v41, %v8920_v41  ;;  %v1105_v41 = vld [vmem:[%s8405_s8 + $0xf8] sm:$0xff] }
 0x18c   : > { %11456 = vst [vmem:[#allocation38_spill] sm:$0xff] %v8900_v33  ;;  %11458 = vst [vmem:[#allocation40_spill] sm:$0xff] %v8913_v59  ;;  %v809_v24 = vsel %vm564_vm0, %v743_v34, 0.0  ;;  %v745_v4 = vmul.f32 %v8900_v33, %v8900_v33  ;;  %v747_v12 = vmul.f32 %v8913_v59, %v8913_v59  ;;  %v1104_v59 = vld [vmem:[%s8405_s8 + $0xf0] sm:$0xff] }
 0x18e   : > { %1216 = vadd.xlane.f32.xlu1 %v1215_v47  ;;  %1219 = vadd.xlane.f32.xlu0 %v1218_v52  ;;  %v636_v47 = vpop.xlane.xlu1 %635  ;;  %v639_v52 = vpop.xlane.xlu0 %638  ;;  %v815_v2 = vsel %vm564_vm0, %v745_v4, 0.0  ;;  %v821_v4 = vsel %vm564_vm0, %v747_v12, 0.0 }
 0x18f   : > { %v685_v14 = vmul.f32 0.03125, %v636_v47  ;;  %v8935_v47 = vadd.f32 %v8616_v51, %v1102_v63 }
 0x191   : > { %v8926_v34 = vsub.f32 %v8565_v13, %v685_v14  ;;  %v824_v13 = vsel %vm564_vm0, %v748_v22, 0.0  ;;  %v686_v14 = vmul.f32 0.03125, %v639_v52 }
 0x192   : > { %1222 = vadd.xlane.f32.xlu1 %v1221_v32  ;;  %807 = vadd.xlane.f32.xlu0 %v806_v58  ;;  %v642_v32 = vpop.xlane.xlu1 %641  ;;  %v645_v50 = vpop.xlane.xlu0 %644  ;;  %v818_v58 = vsel %vm564_vm0, %v746_v53, 0.0  ;;  %v1103_v53 = vld [vmem:[%s8405_s8 + $0xe8] sm:$0xff]  ;;  %s8123_s8 = smov [#allocation14]  }
 0x193   : > { %11460 = vst [vmem:[#allocation42_spill] sm:$0xff] %v8926_v34  ;;  %v8946_v63 = vadd.f32 %v8619_v55, %v1103_v53  ;;  %v8950_v22 = vsub.f32 %v8574_v20, %v686_v14  ;;  %v688_v52 = vmul.f32 0.03125, %v645_v50  ;;  %s8031_s22 = sshll.u32 %s8123_s8, 4  ;;  %s8032_s22 = int_to_ptr.vmem [resolvable:$false] %s8031_s22 }
 0x194   : > { %s8033_s15 = scalar_lea.vmem %s8032_s22, 8192  ;;  %p8034_p1 = scmp.lt.s32.totalorder %s11263_s26, %s8032_s22 }
 0x195   : > { %v750_v50 = vmul.f32 %v8950_v22, %v8950_v22  ;;  %p8035_p4 = scmp.lt.s32.totalorder %s8033_s15, %s8027_s20 }
 0x196   : > { %810 = vadd.xlane.f32.xlu1 %v809_v24  ;;  %813 = vadd.xlane.f32.xlu0 %v812_v0  ;;  %v648_v24 = vpop.xlane.xlu1 %647  ;;  %v749_v0 = vmul.f32 %v8926_v34, %v8926_v34  ;;  %v651_v36 = vpop.xlane.xlu0 %650  ;;  %v8953_v34 = vadd.f32 %v8616_v51, %v1104_v59  ;;  %v8967_v59 = vsub.f32 %v8586_v28, %v688_v52 }
 0x197   : > { %v690_v14 = vmul.f32 0.03125, %v651_v36  ;;  %v830_v28 = vsel %vm564_vm0, %v750_v50, 0.0  ;;  %p8036_p6 = por %p8035_p4, %p8034_p1 }
 0x198   : > { %v827_v12 = vsel %vm564_vm0, %v749_v0, 0.0  ;;  %v8962_v0 = vadd.f32 %v8619_v55, %v1105_v41  ;;  %v1230_v51 = vsel %vm564_vm0, %v8953_v34, 0.0  ;;  %v752_v36 = vmul.f32 %v8967_v59, %v8967_v59 }
 0x199   : > { %p8037_p9 = pnand %p8036_p6, %p8030_p11 }
 0x19a   : > { %816 = vadd.xlane.f32.xlu1 %v815_v2  ;;  %819 = vadd.xlane.f32.xlu0 %v818_v58  ;;  %v1224_v2 = vsel %vm564_vm0, %v8935_v47, 0.0  ;;  %v687_v58 = vmul.f32 0.03125, %v642_v32  ;;  %v654_v33 = vpop.xlane.xlu1 %653  ;;  %v1227_v32 = vsel %vm564_vm0, %v8946_v63, 0.0  ;;  %v657_v20 = vpop.xlane.xlu0 %656  ;;  %v1233_v55 = vsel %vm564_vm0, %v8962_v0, 0.0 }
 0x19b   : > { %v691_v41 = vmul.f32 0.03125, %v654_v33 }
 0x19e   : > { %822 = vadd.xlane.f32.xlu1 %v821_v4  ;;  %825 = vadd.xlane.f32.xlu0 %v824_v13  ;;  %v8957_v4 = vsub.f32 %v8577_v21, %v687_v58  ;;  %v689_v13 = vmul.f32 0.03125, %v648_v24  ;;  %v660_v53 = vpop.xlane.xlu1 %659  ;;  %v692_v58 = vmul.f32 0.03125, %v657_v20 }
 0x19f   : > { %v693_v52 = vmul.f32 0.03125, %v660_v53 }
 0x1a0   : > { %v8972_v21 = vsub.f32 %v8589_v31, %v689_v13  ;;  %v751_v24 = vmul.f32 %v8957_v4, %v8957_v4  ;;  %v8985_v31 = vsub.f32 %v8601_v39, %v691_v41  ;;  %v836_v13 = vsel %vm564_vm0, %v752_v36, 0.0 }
 0x1a1   : > { %v8997_v39 = vsub.f32 %v8613_v49, %v693_v52 }
 0x1a2   : > { %828 = vadd.xlane.f32.xlu1 %v827_v12  ;;  %1225 = vadd.xlane.f32.xlu0 %v1224_v2  ;;  %v8980_v2 = vsub.f32 %v8598_v38, %v690_v14  ;;  %v1142_v12 = vpop.xlane.xlu0 %1141  ;;  %v833_v33 = vsel %vm564_vm0, %v751_v24, 0.0  ;;  %v8992_v38 = vsub.f32 %v8610_v48, %v692_v58  ;;  %v1145_v50 = vpop.xlane.xlu1 %1144 }
 0x1a3   : > { %v1237_v24 = vmul.f32 0.03125, %v1145_v50  ;;  %v757_v58 = vmul.f32 %v8997_v39, %v8997_v39 }
 0x1a4   : > { %v754_v20 = vmul.f32 %v8980_v2, %v8980_v2  ;;  %v756_v53 = vmul.f32 %v8992_v38, %v8992_v38 }
 0x1a5   : > { %v9010_v49 = vsub.f32 %v8629_v6, %v1237_v24 }
 0x1a6   : > { %1228 = vadd.xlane.f32.xlu1 %v1227_v32  ;;  %1231 = vadd.xlane.f32.xlu0 %v1230_v51  ;;  %v753_v32 = vmul.f32 %v8972_v21, %v8972_v21  ;;  %v1236_v51 = vmul.f32 0.03125, %v1142_v12  ;;  %v842_v41 = vsel %vm564_vm0, %v754_v20, 0.0  ;;  %v848_v36 = vsel %vm564_vm0, %v756_v53, 0.0 }
 0x1a7   : > { %11462 = vst [vmem:[#allocation44_spill] sm:$0xff] %v9010_v49  ;;  %v851_v12 = vsel %vm564_vm0, %v757_v58, 0.0  ;;  %v1301_v52 = vmul.f32 %v9010_v49, %v9010_v49 }
 0x1a8   : > { %v839_v14 = vsel %vm564_vm0, %v753_v32, 0.0  ;;  %v9004_v48 = vsub.f32 %v8626_v1, %v1236_v51 }
 0x1a9   : > { %v1335_v6 = vsel %vm564_vm0, %v1301_v52, 0.0 }
 0x1aa   : > { %1234 = vadd.xlane.f32.xlu1 %v1233_v55  ;;  %831 = vadd.xlane.f32.xlu0 %v830_v28  ;;  %v755_v55 = vmul.f32 %v8985_v31, %v8985_v31  ;;  %11461 = vst [vmem:[#allocation43_spill] sm:$0xff] %v9004_v48  ;;  %v1300_v1 = vmul.f32 %v9004_v48, %v9004_v48 }
 0x1ac   : > { %v845_v28 = vsel %vm564_vm0, %v755_v55, 0.0 }
 0x1ae   : > { %834 = vadd.xlane.f32.xlu1 %v833_v33  ;;  %837 = vadd.xlane.f32.xlu0 %v836_v13  ;;  %v1332_v33 = vsel %vm564_vm0, %v1300_v1, 0.0 }
 0x1b2   : > { %840 = vadd.xlane.f32.xlu1 %v839_v14  ;;  %843 = vadd.xlane.f32.xlu0 %v842_v41 }
 0x1b6   : > { %846 = vadd.xlane.f32.xlu1 %v845_v28  ;;  %849 = vadd.xlane.f32.xlu0 %v848_v36 }
 0x1ba   : > { %852 = vadd.xlane.f32.xlu1 %v851_v12  ;;  %1333 = vadd.xlane.f32.xlu0 %v1332_v33 }
 0x1be   : > { %1336 = vadd.xlane.f32.xlu1 %v1335_v6 }
 0x1c7   : > { %v760_v32 = vpop.xlane.xlu0 %759 }
 0x1c8   : > { %v854_v13 = vmul.f32 0.03125, %v760_v32 }
 0x1ca   : > { %v886_v20 = vadd.f32 1e-05, %v854_v13 }
 0x1cb   : > { %v763_v51 = vpop.xlane.xlu1 %762  ;;  %v766_v50 = vpop.xlane.xlu0 %765 }
 0x1cc   : > { %7517 = vrsqrt.f32 %v886_v20  ;;  %v855_v14 = vmul.f32 0.03125, %v763_v51  ;;  %v856_v55 = vmul.f32 0.03125, %v766_v50 }
 0x1ce   : > { %v887_v41 = vadd.f32 1e-05, %v855_v14  ;;  %v888_v24 = vadd.f32 1e-05, %v856_v55 }
 0x1cf   : > { %v769_v53 = vpop.xlane.xlu1 %768  ;;  %v772_v28 = vpop.xlane.xlu0 %771 }
 0x1d0   : > { %7519 = vrsqrt.f32 %v887_v41  ;;  %v857_v36 = vmul.f32 0.03125, %v769_v53  ;;  %v858_v58 = vmul.f32 0.03125, %v772_v28 }
 0x1d1   : > { %7521 = vrsqrt.f32 %v888_v24  ;;  %v9025_v24 = vld [vmem:[%s11315_s4] ss:$0 sm:$0xff] }
 0x1d2   : > { %v889_v1 = vadd.f32 1e-05, %v857_v36  ;;  %v890_v12 = vadd.f32 1e-05, %v858_v58 }
 0x1d3   : > { %v775_v33 = vpop.xlane.xlu1 %774  ;;  %v778_v52 = vpop.xlane.xlu0 %777 }
 0x1d4   : > { %7523 = vrsqrt.f32 %v889_v1  ;;  %v859_v6 = vmul.f32 0.03125, %v775_v33  ;;  %v860_v32 = vmul.f32 0.03125, %v778_v52 }
 0x1d5   : > { %7525 = vrsqrt.f32 %v890_v12 }
 0x1d6   : > { %v891_v13 = vadd.f32 1e-05, %v859_v6  ;;  %v892_v20 = vadd.f32 1e-05, %v860_v32 }
 0x1d7   : > { %v781_v51 = vpop.xlane.xlu1 %780  ;;  %v784_v50 = vpop.xlane.xlu0 %783 }
 0x1d8   : > { %7527 = vrsqrt.f32 %v891_v13  ;;  %v861_v14 = vmul.f32 0.03125, %v781_v51  ;;  %v862_v55 = vmul.f32 0.03125, %v784_v50 }
 0x1d9   : > { %v7518_v49 = vpop.eup %7517  ;;  %7529 = vrsqrt.f32 %v892_v20  ;;  %v9032_v20 = vld [vmem:[%s11316_s5] ss:$0 sm:$0xff] }
 0x1da   : > { %v893_v41 = vadd.f32 1e-05, %v861_v14  ;;  %v894_v53 = vadd.f32 1e-05, %v862_v55  ;;  %v950_v28 = vmul.f32 %v7518_v49, %v8636_v10 }
 0x1db   : > { %v787_v36 = vpop.xlane.xlu1 %786  ;;  %v790_v58 = vpop.xlane.xlu0 %789 }
 0x1dc   : > { %7531 = vrsqrt.f32 %v893_v41  ;;  %v863_v1 = vmul.f32 0.03125, %v787_v36  ;;  %v864_v12 = vmul.f32 0.03125, %v790_v58  ;;  %v988_v52 = vmul.f32 %v9025_v24, %v950_v28 }
 0x1dd   : > { %v7520_v33 = vpop.eup %7519  ;;  %7533 = vrsqrt.f32 %v894_v53 }
 0x1de   : > { %v7522_v6 = vpop.eup %7521  ;;  %v895_v32 = vadd.f32 1e-05, %v863_v1  ;;  %v896_v13 = vadd.f32 1e-05, %v864_v12  ;;  %v951_v51 = vmul.f32 %v7520_v33, %v8646_v26  ;;  %v1026_v28 = vadd.f32 %v9032_v20, %v988_v52 }
 0x1df   : > { %v793_v10 = vpop.xlane.xlu1 %792  ;;  %v796_v49 = vpop.xlane.xlu0 %795  ;;  %v952_v50 = vmul.f32 %v7522_v6, %v8639_v11 }
 0x1e0   : > { %7535 = vrsqrt.f32 %v895_v32  ;;  %v865_v14 = vmul.f32 0.03125, %v793_v10  ;;  %v866_v55 = vmul.f32 0.03125, %v796_v49  ;;  %v989_v41 = vmul.f32 %v9025_v24, %v951_v51 }
 0x1e1   : > { %v7524_v53 = vpop.eup %7523  ;;  %7537 = vrsqrt.f32 %v896_v13  ;;  %v990_v11 = vmul.f32 %v9025_v24, %v952_v50 }
 0x1e2   : > { %v7526_v36 = vpop.eup %7525  ;;  %v897_v58 = vadd.f32 1e-05, %v865_v14  ;;  %v898_v1 = vadd.f32 1e-05, %v866_v55  ;;  %v1027_v12 = vadd.f32 %v9032_v20, %v989_v41  ;;  %v953_v26 = vmul.f32 %v7524_v53, %v8649_v27 }
 0x1e3   : > { %v799_v33 = vpop.xlane.xlu1 %798  ;;  %v802_v48 = vpop.xlane.xlu0 %801  ;;  %v954_v6 = vmul.f32 %v7526_v36, %v8658_v8 }
 0x1e4   : > { %7539 = vrsqrt.f32 %v897_v58  ;;  %v867_v32 = vmul.f32 0.03125, %v799_v33  ;;  %v868_v51 = vmul.f32 0.03125, %v802_v48  ;;  %v9042_v10 = vpack.c.bf16 %v1027_v12, %v1026_v28 }
 0x1e5   : > { %v7528_v13 = vpop.eup %7527  ;;  %7541 = vrsqrt.f32 %v898_v1  ;;  %v991_v52 = vmul.f32 %v9025_v24, %v953_v26  ;;  %v992_v49 = vmul.f32 %v9025_v24, %v954_v6  ;;  %v1028_v48 = vadd.f32 %v9032_v20, %v990_v11  ;;  %v7514_v6 = vld [vmem:[#allocation10] sm:$0xff]  }
 0x1e6   : > { %v7530_v14 = vpop.eup %7529  ;;  %v899_v55 = vadd.f32 1e-05, %v867_v32  ;;  %v900_v27 = vadd.f32 1e-05, %v868_v51  ;;  %6872 = vmatprep.mubr.msk.bf16.mxu0 %vm564_vm0, %v9042_v10  ;;  %v955_v50 = vmul.f32 %v7528_v13, %v8661_v9 }
 0x1e7   : > { %v805_v8 = vpop.xlane.xlu1 %804  ;;  %v1148_v41 = vpop.xlane.xlu0 %1147  ;;  %v1029_v53 = vadd.f32 %v9032_v20, %v991_v52  ;;  %v956_v28 = vmul.f32 %v7530_v14, %v8670_v61  ;;  %v1030_v33 = vadd.f32 %v9032_v20, %v992_v49 }
 0x1e8   : > { %7543 = vrsqrt.f32 %v899_v55  ;;  %v869_v36 = vmul.f32 0.03125, %v805_v8  ;;  %v1238_v58 = vmul.f32 0.03125, %v1148_v41  ;;  %v993_v1 = vmul.f32 %v9025_v24, %v955_v50 }
 0x1e9   : > { %v7532_v12 = vpop.eup %7531  ;;  %7545 = vrsqrt.f32 %v900_v27  ;;  %v9053_v26 = vpack.c.bf16 %v1029_v53, %v1028_v48  ;;  %v994_v9 = vmul.f32 %v9025_v24, %v956_v28 }
 0x1ea   : > { %v7534_v32 = vpop.eup %7533  ;;  %v901_v11 = vadd.f32 1e-05, %v869_v36  ;;  %v9058_v51 = vsub.f32 %v8731_v46, %v1238_v58  ;;  %v1031_v61 = vadd.f32 %v9032_v20, %v993_v1  ;;  %v957_v13 = vmul.f32 %v7532_v12, %v8673_v17 }
 0x1eb   : > { %6873 = vmatmul.mubr.msk.bf16.vlgmr.msra.gmra.mxu0 %vm564_vm0, %v9053_v26  ;;  %v1151_v52 = vpop.xlane.xlu1 %1150  ;;  %v1154_v14 = vpop.xlane.xlu0 %1153  ;;  %v958_v55 = vmul.f32 %v7534_v32, %v8682_v19  ;;  %v1032_v53 = vadd.f32 %v9032_v20, %v994_v9 }
 0x1ec   : > { %7547 = vrsqrt.f32 %v901_v11  ;;  %v1239_v49 = vmul.f32 0.03125, %v1151_v52  ;;  %v1240_v27 = vmul.f32 0.03125, %v1154_v14  ;;  %v9065_v50 = vpack.c.bf16 %v1031_v61, %v1030_v33  ;;  %6941 = vmatpush3.bf16.msra.mxu0 %v8866_v16 }
 0x1ed   : > { %v7536_v46 = vpop.eup %7535  ;;  %v1302_v8 = vmul.f32 %v9058_v51, %v9058_v51  ;;  %v995_v17 = vmul.f32 %v9025_v24, %v957_v13  ;;  %6942 = vmatprep.subr.bf16.mxu0 %v7514_v6  ;;  %v996_v12 = vmul.f32 %v9025_v24, %v958_v55 }
 0x1ee   : > { %v7538_v41 = vpop.eup %7537  ;;  %v9072_v48 = vsub.f32 %v8740_v29, %v1239_v49  ;;  %v9075_v19 = vsub.f32 %v8743_v42, %v1240_v27  ;;  %6876 = vmatprep.mubr.msk.bf16.mxu0 %vm564_vm0, %v9065_v50  ;;  %v959_v16 = vmul.f32 %v7536_v46, %v8685_v23 }
 0x1ef   : > { %v1157_v28 = vpop.xlane.xlu1 %1156  ;;  %v1338_v36 = vsel %vm564_vm0, %v1302_v8, 0.0  ;;  %v1160_v58 = vpop.xlane.xlu0 %1159  ;;  %v1033_v1 = vadd.f32 %v9032_v20, %v995_v17  ;;  %v960_v29 = vmul.f32 %v7538_v41, %v8694_v37  ;;  %v1034_v46 = vadd.f32 %v9032_v20, %v996_v12 }
 0x1f0   : > { %v1241_v33 = vmul.f32 0.03125, %v1157_v28  ;;  %1339 = vadd.xlane.f32.xlu0 %v1338_v36  ;;  %v1242_v42 = vmul.f32 0.03125, %v1160_v58  ;;  %v1303_v32 = vmul.f32 %v9072_v48, %v9072_v48  ;;  %v1304_v9 = vmul.f32 %v9075_v19, %v9075_v19  ;;  %6943 = vmatpush3.bf16.msra.mxu0 %v7514_v6 }
 0x1f1   : > { %v7540_v23 = vpop.eup %7539  ;;  %v9089_v11 = vpack.c.bf16 %v1033_v1, %v1032_v53  ;;  %v997_v61 = vmul.f32 %v9025_v24, %v959_v16  ;;  %v998_v13 = vmul.f32 %v9025_v24, %v960_v29 }
 0x1f2   : > { %v7542_v52 = vpop.eup %7541  ;;  %v9094_v37 = vsub.f32 %v8752_v54, %v1241_v33  ;;  %v9097_v14 = vsub.f32 %v8755_v56, %v1242_v42  ;;  %v1341_v55 = vsel %vm564_vm0, %v1303_v32, 0.0  ;;  %v1344_v49 = vsel %vm564_vm0, %v1304_v9, 0.0 }
 0x1f3   : > { %6877 = vmatmul.mubr.msk.bf16.gmra.mxu0 %vm564_vm0, %v9089_v11  ;;  %1342 = vadd.xlane.f32.xlu1 %v1341_v55  ;;  %v1163_v6 = vpop.xlane.xlu1 %1162  ;;  %v1166_v27 = vpop.xlane.xlu0 %1165  ;;  %v1035_v8 = vadd.f32 %v9032_v20, %v997_v61  ;;  %v961_v54 = vmul.f32 %v7540_v23, %v8697_v30  ;;  %v1036_v58 = vadd.f32 %v9032_v20, %v998_v13 }
 0x1f4   : > { %v1243_v17 = vmul.f32 0.03125, %v1163_v6  ;;  %1345 = vadd.xlane.f32.xlu0 %v1344_v49  ;;  %v1244_v56 = vmul.f32 0.03125, %v1166_v27  ;;  %v1305_v41 = vmul.f32 %v9094_v37, %v9094_v37  ;;  %v1306_v53 = vmul.f32 %v9097_v14, %v9097_v14 }
 0x1f5   : > { %v7544_v16 = vpop.eup %7543  ;;  %v9110_v28 = vpack.c.bf16 %v1035_v8, %v1034_v46  ;;  %v999_v36 = vmul.f32 %v9025_v24, %v961_v54  ;;  %v962_v1 = vmul.f32 %v7542_v52, %v8706_v35 }
 0x1f6   : > { %v7546_v12 = vpop.eup %7545  ;;  %v9116_v30 = vsub.f32 %v8764_v5, %v1243_v17  ;;  %v9119_v29 = vsub.f32 %v8767_v7, %v1244_v56  ;;  %v1347_v33 = vsel %vm564_vm0, %v1305_v41, 0.0  ;;  %v1350_v42 = vsel %vm564_vm0, %v1306_v53, 0.0 }
 0x1f7   : > { %6880 = vmatprep.mubr.msk.bf16.mxu0 %vm564_vm0, %v9110_v28  ;;  %1348 = vadd.xlane.f32.xlu1 %v1347_v33  ;;  %v1169_v32 = vpop.xlane.xlu1 %1168  ;;  %v1172_v9 = vpop.xlane.xlu0 %1171  ;;  %v1037_v23 = vadd.f32 %v9032_v20, %v999_v36  ;;  %v963_v35 = vmul.f32 %v7544_v16, %v8709_v57  ;;  %v1000_v5 = vmul.f32 %v9025_v24, %v962_v1  ;;  %v11463_v33 = vld [vmem:[#allocation24_spill] sm:$0xff] }
 0x1f8   : > { %v1245_v61 = vmul.f32 0.03125, %v1169_v32  ;;  %1351 = vadd.xlane.f32.xlu0 %v1350_v42  ;;  %v1246_v7 = vmul.f32 0.03125, %v1172_v9  ;;  %v1307_v13 = vmul.f32 %v9116_v30, %v9116_v30  ;;  %v1308_v52 = vmul.f32 %v9119_v29, %v9119_v29  ;;  %v11464_v32 = vld [vmem:[#allocation25_spill] sm:$0xff] }
 0x1f9   : > { %v7548_v55 = vpop.eup %7547  ;;  %v9132_v49 = vpack.c.bf16 %v1037_v23, %v1036_v58  ;;  %v1001_v6 = vmul.f32 %v9025_v24, %v963_v35  ;;  %v1038_v27 = vadd.f32 %v9032_v20, %v1000_v5  ;;  %v964_v57 = vmul.f32 %v7546_v12, %v8719_v15 }
 0x1fa   : > { %v9138_v46 = vsub.f32 %v8776_v25, %v1245_v61  ;;  %v9141_v8 = vsub.f32 %v8779_v3, %v1246_v7  ;;  %v1353_v54 = vsel %vm564_vm0, %v1307_v13, 0.0  ;;  %v1356_v17 = vsel %vm564_vm0, %v1308_v52, 0.0 }
 0x1fb   : > { %6881 = vmatmul.mubr.msk.bf16.gmra.mxu0 %vm564_vm0, %v9132_v49  ;;  %1354 = vadd.xlane.f32.xlu1 %v1353_v54  ;;  %v1175_v56 = vpop.xlane.xlu1 %1174  ;;  %v1178_v41 = vpop.xlane.xlu0 %1177  ;;  %v1039_v53 = vadd.f32 %v9032_v20, %v1001_v6  ;;  %v965_v15 = vmul.f32 %v7548_v55, %v8722_v18  ;;  %v1002_v25 = vmul.f32 %v9025_v24, %v964_v57  ;;  %v11465_v57 = vld [vmem:[#allocation26_spill] sm:$0xff] }
 0x1fc   : > { %v1247_v16 = vmul.f32 0.03125, %v1175_v56  ;;  %1357 = vadd.xlane.f32.xlu0 %v1356_v17  ;;  %v1248_v3 = vmul.f32 0.03125, %v1178_v41  ;;  %v1309_v36 = vmul.f32 %v9138_v46, %v9138_v46  ;;  %v1310_v58 = vmul.f32 %v9141_v8, %v9141_v8  ;;  %v11466_v17 = vld [vmem:[#allocation27_spill] sm:$0xff] }
 0x1fd   : > { %v9154_v1 = vpack.c.bf16 %v1039_v53, %v1038_v27  ;;  %v1003_v12 = vmul.f32 %v9025_v24, %v965_v15  ;;  %v1040_v61 = vadd.f32 %v9032_v20, %v1002_v25 }
 0x1fe   : > { %v9158_v42 = vsub.f32 %v11463_v33, %v1247_v16  ;;  %v9161_v18 = vsub.f32 %v11464_v32, %v1248_v3  ;;  %v1359_v9 = vsel %vm564_vm0, %v1309_v36, 0.0  ;;  %v1362_v23 = vsel %vm564_vm0, %v1310_v58, 0.0  ;;  %v11468_v32 = vld [vmem:[#allocation29_spill] sm:$0xff] }
 0x1ff   : > { %6884 = vmatprep.mubr.msk.bf16.mxu0 %vm564_vm0, %v9154_v1  ;;  %1360 = vadd.xlane.f32.xlu1 %v1359_v9  ;;  %v1181_v35 = vpop.xlane.xlu1 %1180  ;;  %v1184_v5 = vpop.xlane.xlu0 %1183  ;;  %v1041_v7 = vadd.f32 %v9032_v20, %v1003_v12  ;;  %v11467_v12 = vld [vmem:[#allocation28_spill] sm:$0xff] }
 0x200   : > { %v1249_v13 = vmul.f32 0.03125, %v1181_v35  ;;  %1363 = vadd.xlane.f32.xlu0 %v1362_v23  ;;  %v1250_v52 = vmul.f32 0.03125, %v1184_v5  ;;  %v1311_v55 = vmul.f32 %v9158_v42, %v9158_v42  ;;  %v1312_v6 = vmul.f32 %v9161_v18, %v9161_v18 }
 0x201   : > { %v9173_v27 = vpack.c.bf16 %v1041_v7, %v1040_v61 }
 0x202   : > { %v9176_v54 = vsub.f32 %v11465_v57, %v1249_v13  ;;  %v9179_v56 = vsub.f32 %v11466_v17, %v1250_v52  ;;  %v1365_v41 = vsel %vm564_vm0, %v1311_v55, 0.0  ;;  %v1368_v53 = vsel %vm564_vm0, %v1312_v6, 0.0  ;;  %v11469_v55 = vld [vmem:[#allocation30_spill] sm:$0xff]  ;;  %v11470_v57 = vld [vmem:[#allocation31_spill] sm:$0xff] }
 0x203   : > { %6885 = vmatmul.mubr.msk.bf16.gmra.mxu0 %vm564_vm0, %v9173_v27  ;;  %1366 = vadd.xlane.f32.xlu1 %v1365_v41  ;;  %v1187_v15 = vpop.xlane.xlu1 %1186  ;;  %v1190_v25 = vpop.xlane.xlu0 %1189 }
 0x204   : > { %v1251_v16 = vmul.f32 0.03125, %v1187_v15  ;;  %1369 = vadd.xlane.f32.xlu0 %v1368_v53  ;;  %v1252_v3 = vmul.f32 0.03125, %v1190_v25  ;;  %6944 = vmatprep.mubr.msk.bf16.mxu0 %vm564_vm0, %v9042_v10  ;;  %v1313_v36 = vmul.f32 %v9176_v54, %v9176_v54  ;;  %v1314_v58 = vmul.f32 %v9179_v56, %v9179_v56 }
 0x206   : > { %v9192_v33 = vsub.f32 %v11467_v12, %v1251_v16  ;;  %v9195_v9 = vsub.f32 %v11468_v32, %v1252_v3  ;;  %v1371_v23 = vsel %vm564_vm0, %v1313_v36, 0.0  ;;  %v1374_v35 = vsel %vm564_vm0, %v1314_v58, 0.0  ;;  %v11471_v12 = vld [vmem:[#allocation32_spill] sm:$0xff] }
 0x207   : > { %1372 = vadd.xlane.f32.xlu1 %v1371_v23  ;;  %v1193_v5 = vpop.xlane.xlu1 %1192  ;;  %v1196_v61 = vpop.xlane.xlu0 %1195  ;;  %v11472_v23 = vld [vmem:[#allocation33_spill] sm:$0xff] }
 0x208   : > { %v1253_v10 = vmul.f32 0.03125, %v1193_v5  ;;  %1375 = vadd.xlane.f32.xlu0 %v1374_v35  ;;  %v1254_v7 = vmul.f32 0.03125, %v1196_v61  ;;  %v1315_v13 = vmul.f32 %v9192_v33, %v9192_v33  ;;  %v1316_v52 = vmul.f32 %v9195_v9, %v9195_v9 }
 0x20a   : > { %v9204_v6 = vsub.f32 %v11469_v55, %v1253_v10  ;;  %v9207_v17 = vsub.f32 %v11470_v57, %v1254_v7  ;;  %v1377_v41 = vsel %vm564_vm0, %v1315_v13, 0.0  ;;  %v1380_v53 = vsel %vm564_vm0, %v1316_v52, 0.0  ;;  %v11473_v55 = vld [vmem:[#allocation34_spill] sm:$0xff] }
 0x20b   : > { %6945 = vmatmul.mubr.msk.bf16.vlgmr.msra.gmra.mxu0 %vm564_vm0, %v9053_v26  ;;  %1378 = vadd.xlane.f32.xlu1 %v1377_v41  ;;  %v1199_v15 = vpop.xlane.xlu1 %1198  ;;  %v1202_v25 = vpop.xlane.xlu0 %1201  ;;  %v11474_v41 = vld [vmem:[#allocation35_spill] sm:$0xff] }
 0x20c   : > { %v1255_v16 = vmul.f32 0.03125, %v1199_v15  ;;  %1381 = vadd.xlane.f32.xlu0 %v1380_v53  ;;  %v1256_v3 = vmul.f32 0.03125, %v1202_v25  ;;  %6948 = vmatprep.mubr.msk.bf16.mxu0 %vm564_vm0, %v9065_v50  ;;  %v1317_v36 = vmul.f32 %v9204_v6, %v9204_v6  ;;  %v1318_v58 = vmul.f32 %v9207_v17, %v9207_v17 }
 0x20e   : > { %v9220_v32 = vsub.f32 %v11471_v12, %v1255_v16  ;;  %v9223_v26 = vsub.f32 %v11472_v23, %v1256_v3  ;;  %v1383_v35 = vsel %vm564_vm0, %v1317_v36, 0.0  ;;  %v1386_v5 = vsel %vm564_vm0, %v1318_v58, 0.0 }
 0x20f   : > { %1384 = vadd.xlane.f32.xlu1 %v1383_v35  ;;  %v1205_v61 = vpop.xlane.xlu1 %1204  ;;  %v1208_v10 = vpop.xlane.xlu0 %1207  ;;  %v11475_v35 = vld [vmem:[#allocation36_spill] sm:$0xff] }
 0x210   : > { %v1257_v50 = vmul.f32 0.03125, %v1205_v61  ;;  %1387 = vadd.xlane.f32.xlu0 %v1386_v5  ;;  %v1258_v7 = vmul.f32 0.03125, %v1208_v10  ;;  %v1319_v13 = vmul.f32 %v9220_v32, %v9220_v32  ;;  %v1320_v52 = vmul.f32 %v9223_v26, %v9223_v26  ;;  %v11476_v61 = vld [vmem:[#allocation37_spill] sm:$0xff] }
 0x212   : > { %v9232_v57 = vsub.f32 %v11473_v55, %v1257_v50  ;;  %v9235_v53 = vsub.f32 %v11474_v41, %v1258_v7  ;;  %v1389_v15 = vsel %vm564_vm0, %v1319_v13, 0.0  ;;  %v1392_v25 = vsel %vm564_vm0, %v1320_v52, 0.0 }
 0x213   : > { %6949 = vmatmul.mubr.msk.bf16.gmra.mxu0 %vm564_vm0, %v9089_v11  ;;  %1390 = vadd.xlane.f32.xlu1 %v1389_v15  ;;  %v1211_v16 = vpop.xlane.xlu1 %1210  ;;  %v1214_v3 = vpop.xlane.xlu0 %1213 }
 0x214   : > { %v1259_v36 = vmul.f32 0.03125, %v1211_v16  ;;  %1393 = vadd.xlane.f32.xlu0 %v1392_v25  ;;  %v1260_v58 = vmul.f32 0.03125, %v1214_v3  ;;  %6952 = vmatprep.mubr.msk.bf16.mxu0 %vm564_vm0, %v9110_v28  ;;  %v1321_v12 = vmul.f32 %v9232_v57, %v9232_v57  ;;  %v1322_v23 = vmul.f32 %v9235_v53, %v9235_v53 }
 0x216   : > { %v9248_v5 = vsub.f32 %v11475_v35, %v1259_v36  ;;  %v9251_v11 = vsub.f32 %v11476_v61, %v1260_v58  ;;  %v1395_v10 = vsel %vm564_vm0, %v1321_v12, 0.0  ;;  %v1398_v50 = vsel %vm564_vm0, %v1322_v23, 0.0 }
 0x217   : > { %1396 = vadd.xlane.f32.xlu1 %v1395_v10  ;;  %v1217_v7 = vpop.xlane.xlu1 %1216  ;;  %v1220_v13 = vpop.xlane.xlu0 %1219 }
 0x218   : > { %v1261_v28 = vmul.f32 0.03125, %v1217_v7  ;;  %1399 = vadd.xlane.f32.xlu0 %v1398_v50  ;;  %v1262_v52 = vmul.f32 0.03125, %v1220_v13  ;;  %v1323_v55 = vmul.f32 %v9248_v5, %v9248_v5  ;;  %v1324_v41 = vmul.f32 %v9251_v11, %v9251_v11 }
 0x21a   : > { %v9260_v15 = vsub.f32 %v8873_v45, %v1261_v28  ;;  %v9263_v25 = vsub.f32 %v8881_v43, %v1262_v52  ;;  %v1401_v16 = vsel %vm564_vm0, %v1323_v55, 0.0  ;;  %v1404_v3 = vsel %vm564_vm0, %v1324_v41, 0.0 }
 0x21b   : > { %6953 = vmatmul.mubr.msk.bf16.gmra.mxu0 %vm564_vm0, %v9132_v49  ;;  %1402 = vadd.xlane.f32.xlu1 %v1401_v16  ;;  %v1223_v36 = vpop.xlane.xlu1 %1222  ;;  %v808_v58 = vpop.xlane.xlu0 %807 }
 0x21c   : > { %v1263_v12 = vmul.f32 0.03125, %v1223_v36  ;;  %1405 = vadd.xlane.f32.xlu0 %v1404_v3  ;;  %v870_v23 = vmul.f32 0.03125, %v808_v58  ;;  %6956 = vmatprep.mubr.msk.bf16.mxu0 %vm564_vm0, %v9154_v1  ;;  %v1325_v43 = vmul.f32 %v9260_v15, %v9260_v15  ;;  %v1326_v45 = vmul.f32 %v9263_v25, %v9263_v25 }
 0x21e   : > { %v9276_v35 = vsub.f32 %v8890_v62, %v1263_v12  ;;  %v902_v61 = vadd.f32 1e-05, %v870_v23  ;;  %v1407_v49 = vsel %vm564_vm0, %v1325_v43, 0.0  ;;  %v1410_v10 = vsel %vm564_vm0, %v1326_v45, 0.0 }
 0x21f   : > { %1408 = vadd.xlane.f32.xlu1 %v1407_v49  ;;  %v811_v50 = vpop.xlane.xlu1 %810  ;;  %v814_v7 = vpop.xlane.xlu0 %813 }
 0x220   : > { %7549 = vrsqrt.f32 %v902_v61  ;;  %v871_v13 = vmul.f32 0.03125, %v811_v50  ;;  %1411 = vadd.xlane.f32.xlu0 %v1410_v10  ;;  %v872_v1 = vmul.f32 0.03125, %v814_v7  ;;  %v1327_v28 = vmul.f32 %v9276_v35, %v9276_v35 }
 0x222   : > { %v903_v52 = vadd.f32 1e-05, %v871_v13  ;;  %v904_v55 = vadd.f32 1e-05, %v872_v1  ;;  %v1413_v62 = vsel %vm564_vm0, %v1327_v28, 0.0 }
 0x223   : > { %6957 = vmatmul.mubr.msk.bf16.gmra.mxu0 %vm564_vm0, %v9173_v27  ;;  %1414 = vadd.xlane.f32.xlu1 %v1413_v62  ;;  %v817_v41 = vpop.xlane.xlu1 %816  ;;  %v820_v16 = vpop.xlane.xlu0 %819 }
 0x224   : > { %7551 = vrsqrt.f32 %v903_v52  ;;  %v873_v3 = vmul.f32 0.03125, %v817_v41  ;;  %v874_v36 = vmul.f32 0.03125, %v820_v16 }
 0x225   : > { %7553 = vrsqrt.f32 %v904_v55 }
 0x226   : > { %v905_v58 = vadd.f32 1e-05, %v873_v3  ;;  %v906_v12 = vadd.f32 1e-05, %v874_v36 }
 0x227   : > { %v823_v23 = vpop.xlane.xlu1 %822  ;;  %v826_v43 = vpop.xlane.xlu0 %825 }
 0x228   : > { %7555 = vrsqrt.f32 %v905_v58  ;;  %v875_v45 = vmul.f32 0.03125, %v823_v23  ;;  %v876_v61 = vmul.f32 0.03125, %v826_v43 }
 0x229   : > { %7557 = vrsqrt.f32 %v906_v12 }
 0x22a   : > { %v907_v49 = vadd.f32 1e-05, %v875_v45  ;;  %v908_v10 = vadd.f32 1e-05, %v876_v61 }
 0x22b   : > { %v829_v50 = vpop.xlane.xlu1 %828  ;;  %v1226_v7 = vpop.xlane.xlu0 %1225 }
 0x22c   : > { %7559 = vrsqrt.f32 %v907_v49  ;;  %v877_v27 = vmul.f32 0.03125, %v829_v50  ;;  %v1264_v13 = vmul.f32 0.03125, %v1226_v7 }
 0x22d   : > { %v7550_v1 = vpop.eup %7549  ;;  %7561 = vrsqrt.f32 %v908_v10 }
 0x22e   : > { %v909_v28 = vadd.f32 1e-05, %v877_v27  ;;  %v9286_v52 = vsub.f32 %v8935_v47, %v1264_v13  ;;  %v966_v41 = vmul.f32 %v7550_v1, %v8878_v44  ;;  %v11353_v27 = vmov 0.0  }
 0x22f   : > { %v1229_v55 = vpop.xlane.xlu1 %1228  ;;  %v1232_v62 = vpop.xlane.xlu0 %1231  ;;  %7024 = vmatprep.subr.bf16.mxu0 %v11353_v27 }
 0x230   : > { %7563 = vrsqrt.f32 %v909_v28  ;;  %v1265_v16 = vmul.f32 0.03125, %v1229_v55  ;;  %v1266_v3 = vmul.f32 0.03125, %v1232_v62  ;;  %v1328_v36 = vmul.f32 %v9286_v52, %v9286_v52 }
 0x231   : > { %v7552_v58 = vpop.eup %7551  ;;  %v1004_v49 = vmul.f32 %v9025_v24, %v966_v41 }
 0x232   : > { %v7554_v12 = vpop.eup %7553  ;;  %v9292_v23 = vsub.f32 %v8946_v63, %v1265_v16  ;;  %v9295_v43 = vsub.f32 %v8953_v34, %v1266_v3  ;;  %v1416_v47 = vsel %vm564_vm0, %v1328_v36, 0.0  ;;  %v967_v45 = vmul.f32 %v7552_v58, %v8885_v40 }
 0x233   : > { %v1235_v61 = vpop.xlane.xlu1 %1234  ;;  %1417 = vadd.xlane.f32.xlu0 %v1416_v47  ;;  %v832_v44 = vpop.xlane.xlu0 %831  ;;  %v968_v10 = vmul.f32 %v7554_v12, %v8895_v60  ;;  %v1042_v36 = vadd.f32 %v9032_v20, %v1004_v49  ;;  %v11477_v12 = vld [vmem:[#allocation38_spill] sm:$0xff] }
 0x234   : > { %v1267_v50 = vmul.f32 0.03125, %v1235_v61  ;;  %v878_v7 = vmul.f32 0.03125, %v832_v44  ;;  %v1329_v63 = vmul.f32 %v9292_v23, %v9292_v23  ;;  %v1330_v34 = vmul.f32 %v9295_v43, %v9295_v43 }
 0x235   : > { %v7556_v13 = vpop.eup %7555  ;;  %v1005_v40 = vmul.f32 %v9025_v24, %v967_v45  ;;  %v1006_v1 = vmul.f32 %v9025_v24, %v968_v10 }
 0x236   : > { %v7558_v28 = vpop.eup %7557  ;;  %v9309_v55 = vsub.f32 %v8962_v0, %v1267_v50  ;;  %v910_v60 = vadd.f32 1e-05, %v878_v7  ;;  %v1419_v62 = vsel %vm564_vm0, %v1329_v63, 0.0  ;;  %v1422_v41 = vsel %vm564_vm0, %v1330_v34, 0.0  ;;  %v11478_v63 = vld [vmem:[#allocation39_spill] sm:$0xff] }
 0x237   : > { %1420 = vadd.xlane.f32.xlu1 %v1419_v62  ;;  %v835_v16 = vpop.xlane.xlu1 %834  ;;  %1423 = vadd.xlane.f32.xlu0 %v1422_v41  ;;  %v838_v3 = vpop.xlane.xlu0 %837  ;;  %v1043_v58 = vadd.f32 %v9032_v20, %v1005_v40  ;;  %v969_v47 = vmul.f32 %v7556_v13, %v11477_v12  ;;  %v1044_v7 = vadd.f32 %v9032_v20, %v1006_v1  ;;  %v11479_v13 = vld [vmem:[#allocation40_spill] sm:$0xff]  ;;  %v11480_v1 = vld [vmem:[#allocation41_spill] sm:$0xff] }
 0x238   : > { %7565 = vrsqrt.f32 %v910_v60  ;;  %v879_v45 = vmul.f32 0.03125, %v835_v16  ;;  %v880_v61 = vmul.f32 0.03125, %v838_v3  ;;  %v1331_v0 = vmul.f32 %v9309_v55, %v9309_v55 }
 0x239   : > { %v7560_v44 = vpop.eup %7559  ;;  %v1066_v10 = vpack.c.bf16 %v1043_v58, %v1042_v36  ;;  %v1007_v50 = vmul.f32 %v9025_v24, %v969_v47  ;;  %v970_v34 = vmul.f32 %v7558_v28, %v11478_v63 }
 0x23a   : > { %v7562_v62 = vpop.eup %7561  ;;  %v911_v49 = vadd.f32 1e-05, %v879_v45  ;;  %v912_v41 = vadd.f32 1e-05, %v880_v61  ;;  %v1425_v40 = vsel %vm564_vm0, %v1331_v0, 0.0  ;;  %v971_v60 = vmul.f32 %v7560_v44, %v11479_v13 }
 0x23b   : > { %6888 = vmatprep.mubr.msk.bf16.mxu1 %vm564_vm0, %v1066_v10  ;;  %6960 = vmatprep.mubr.msk.bf16.mxu0 %vm564_vm0, %v1066_v10  ;;  %v841_v16 = vpop.xlane.xlu1 %840  ;;  %v844_v3 = vpop.xlane.xlu0 %843  ;;  %v1045_v36 = vadd.f32 %v9032_v20, %v1007_v50  ;;  %v1008_v58 = vmul.f32 %v9025_v24, %v970_v34  ;;  %v972_v12 = vmul.f32 %v7562_v62, %v11480_v1  ;;  %v11481_v50 = vld [vmem:[#allocation42_spill] sm:$0xff] }
 0x23c   : > { %7567 = vrsqrt.f32 %v911_v49  ;;  %1426 = vadd.xlane.f32.xlu1 %v1425_v40  ;;  %v881_v28 = vmul.f32 0.03125, %v841_v16  ;;  %v882_v47 = vmul.f32 0.03125, %v844_v3  ;;  %v1009_v45 = vmul.f32 %v9025_v24, %v971_v60  ;;  %v7837_v60 = vld [vmem:[#allocation11 + $0x8] sm:$0xff]   ;;  %v7838_v3 = vld [vmem:[#allocation11] sm:$0xff]  }
 0x23d   : > { %v7564_v61 = vpop.eup %7563  ;;  %7569 = vrsqrt.f32 %v912_v41  ;;  %v1067_v0 = vpack.c.bf16 %v1045_v36, %v1044_v7  ;;  %v1046_v44 = vadd.f32 %v9032_v20, %v1008_v58  ;;  %v1010_v49 = vmul.f32 %v9025_v24, %v972_v12 }
 0x23e   : > { %v913_v10 = vadd.f32 1e-05, %v881_v28  ;;  %v914_v63 = vadd.f32 1e-05, %v882_v47  ;;  %v1047_v13 = vadd.f32 %v9032_v20, %v1009_v45  ;;  %v973_v27 = vmul.f32 %v7564_v61, %v11481_v50 }
 0x23f   : > { %6889 = vmatmul.mubr.msk.bf16.vlgmr.msra.gmra.mxu1 %vm564_vm0, %v1067_v0  ;;  %6961 = vmatmul.mubr.msk.bf16.gmra.mxu0 %vm564_vm0, %v1067_v0  ;;  %v847_v34 = vpop.xlane.xlu1 %846  ;;  %v850_v62 = vpop.xlane.xlu0 %849  ;;  %v1048_v12 = vadd.f32 %v9032_v20, %v1010_v49 }
 0x240   : > { %7571 = vrsqrt.f32 %v913_v10  ;;  %v883_v40 = vmul.f32 0.03125, %v847_v34  ;;  %v884_v41 = vmul.f32 0.03125, %v850_v62  ;;  %v1068_v7 = vpack.c.bf16 %v1047_v13, %v1046_v44  ;;  %6905 = vmatpush3.bf16.msra.mxu1 %v7837_v60 }
 0x241   : > { %7573 = vrsqrt.f32 %v914_v63  ;;  %v1011_v16 = vmul.f32 %v9025_v24, %v973_v27  ;;  %6906 = vmatprep.subr.bf16.mxu1 %v7838_v3  ;;  %v11482_v44 = vmov 0.0  }
 0x242   : > { %v915_v36 = vadd.f32 1e-05, %v883_v40  ;;  %v916_v58 = vadd.f32 1e-05, %v884_v41  ;;  %6892 = vmatprep.mubr.msk.bf16.mxu1 %vm564_vm0, %v1068_v7  ;;  %6964 = vmatprep.mubr.msk.bf16.mxu0 %vm564_vm0, %v1068_v7 }
 0x243   : > { %v853_v1 = vpop.xlane.xlu1 %852  ;;  %v1334_v28 = vpop.xlane.xlu0 %1333  ;;  %v1049_v47 = vadd.f32 %v9032_v20, %v1011_v16 }
 0x244   : > { %7575 = vrsqrt.f32 %v915_v36  ;;  %v885_v45 = vmul.f32 0.03125, %v853_v1  ;;  %v1428_v61 = vmul.f32 0.03125, %v1334_v28  ;;  %6907 = vmatpush3.bf16.msra.mxu1 %v7838_v3 }
 0x245   : > { %v7566_v0 = vpop.eup %7565  ;;  %7577 = vrsqrt.f32 %v916_v58  ;;  %v1069_v27 = vpack.c.bf16 %v1049_v47, %v1048_v12  ;;  %6976 = vmatprep.subr.bf16.mxu1 %v11482_v44 }
 0x246   : > { %v917_v10 = vadd.f32 1e-05, %v885_v45  ;;  %v1460_v63 = vadd.f32 1e-05, %v1428_v61  ;;  %v974_v13 = vmul.f32 %v7566_v0, %v8950_v22 }
 0x247   : > { %6893 = vmatmul.mubr.msk.bf16.gmra.mxu1 %vm564_vm0, %v1069_v27  ;;  %6965 = vmatmul.mubr.msk.bf16.gmra.mxu0 %vm564_vm0, %v1069_v27  ;;  %v1337_v50 = vpop.xlane.xlu1 %1336 }
 0x248   : > { %7579 = vrsqrt.f32 %v917_v10  ;;  %v1429_v34 = vmul.f32 0.03125, %v1337_v50  ;;  %v1012_v7 = vmul.f32 %v9025_v24, %v974_v13 }
 0x249   : > { %v7568_v62 = vpop.eup %7567  ;;  %7581 = vrsqrt.f32 %v1460_v63 }
 0x24a   : > { %v7570_v49 = vpop.eup %7569  ;;  %v1461_v40 = vadd.f32 1e-05, %v1429_v34  ;;  %v975_v41 = vmul.f32 %v7568_v62, %v8957_v4  ;;  %v1050_v58 = vadd.f32 %v9032_v20, %v1012_v7 }
 0x24b   : > { %v976_v60 = vmul.f32 %v7570_v49, %v8967_v59 }
 0x24c   : > { %7583 = vrsqrt.f32 %v1461_v40  ;;  %v1013_v22 = vmul.f32 %v9025_v24, %v975_v41  ;;  %v11483_v40 = vld [vmem:[#allocation43_spill] sm:$0xff] }
 0x24d   : > { %v7572_v16 = vpop.eup %7571  ;;  %v1014_v3 = vmul.f32 %v9025_v24, %v976_v60 }
 0x24e   : > { %v7574_v36 = vpop.eup %7573  ;;  %v1051_v1 = vadd.f32 %v9032_v20, %v1013_v22  ;;  %v977_v28 = vmul.f32 %v7572_v16, %v8972_v21 }
 0x24f   : > { %v978_v12 = vmul.f32 %v7574_v36, %v8980_v2  ;;  %v1052_v59 = vadd.f32 %v9032_v20, %v1014_v3  ;;  %v11484_v3 = vld [vmem:[#allocation44_spill] sm:$0xff] }
 0x250   : > { %v1070_v4 = vpack.c.bf16 %v1051_v1, %v1050_v58  ;;  %v1015_v47 = vmul.f32 %v9025_v24, %v977_v28 }
 0x251   : > { %v7576_v45 = vpop.eup %7575  ;;  %v1016_v10 = vmul.f32 %v9025_v24, %v978_v12 }
 0x252   : > { %v7578_v61 = vpop.eup %7577  ;;  %6896 = vmatprep.mubr.msk.bf16.mxu1 %vm564_vm0, %v1070_v4  ;;  %6968 = vmatprep.mubr.msk.bf16.mxu0 %vm564_vm0, %v1070_v4  ;;  %v1053_v0 = vadd.f32 %v9032_v20, %v1015_v47  ;;  %v979_v27 = vmul.f32 %v7576_v45, %v8985_v31 }
 0x253   : > { %v980_v21 = vmul.f32 %v7578_v61, %v8992_v38  ;;  %v1054_v62 = vadd.f32 %v9032_v20, %v1016_v10 }
 0x254   : > { %v1071_v2 = vpack.c.bf16 %v1053_v0, %v1052_v59  ;;  %v1017_v63 = vmul.f32 %v9025_v24, %v979_v27 }
 0x255   : > { %v7580_v13 = vpop.eup %7579  ;;  %v1018_v50 = vmul.f32 %v9025_v24, %v980_v21 }
 0x256   : > { %v7582_v34 = vpop.eup %7581  ;;  %6897 = vmatmul.mubr.msk.bf16.gmra.mxu1 %vm564_vm0, %v1071_v2  ;;  %6969 = vmatmul.mubr.msk.bf16.gmra.mxu0 %vm564_vm0, %v1071_v2  ;;  %v1055_v49 = vadd.f32 %v9032_v20, %v1017_v63  ;;  %v981_v31 = vmul.f32 %v7580_v13, %v8997_v39 }
 0x257   : > { %v1524_v41 = vmul.f32 %v7582_v34, %v11483_v40  ;;  %v1056_v22 = vadd.f32 %v9032_v20, %v1018_v50 }
 0x258   : > { %v1072_v38 = vpack.c.bf16 %v1055_v49, %v1054_v62  ;;  %v1019_v7 = vmul.f32 %v9025_v24, %v981_v31 }
 0x259   : > { %v7584_v60 = vpop.eup %7583  ;;  %v1556_v58 = vmul.f32 %v9025_v24, %v1524_v41 }
 0x25a   : > { %6900 = vmatprep.mubr.msk.bf16.mxu1 %vm564_vm0, %v1072_v38  ;;  %6972 = vmatprep.mubr.msk.bf16.mxu0 %vm564_vm0, %v1072_v38  ;;  %v1057_v16 = vadd.f32 %v9032_v20, %v1019_v7  ;;  %v1525_v36 = vmul.f32 %v7584_v60, %v11484_v3 }
 0x25b   : > { %v1588_v28 = vadd.f32 %v9032_v20, %v1556_v58 }
 0x25c   : > { %v1073_v1 = vpack.c.bf16 %v1057_v16, %v1056_v22  ;;  %v1557_v39 = vmul.f32 %v9025_v24, %v1525_v36 }
 0x25e   : > { %6901 = vmatmul.mubr.msk.bf16.gmra.mxu1 %vm564_vm0, %v1073_v1  ;;  %6973 = vmatmul.mubr.msk.bf16.gmra.mxu0 %vm564_vm0, %v1073_v1  ;;  %v1589_v12 = vadd.f32 %v9032_v20, %v1557_v39 }
 0x25f   : > { %7026 = vmatprep.mubr.msk.bf16.mxu0 %vm8121_vm1, %v11482_v44 }
 0x260   : > { %v1620_v4 = vpack.c.bf16 %v1589_v12, %v1588_v28 }
 0x262   : > { %6908 = vmatprep.mubr.msk.bf16.mxu1 %vm564_vm0, %v1620_v4 }
 0x279   : > { %v1340_v47 = vpop.xlane.xlu0 %1339 }
 0x27a   : > { %v1430_v45 = vmul.f32 0.03125, %v1340_v47 }
 0x27c   : > { %v1462_v59 = vadd.f32 1e-05, %v1430_v45  ;;  %v1343_v61 = vpop.xlane.xlu1 %1342 }
 0x27d   : > { %v1431_v24 = vmul.f32 0.03125, %v1343_v61  ;;  %v1346_v0 = vpop.xlane.xlu0 %1345 }
 0x27e   : > { %7585 = vrsqrt.f32 %v1462_v59  ;;  %v1432_v27 = vmul.f32 0.03125, %v1346_v0  ;;  %v9388_v59 = vld [vmem:[%s11315_s4] ss:$0 sm:$0xff] }
 0x27f   : > { %v1463_v10 = vadd.f32 1e-05, %v1431_v24 }
 0x280   : > { %v1464_v21 = vadd.f32 1e-05, %v1432_v27  ;;  %v1349_v2 = vpop.xlane.xlu1 %1348 }
 0x281   : > { %7587 = vrsqrt.f32 %v1463_v10  ;;  %v1433_v20 = vmul.f32 0.03125, %v1349_v2  ;;  %v1352_v63 = vpop.xlane.xlu0 %1351 }
 0x282   : > { %7589 = vrsqrt.f32 %v1464_v21  ;;  %v1434_v13 = vmul.f32 0.03125, %v1352_v63 }
 0x283   : > { %v1465_v50 = vadd.f32 1e-05, %v1433_v20 }
 0x284   : > { %v1466_v34 = vadd.f32 1e-05, %v1434_v13  ;;  %v1355_v62 = vpop.xlane.xlu1 %1354 }
 0x285   : > { %7591 = vrsqrt.f32 %v1465_v50  ;;  %v1435_v49 = vmul.f32 0.03125, %v1355_v62  ;;  %v1358_v31 = vpop.xlane.xlu0 %1357 }
 0x286   : > { %7593 = vrsqrt.f32 %v1466_v34  ;;  %v1436_v40 = vmul.f32 0.03125, %v1358_v31 }
 0x287   : > { %v1467_v41 = vadd.f32 1e-05, %v1435_v49 }
 0x288   : > { %v1468_v38 = vadd.f32 1e-05, %v1436_v40  ;;  %v1361_v7 = vpop.xlane.xlu1 %1360 }
 0x289   : > { %7595 = vrsqrt.f32 %v1467_v41  ;;  %v1437_v60 = vmul.f32 0.03125, %v1361_v7  ;;  %v1364_v22 = vpop.xlane.xlu0 %1363 }
 0x28a   : > { %7597 = vrsqrt.f32 %v1468_v38  ;;  %v1438_v16 = vmul.f32 0.03125, %v1364_v22 }
 0x28b   : > { %v7586_v3 = vpop.eup %7585  ;;  %v1469_v36 = vadd.f32 1e-05, %v1437_v60 }
 0x28c   : > { %v1526_v58 = vmul.f32 %v7586_v3, %v9058_v51  ;;  %v1470_v1 = vadd.f32 1e-05, %v1438_v16  ;;  %v1367_v39 = vpop.xlane.xlu1 %1366 }
 0x28d   : > { %7599 = vrsqrt.f32 %v1469_v36  ;;  %v1439_v28 = vmul.f32 0.03125, %v1367_v39  ;;  %v1370_v12 = vpop.xlane.xlu0 %1369 }
 0x28e   : > { %v7588_v4 = vpop.eup %7587  ;;  %7601 = vrsqrt.f32 %v1470_v1  ;;  %v1440_v47 = vmul.f32 0.03125, %v1370_v12  ;;  %v1558_v61 = vmul.f32 %v9388_v59, %v1526_v58 }
 0x28f   : > { %v7590_v45 = vpop.eup %7589  ;;  %v1527_v24 = vmul.f32 %v7588_v4, %v9072_v48  ;;  %v1471_v0 = vadd.f32 1e-05, %v1439_v28  ;;  %v9398_v48 = vld [vmem:[%s11316_s5] ss:$0 sm:$0xff] }
 0x290   : > { %v1472_v51 = vadd.f32 1e-05, %v1440_v47  ;;  %v1373_v27 = vpop.xlane.xlu1 %1372  ;;  %v1528_v10 = vmul.f32 %v7590_v45, %v9075_v19  ;;  %v1590_v49 = vadd.f32 %v9398_v48, %v1558_v61 }
 0x291   : > { %v1559_v21 = vmul.f32 %v9388_v59, %v1527_v24  ;;  %7603 = vrsqrt.f32 %v1471_v0  ;;  %v1441_v2 = vmul.f32 0.03125, %v1373_v27  ;;  %v1376_v20 = vpop.xlane.xlu0 %1375 }
 0x292   : > { %v7592_v63 = vpop.eup %7591  ;;  %7605 = vrsqrt.f32 %v1472_v51  ;;  %v1442_v13 = vmul.f32 0.03125, %v1376_v20  ;;  %v1560_v50 = vmul.f32 %v9388_v59, %v1528_v10 }
 0x293   : > { %v7594_v34 = vpop.eup %7593  ;;  %v1473_v62 = vadd.f32 1e-05, %v1441_v2  ;;  %v1591_v19 = vadd.f32 %v9398_v48, %v1559_v21  ;;  %v1529_v31 = vmul.f32 %v7592_v63, %v9094_v37 }
 0x294   : > { %v1474_v40 = vadd.f32 1e-05, %v1442_v13  ;;  %v1379_v41 = vpop.xlane.xlu1 %1378  ;;  %v1530_v38 = vmul.f32 %v7594_v34, %v9097_v14  ;;  %v1592_v58 = vadd.f32 %v9398_v48, %v1560_v50 }
 0x295   : > { %7607 = vrsqrt.f32 %v1473_v62  ;;  %v1443_v7 = vmul.f32 0.03125, %v1379_v41  ;;  %v1382_v60 = vpop.xlane.xlu0 %1381  ;;  %v1621_v22 = vpack.c.bf16 %v1591_v19, %v1590_v49  ;;  %v1561_v16 = vmul.f32 %v9388_v59, %v1529_v31 }
 0x296   : > { %v7596_v3 = vpop.eup %7595  ;;  %7609 = vrsqrt.f32 %v1474_v40  ;;  %v1444_v36 = vmul.f32 0.03125, %v1382_v60  ;;  %v1562_v14 = vmul.f32 %v9388_v59, %v1530_v38 }
 0x297   : > { %v7598_v1 = vpop.eup %7597  ;;  %v1475_v39 = vadd.f32 1e-05, %v1443_v7  ;;  %6909 = vmatmul.mubr.msk.bf16.vlgmr.msra.gmra.mxu1 %vm564_vm0, %v1621_v22  ;;  %v1593_v37 = vadd.f32 %v9398_v48, %v1561_v16  ;;  %v1531_v28 = vmul.f32 %v7596_v3, %v9116_v30 }
 0x298   : > { %v1476_v12 = vadd.f32 1e-05, %v1444_v36  ;;  %v1385_v4 = vpop.xlane.xlu1 %1384  ;;  %v1532_v47 = vmul.f32 %v7598_v1, %v9119_v29  ;;  %v1594_v30 = vadd.f32 %v9398_v48, %v1562_v14 }
 0x299   : > { %7611 = vrsqrt.f32 %v1475_v39  ;;  %v1445_v45 = vmul.f32 0.03125, %v1385_v4  ;;  %v1388_v61 = vpop.xlane.xlu0 %1387  ;;  %v1622_v24 = vpack.c.bf16 %v1593_v37, %v1592_v58  ;;  %v1563_v0 = vmul.f32 %v9388_v59, %v1531_v28 }
 0x29a   : > { %v7600_v51 = vpop.eup %7599  ;;  %7613 = vrsqrt.f32 %v1476_v12  ;;  %v1446_v27 = vmul.f32 0.03125, %v1388_v61  ;;  %v1564_v10 = vmul.f32 %v9388_v59, %v1532_v47 }
 0x29b   : > { %v7602_v21 = vpop.eup %7601  ;;  %v1477_v2 = vadd.f32 1e-05, %v1445_v45  ;;  %6912 = vmatprep.mubr.msk.bf16.mxu1 %vm564_vm0, %v1622_v24  ;;  %v1595_v20 = vadd.f32 %v9398_v48, %v1563_v0  ;;  %v1533_v29 = vmul.f32 %v7600_v51, %v9138_v46 }
 0x29c   : > { %v1478_v63 = vadd.f32 1e-05, %v1446_v27  ;;  %v1391_v13 = vpop.xlane.xlu1 %1390  ;;  %v1534_v50 = vmul.f32 %v7602_v21, %v9141_v8  ;;  %v1596_v41 = vadd.f32 %v9398_v48, %v1564_v10 }
 0x29d   : > { %7615 = vrsqrt.f32 %v1477_v2  ;;  %v1447_v34 = vmul.f32 0.03125, %v1391_v13  ;;  %v1394_v62 = vpop.xlane.xlu0 %1393  ;;  %v1623_v49 = vpack.c.bf16 %v1595_v20, %v1594_v30  ;;  %v1565_v19 = vmul.f32 %v9388_v59, %v1533_v29 }
 0x29e   : > { %v7604_v31 = vpop.eup %7603  ;;  %7617 = vrsqrt.f32 %v1478_v63  ;;  %v1448_v40 = vmul.f32 0.03125, %v1394_v62  ;;  %v1566_v8 = vmul.f32 %v9388_v59, %v1534_v50 }
 0x29f   : > { %v7606_v38 = vpop.eup %7605  ;;  %v1479_v7 = vadd.f32 1e-05, %v1447_v34  ;;  %6913 = vmatmul.mubr.msk.bf16.gmra.mxu1 %vm564_vm0, %v1623_v49  ;;  %v1597_v46 = vadd.f32 %v9398_v48, %v1565_v19  ;;  %v1535_v60 = vmul.f32 %v7604_v31, %v9158_v42 }
 0x2a0   : > { %v1480_v22 = vadd.f32 1e-05, %v1448_v40  ;;  %v1397_v16 = vpop.xlane.xlu1 %1396  ;;  %v1536_v3 = vmul.f32 %v7606_v38, %v9161_v18  ;;  %v1598_v42 = vadd.f32 %v9398_v48, %v1566_v8 }
 0x2a1   : > { %7619 = vrsqrt.f32 %v1479_v7  ;;  %v1449_v36 = vmul.f32 0.03125, %v1397_v16  ;;  %v1400_v58 = vpop.xlane.xlu0 %1399  ;;  %v1624_v1 = vpack.c.bf16 %v1597_v46, %v1596_v41  ;;  %v1567_v39 = vmul.f32 %v9388_v59, %v1535_v60 }
 0x2a2   : > { %v7608_v37 = vpop.eup %7607  ;;  %7621 = vrsqrt.f32 %v1480_v22  ;;  %v1450_v28 = vmul.f32 0.03125, %v1400_v58  ;;  %v1568_v14 = vmul.f32 %v9388_v59, %v1536_v3 }
 0x2a3   : > { %v7610_v12 = vpop.eup %7609  ;;  %v1481_v4 = vadd.f32 1e-05, %v1449_v36  ;;  %6916 = vmatprep.mubr.msk.bf16.mxu1 %vm564_vm0, %v1624_v1  ;;  %v1599_v47 = vadd.f32 %v9398_v48, %v1567_v39  ;;  %v1537_v18 = vmul.f32 %v7608_v37, %v9176_v54 }
 0x2a4   : > { %v1482_v45 = vadd.f32 1e-05, %v1450_v28  ;;  %v1403_v61 = vpop.xlane.xlu1 %1402  ;;  %v1538_v24 = vmul.f32 %v7610_v12, %v9179_v56  ;;  %v1600_v30 = vadd.f32 %v9398_v48, %v1568_v14 }
 0x2a5   : > { %7623 = vrsqrt.f32 %v1481_v4  ;;  %v1451_v0 = vmul.f32 0.03125, %v1403_v61  ;;  %v1406_v51 = vpop.xlane.xlu0 %1405  ;;  %v1625_v27 = vpack.c.bf16 %v1599_v47, %v1598_v42  ;;  %v1569_v10 = vmul.f32 %v9388_v59, %v1537_v18 }
 0x2a6   : > { %v7612_v21 = vpop.eup %7611  ;;  %7625 = vrsqrt.f32 %v1482_v45  ;;  %v1452_v2 = vmul.f32 0.03125, %v1406_v51  ;;  %v1570_v56 = vmul.f32 %v9388_v59, %v1538_v24 }
 0x2a7   : > { %v7614_v20 = vpop.eup %7613  ;;  %v1483_v29 = vadd.f32 1e-05, %v1451_v0  ;;  %6917 = vmatmul.mubr.msk.bf16.gmra.mxu1 %vm564_vm0, %v1625_v27  ;;  %v1601_v54 = vadd.f32 %v9398_v48, %v1569_v10  ;;  %v1539_v63 = vmul.f32 %v7612_v21, %v9192_v33 }
 0x2a8   : > { %v1484_v13 = vadd.f32 1e-05, %v1452_v2  ;;  %v1409_v50 = vpop.xlane.xlu1 %1408  ;;  %v1540_v34 = vmul.f32 %v7614_v20, %v9195_v9  ;;  %v1602_v60 = vadd.f32 %v9398_v48, %v1570_v56 }
 0x2a9   : > { %7627 = vrsqrt.f32 %v1483_v29  ;;  %v1453_v62 = vmul.f32 0.03125, %v1409_v50  ;;  %v1412_v49 = vpop.xlane.xlu0 %1411  ;;  %v1626_v19 = vpack.c.bf16 %v1601_v54, %v1600_v30  ;;  %v1571_v31 = vmul.f32 %v9388_v59, %v1539_v63 }
 0x2aa   : > { %v7616_v40 = vpop.eup %7615  ;;  %7629 = vrsqrt.f32 %v1484_v13  ;;  %v1454_v41 = vmul.f32 0.03125, %v1412_v49  ;;  %v1572_v38 = vmul.f32 %v9388_v59, %v1540_v34 }
 0x2ab   : > { %v7618_v7 = vpop.eup %7617  ;;  %v1485_v46 = vadd.f32 1e-05, %v1453_v62  ;;  %v9441_v33 = vpop.f32.mrf.mxu0  ;;  %6920 = vmatprep.mubr.msk.bf16.mxu1 %vm564_vm0, %v1626_v19  ;;  %v1603_v9 = vadd.f32 %v9398_v48, %v1571_v31  ;;  %v1541_v8 = vmul.f32 %v7616_v40, %v9204_v6 }
 0x2ac   : > { %v1486_v22 = vadd.f32 1e-05, %v1454_v41  ;;  %v1415_v16 = vpop.xlane.xlu1 %1414  ;;  %v1542_v3 = vmul.f32 %v7618_v7, %v9207_v17  ;;  %v1604_v28 = vadd.f32 %v9398_v48, %v1572_v38 }
 0x2ad   : > { %7631 = vrsqrt.f32 %v1485_v46  ;;  %v1455_v36 = vmul.f32 0.03125, %v1415_v16  ;;  %v1734_v58 = vpop.f32.mrf.mxu0  ;;  %v1627_v1 = vpack.c.bf16 %v1603_v9, %v1602_v60  ;;  %v1573_v39 = vmul.f32 %v9388_v59, %v1541_v8 }
 0x2ae   : > { %v7620_v37 = vpop.eup %7619  ;;  %7633 = vrsqrt.f32 %v1486_v22  ;;  %v1574_v42 = vmul.f32 %v9388_v59, %v1542_v3 }
 0x2af   : > { %v7622_v14 = vpop.eup %7621  ;;  %v1487_v12 = vadd.f32 1e-05, %v1455_v36  ;;  %v9450_v4 = vpop.f32.mrf.mxu0  ;;  %6921 = vmatmul.mubr.msk.bf16.gmra.mxu1 %vm564_vm0, %v1627_v1  ;;  %v1605_v6 = vadd.f32 %v9398_v48, %v1573_v39  ;;  %v1543_v17 = vmul.f32 %v7620_v37, %v9220_v32 }
 0x2b0   : > { %v1544_v47 = vmul.f32 %v7622_v14, %v9223_v26  ;;  %v1606_v10 = vadd.f32 %v9398_v48, %v1574_v42 }
 0x2b1   : > { %7635 = vrsqrt.f32 %v1487_v12  ;;  %v1737_v18 = vpop.f32.mrf.mxu0  ;;  %v1628_v45 = vpack.c.bf16 %v1605_v6, %v1604_v28  ;;  %v1575_v61 = vmul.f32 %v9388_v59, %v1543_v17 }
 0x2b2   : > { %v7624_v24 = vpop.eup %7623  ;;  %v9458_v0 = vpack.c.bf16 %v1737_v18, %v1734_v58  ;;  %v1576_v26 = vmul.f32 %v9388_v59, %v1544_v47 }
 0x2b3   : > { %v7626_v51 = vpop.eup %7625  ;;  %v9460_v27 = vpop.f32.mrf.mxu0  ;;  %6924 = vmatprep.mubr.msk.bf16.mxu1 %vm564_vm0, %v1628_v45  ;;  %v1607_v32 = vadd.f32 %v9398_v48, %v1575_v61  ;;  %v1545_v21 = vmul.f32 %v7624_v24, %v9232_v57 }
 0x2b4   : > { %v2331_v2 = vsel %vm564_vm0, %v9458_v0, 0  ;;  %v1546_v30 = vmul.f32 %v7626_v51, %v9235_v53  ;;  %v1608_v57 = vadd.f32 %v9398_v48, %v1576_v26 }
 0x2b5   : > { %v9470_v20 = vpop.f32.mrf.mxu0  ;;  %6977 = vmatpush3.bf16.xpose.msra.mxu1 %v2331_v2  ;;  %v1629_v29 = vpack.c.bf16 %v1607_v32, %v1606_v10  ;;  %v1577_v54 = vmul.f32 %v9388_v59, %v1545_v21 }
 0x2b6   : > { %v7628_v63 = vpop.eup %7627  ;;  %6982 = vmatprep.subr.bf16.mxu1 %v11482_v44  ;;  %v1578_v34 = vmul.f32 %v9388_v59, %v1546_v30 }
 0x2b7   : > { %v7630_v56 = vpop.eup %7629  ;;  %v9474_v13 = vpop.f32.mrf.mxu0  ;;  %6925 = vmatmul.mubr.msk.bf16.gmra.mxu1 %vm564_vm0, %v1629_v29  ;;  %v1609_v50 = vadd.f32 %v9398_v48, %v1577_v54  ;;  %v1547_v53 = vmul.f32 %v7628_v63, %v9248_v5 }
 0x2b8   : > { %v1548_v62 = vmul.f32 %v7630_v56, %v9251_v11  ;;  %v1610_v7 = vadd.f32 %v9398_v48, %v1578_v34 }
 0x2b9   : > { %v9482_v49 = vpop.f32.mrf.mxu0  ;;  %v1630_v19 = vpack.c.bf16 %v1609_v50, %v1608_v57  ;;  %v1579_v31 = vmul.f32 %v9388_v59, %v1547_v53 }
 0x2ba   : > { %v7632_v40 = vpop.eup %7631  ;;  %v1580_v60 = vmul.f32 %v9388_v59, %v1548_v62 }
 0x2bb   : > { %v7634_v41 = vpop.eup %7633  ;;  %v9485_v38 = vpop.f32.mrf.mxu0  ;;  %6928 = vmatprep.mubr.msk.bf16.mxu1 %vm564_vm0, %v1630_v19  ;;  %v1611_v46 = vadd.f32 %v9398_v48, %v1579_v31  ;;  %v1549_v5 = vmul.f32 %v7632_v40, %v9260_v15 }
 0x2bc   : > { %v1418_v11 = vpop.xlane.xlu0 %1417  ;;  %v1550_v9 = vmul.f32 %v7634_v41, %v9263_v25  ;;  %v1612_v39 = vadd.f32 %v9398_v48, %v1580_v60 }
 0x2bd   : > { %v1456_v8 = vmul.f32 0.03125, %v1418_v11  ;;  %v9493_v22 = vpop.f32.mrf.mxu0  ;;  %v1631_v16 = vpack.c.bf16 %v1611_v46, %v1610_v7  ;;  %v1581_v3 = vmul.f32 %v9388_v59, %v1549_v5 }
 0x2be   : > { %v7636_v36 = vpop.eup %7635  ;;  %v1582_v14 = vmul.f32 %v9388_v59, %v1550_v9 }
 0x2bf   : > { %v1488_v58 = vadd.f32 1e-05, %v1456_v8  ;;  %v9496_v1 = vpop.f32.mrf.mxu0  ;;  %6929 = vmatmul.mubr.msk.bf16.gmra.mxu1 %vm564_vm0, %v1631_v16  ;;  %v1613_v15 = vadd.f32 %v9398_v48, %v1581_v3  ;;  %v1551_v37 = vmul.f32 %v7636_v36, %v9276_v35 }
 0x2c0   : > { %v1421_v28 = vpop.xlane.xlu1 %1420  ;;  %v1424_v25 = vpop.xlane.xlu0 %1423  ;;  %v1614_v35 = vadd.f32 %v9398_v48, %v1582_v14 }
 0x2c1   : > { %7637 = vrsqrt.f32 %v1488_v58  ;;  %v1457_v12 = vmul.f32 0.03125, %v1421_v28  ;;  %v1458_v6 = vmul.f32 0.03125, %v1424_v25  ;;  %v9503_v17 = vpop.f32.mrf.mxu0  ;;  %v1632_v42 = vpack.c.bf16 %v1613_v15, %v1612_v39 }
 0x2c2   : > { %v1583_v47 = vmul.f32 %v9388_v59, %v1551_v37  ;;  %v9538_v39 = vpack.c.bf16 %v9450_v4, %v9441_v33  ;;  %v9551_v33 = vpack.c.bf16 %v9482_v49, %v9470_v20  ;;  %v9566_v20 = vpack.c.bf16 %v9474_v13, %v9460_v27 }
 0x2c3   : > { %v1489_v18 = vadd.f32 1e-05, %v1457_v12  ;;  %v1490_v45 = vadd.f32 1e-05, %v1458_v6  ;;  %v9506_v61 = vpop.f32.mrf.mxu0  ;;  %6932 = vmatprep.mubr.msk.bf16.mxu1 %vm564_vm0, %v1632_v42  ;;  %v9583_v27 = vpack.c.bf16 %v9503_v17, %v9493_v22 }
 0x2c4   : > { %v1615_v24 = vadd.f32 %v9398_v48, %v1583_v47  ;;  %11485 = vst [vmem:[#allocation24_spill] sm:$0xff] %v9551_v33  ;;  %v2425_v6 = vsel %vm564_vm0, %v9551_v33, 0 }
 0x2c5   : > { %7639 = vrsqrt.f32 %v1489_v18  ;;  %v1427_v51 = vpop.xlane.xlu1 %1426  ;;  %v9511_v10 = vpop.f32.mrf.mxu0  ;;  %11486 = vst [vmem:[#allocation25_spill] sm:$0xff] %v9583_v27 }
 0x2c6   : > { %7641 = vrsqrt.f32 %v1490_v45  ;;  %v1459_v32 = vmul.f32 0.03125, %v1427_v51  ;;  %v1633_v21 = vpack.c.bf16 %v1615_v24, %v1614_v35  ;;  %v2472_v35 = vsel %vm564_vm0, %v9566_v20, 0 }
 0x2c7   : > { %v9513_v26 = vpop.f32.mrf.mxu0 }
 0x2c8   : > { %v1491_v2 = vadd.f32 1e-05, %v1459_v32  ;;  %6933 = vmatmul.mubr.msk.bf16.gmra.mxu1 %vm564_vm0, %v1633_v21 }
 0x2c9   : > { %v9516_v30 = vpop.f32.mrf.mxu0 }
 0x2ca   : > { %7643 = vrsqrt.f32 %v1491_v2 }
 0x2cb   : > { %v6946_v29 = vpop.f32.mrf.mxu0 }
 0x2cc   : > { %v2281_v4 = vmul.f32 0.17677669, %v6946_v29 }
 0x2cd   : > { %v2152_v54 = vpop.f32.mrf.mxu0 }
 0x2ce   : > { %v7638_v63 = vpop.eup %7637 }
 0x2cf   : > { %v6947_v56 = vpop.f32.mrf.mxu0  ;;  %v1552_v57 = vmul.f32 %v7638_v63, %v9286_v52 }
 0x2d0   : > { %v2282_v25 = vmul.f32 0.17677669, %v6947_v56 }
 0x2d1   : > { %v2155_v50 = vpop.f32.mrf.mxu0  ;;  %v1584_v31 = vmul.f32 %v9388_v59, %v1552_v57 }
 0x2d2   : > { %v7640_v53 = vpop.eup %7639  ;;  %v9553_v12 = vpack.c.bf16 %v2282_v25, %v2281_v4 }
 0x2d3   : > { %v7642_v34 = vpop.eup %7641  ;;  %v6950_v62 = vpop.f32.mrf.mxu0  ;;  %v1553_v19 = vmul.f32 %v7640_v53, %v9292_v23  ;;  %v1616_v5 = vadd.f32 %v9398_v48, %v1584_v31 }
 0x2d4   : > { %v1554_v40 = vmul.f32 %v7642_v34, %v9295_v43  ;;  %v2285_v13 = vmul.f32 0.17677669, %v6950_v62 }
 0x2d5   : > { %v2168_v41 = vpop.f32.mrf.mxu0  ;;  %v1585_v7 = vmul.f32 %v9388_v59, %v1553_v19 }
 0x2d6   : > { %v1586_v11 = vmul.f32 %v9388_v59, %v1554_v40  ;;  %v2283_v49 = vmul.f32 0.17677669, %v2168_v41 }
 0x2d7   : > { %v7644_v46 = vpop.eup %7643  ;;  %v1617_v60 = vadd.f32 %v9398_v48, %v1585_v7  ;;  %v6951_v9 = vpop.f32.mrf.mxu0 }
 0x2d8   : > { %v1555_v52 = vmul.f32 %v7644_v46, %v9309_v55  ;;  %v1618_v43 = vadd.f32 %v9398_v48, %v1586_v11  ;;  %v2280_v55 = vmul.f32 0.17677669, %v2155_v50  ;;  %v2286_v51 = vmul.f32 0.17677669, %v6951_v9 }
 0x2d9   : > { %v1634_v8 = vpack.c.bf16 %v1617_v60, %v1616_v5  ;;  %v2171_v3 = vpop.f32.mrf.mxu0  ;;  %v9604_v50 = vpack.c.bf16 %v9496_v1, %v9485_v38  ;;  %v9630_v9 = vpack.c.bf16 %v9516_v30, %v9511_v10 }
 0x2da   : > { %v1587_v23 = vmul.f32 %v9388_v59, %v1555_v52  ;;  %v2279_v59 = vmul.f32 0.17677669, %v2152_v54  ;;  %v2284_v47 = vmul.f32 0.17677669, %v2171_v3  ;;  %v9585_v21 = vpack.c.bf16 %v2286_v51, %v2285_v13 }
 0x2db   : > { %6936 = vmatprep.mubr.msk.bf16.mxu1 %vm564_vm0, %v1634_v8  ;;  %v9532_v58 = vpop.f32.mrf.mxu0  ;;  %v2519_v54 = vsel %vm564_vm0, %v9583_v27, 0  ;;  %v2566_v7 = vsel %vm564_vm0, %v9604_v50, 0  ;;  %11488 = vst [vmem:[#allocation27_spill] sm:$0xff] %v9630_v9 }
 0x2dc   : > { %v1619_v16 = vadd.f32 %v9398_v48, %v1587_v23  ;;  %v9540_v37 = vpack.c.bf16 %v2280_v55, %v2279_v59  ;;  %v2378_v48 = vsel %vm564_vm0, %v9538_v39, 0  ;;  %v9570_v45 = vpack.c.bf16 %v2284_v47, %v2283_v49 }
 0x2dd   : > { %v2184_v15 = vpop.f32.mrf.mxu0  ;;  %v2289_v8 = vmul.f32 0.17677669, %v9532_v58  ;;  %v2613_v59 = vsel %vm564_vm0, %v9630_v9, 0 }
 0x2de   : > { %v1635_v36 = vpack.c.bf16 %v1619_v16, %v1618_v43  ;;  %v2287_v53 = vmul.f32 0.17677669, %v2184_v15  ;;  %v9655_v15 = vpack.c.bf16 %v9513_v26, %v9506_v61 }
 0x2df   : > { %v6955_v28 = vpop.f32.mrf.mxu0 }
 0x2e0   : > { %6937 = vmatmul.mubr.msk.bf16.gmra.mxu1 %vm564_vm0, %v1635_v36  ;;  %v2290_v5 = vmul.f32 0.17677669, %v6955_v28  ;;  %v2660_v47 = vsel %vm564_vm0, %v9655_v15, 0 }
 0x2e1   : > { %6978 = vmatprep.mubr.msk.bf16.mxu1 %vm8121_vm1, %v11482_v44  ;;  %v2187_v14 = vpop.f32.mrf.mxu0 }
 0x2e2   : > { %v2288_v22 = vmul.f32 0.17677669, %v2187_v14  ;;  %v9633_v16 = vpack.c.bf16 %v2290_v5, %v2289_v8 }
 0x2e3   : > { %v9559_v42 = vpop.f32.mrf.mxu0 }
 0x2e4   : > { %v9606_v19 = vpack.c.bf16 %v2288_v22, %v2287_v53  ;;  %v2293_v51 = vmul.f32 0.17677669, %v9559_v42 }
 0x2e5   : > { %v9568_v18 = vpop.f32.mrf.mxu0 }
 0x2e7   : > { %v9576_v24 = vpop.f32.mrf.mxu0 }
 0x2e8   : > { %6979 = vmatmul.mubr.msk.bf16.vlgmr.msra.gmra.mxu1 %vm564_vm0, %v9540_v37  ;;  %v2294_v49 = vmul.f32 0.17677669, %v9576_v24 }
 0x2e9   : > { %6983 = vmatpush3.bf16.xpose.msra.mxu1 %v2378_v48  ;;  %6984 = vmatprep.mubr.msk.bf16.mxu1 %vm8121_vm1, %v11482_v44  ;;  %v2203_v32 = vpop.f32.mrf.mxu0  ;;  %v2291_v48 = vmul.f32 0.17677669, %v9568_v18 }
 0x2ea   : > { %6988 = vmatprep.subr.bf16.mxu1 %v11482_v44  ;;  %v2292_v30 = vmul.f32 0.17677669, %v2203_v32 }
 0x2ec   : > { %v9658_v25 = vpack.c.bf16 %v2292_v30, %v2291_v48 }
 0x2f0   : > { %6985 = vmatmul.mubr.msk.bf16.vlgmr.msra.gmra.mxu1 %vm564_vm0, %v9553_v12 }
 0x2f1   : > { %6989 = vmatpush3.bf16.xpose.msra.mxu1 %v2425_v6  ;;  %6990 = vmatprep.mubr.msk.bf16.mxu1 %vm8121_vm1, %v11482_v44 }
 0x2f2   : > { %6994 = vmatprep.subr.bf16.mxu1 %v11482_v44 }
 0x2f8   : > { %6991 = vmatmul.mubr.msk.bf16.vlgmr.msra.gmra.mxu1 %vm564_vm0, %v9570_v45 }
 0x2f9   : > { %6995 = vmatpush3.bf16.xpose.msra.mxu1 %v2472_v35  ;;  %6996 = vmatprep.mubr.msk.bf16.mxu1 %vm8121_vm1, %v11482_v44 }
 0x2fa   : > { %7000 = vmatprep.subr.bf16.mxu1 %v11482_v44 }
 0x2ff   : > { %v9587_v2 = vpop.f32.mrf.mxu1  ;;  %v9589_v29 = vpop.f32.mrf.mxu0 }
 0x300   : > { %6997 = vmatmul.mubr.msk.bf16.vlgmr.msra.gmra.mxu1 %vm564_vm0, %v9585_v21 }
 0x301   : > { %7001 = vmatpush3.bf16.xpose.msra.mxu1 %v2519_v54  ;;  %v1798_v63 = vpop.f32.mrf.mxu1  ;;  %v2216_v56 = vpop.f32.mrf.mxu0  ;;  %7002 = vmatprep.mubr.msk.bf16.mxu1 %vm8121_vm1, %v11482_v44 }
 0x302   : > { %7006 = vmatprep.subr.bf16.mxu1 %v11482_v44  ;;  %v2295_v23 = vmul.f32 0.17677669, %v2216_v56  ;;  %v9683_v56 = vpack.c.bf16 %v2294_v49, %v2293_v51 }
 0x303   : > { %v9598_v17 = vpop.f32.mrf.mxu1  ;;  %v9600_v57 = vpop.f32.mrf.mxu0 }
 0x304   : > { %v9679_v13 = vpack.c.bf16 %v9598_v17, %v9587_v2 }
 0x305   : > { %v1801_v34 = vpop.f32.mrf.mxu1  ;;  %v2219_v62 = vpop.f32.mrf.mxu0 }
 0x306   : > { %v9608_v31 = vpack.c.bf16 %v1801_v34, %v1798_v63  ;;  %v2296_v60 = vmul.f32 0.17677669, %v2219_v62  ;;  %11490 = vst [vmem:[#allocation29_spill] sm:$0xff] %v9679_v13  ;;  %v2754_v34 = vsel %vm564_vm0, %v9679_v13, 0  ;;  %v2298_v62 = vmul.f32 0.17677669, %v9600_v57 }
 0x307   : > { %v9610_v40 = vpop.f32.mrf.mxu1  ;;  %v9612_v41 = vpop.f32.mrf.mxu0 }
 0x308   : > { %11487 = vst [vmem:[#allocation26_spill] sm:$0xff] %v9608_v31  ;;  %7003 = vmatmul.mubr.msk.bf16.vlgmr.msra.gmra.mxu1 %vm564_vm0, %v9606_v19  ;;  %v2707_v38 = vsel %vm564_vm0, %v9608_v31, 0  ;;  %v9635_v3 = vpack.c.bf16 %v2296_v60, %v2295_v23 }
 0x309   : > { %7007 = vmatpush3.bf16.xpose.msra.mxu1 %v2566_v7  ;;  %v1814_v1 = vpop.f32.mrf.mxu1  ;;  %v2232_v46 = vpop.f32.mrf.mxu0  ;;  %7025 = vmatpush3.bf16.xpose.msra.mxu0 %v2707_v38 }
 0x30a   : > { %7008 = vmatprep.mubr.msk.bf16.mxu1 %vm8121_vm1, %v11482_v44  ;;  %7012 = vmatprep.subr.bf16.mxu1 %v11482_v44  ;;  %v2299_v28 = vmul.f32 0.17677669, %v2232_v46  ;;  %v2297_v46 = vmul.f32 0.17677669, %v9589_v29 }
 0x30b   : > { %v9623_v52 = vpop.f32.mrf.mxu1  ;;  %v9625_v11 = vpop.f32.mrf.mxu0  ;;  %7036 = vmatprep.subr.bf16.mxu0 %v11482_v44 }
 0x30c   : > { %v9699_v5 = vpack.c.bf16 %v9623_v52, %v9610_v40  ;;  %v2302_v52 = vmul.f32 0.17677669, %v9625_v11 }
 0x30d   : > { %v1817_v43 = vpop.f32.mrf.mxu1  ;;  %v2235_v55 = vpop.f32.mrf.mxu0 }
 0x30e   : > { %v9637_v36 = vpack.c.bf16 %v1817_v43, %v1814_v1  ;;  %v2300_v58 = vmul.f32 0.17677669, %v2235_v55  ;;  %11492 = vst [vmem:[#allocation31_spill] sm:$0xff] %v9699_v5  ;;  %v9705_v43 = vpack.c.bf16 %v2298_v62, %v2297_v46  ;;  %v2848_v29 = vsel %vm564_vm0, %v9699_v5, 0 }
 0x310   : > { %11489 = vst [vmem:[#allocation28_spill] sm:$0xff] %v9637_v36  ;;  %7009 = vmatmul.mubr.msk.bf16.vlgmr.msra.gmra.mxu1 %vm564_vm0, %v9633_v16  ;;  %7027 = vmatmul.mubr.msk.bf16.vlgmr.msra.gmra.mxu0 %vm564_vm0, %v9635_v3  ;;  %v2801_v10 = vsel %vm564_vm0, %v9637_v36, 0  ;;  %v9660_v4 = vpack.c.bf16 %v2300_v58, %v2299_v28 }
 0x311   : > { %7013 = vmatpush3.bf16.xpose.msra.mxu1 %v2613_v59  ;;  %7037 = vmatpush3.bf16.xpose.msra.mxu0 %v2801_v10  ;;  %v2301_v10 = vmul.f32 0.17677669, %v9612_v41 }
 0x312   : > { %7014 = vmatprep.mubr.msk.bf16.mxu1 %vm8121_vm1, %v11482_v44  ;;  %7018 = vmatprep.subr.bf16.mxu1 %v11482_v44 }
 0x313   : > { %7038 = vmatprep.mubr.msk.bf16.mxu0 %vm8121_vm1, %v11482_v44  ;;  %7048 = vmatprep.subr.bf16.mxu0 %v11482_v44  ;;  %v9727_v48 = vpack.c.bf16 %v2302_v52, %v2301_v10 }
 0x316   : > { %v6898_v14 = vpop.f32.mrf.mxu1  ;;  %v9662_v6 = vpop.f32.mrf.mxu0 }
 0x317   : > { %v2305_v28 = vmul.f32 0.17677669, %v9662_v6 }
 0x318   : > { %7015 = vmatmul.mubr.msk.bf16.vlgmr.msra.gmra.mxu1 %vm564_vm0, %v9658_v25  ;;  %7039 = vmatmul.mubr.msk.bf16.vlgmr.msra.gmra.mxu0 %vm564_vm0, %v9660_v4  ;;  %v1830_v61 = vpop.f32.mrf.mxu1  ;;  %v2248_v26 = vpop.f32.mrf.mxu0 }
 0x319   : > { %7019 = vmatpush3.bf16.xpose.msra.mxu1 %v2660_v47  ;;  %7020 = vmatprep.mubr.msk.bf16.mxu1 %vm8121_vm1, %v11482_v44  ;;  %v2303_v1 = vmul.f32 0.17677669, %v2248_v26 }
 0x31a   : > { %v6899_v18 = vpop.f32.mrf.mxu1  ;;  %v6971_v35 = vpop.f32.mrf.mxu0  ;;  %7030 = vmatprep.subr.bf16.mxu1 %v11482_v44  ;;  %7050 = vmatprep.mubr.msk.bf16.mxu0 %vm8121_vm1, %v11482_v44 }
 0x31b   : > { %v9723_v30 = vpack.c.bf16 %v6899_v18, %v6898_v14  ;;  %v2306_v41 = vmul.f32 0.17677669, %v6971_v35 }
 0x31c   : > { %v1833_v32 = vpop.f32.mrf.mxu1  ;;  %v2251_v54 = vpop.f32.mrf.mxu0 }
 0x31d   : > { %v9681_v63 = vpack.c.bf16 %v1833_v32, %v1830_v61  ;;  %v2304_v17 = vmul.f32 0.17677669, %v2251_v54  ;;  %11494 = vst [vmem:[#allocation33_spill] sm:$0xff] %v9723_v30  ;;  %v2942_v11 = vsel %vm564_vm0, %v9723_v30, 0  ;;  %v9743_v47 = vpack.c.bf16 %v2306_v41, %v2305_v28 }
 0x31e   : > { %v6902_v24 = vpop.f32.mrf.mxu1  ;;  %v6974_v22 = vpop.f32.mrf.mxu0 }
 0x31f   : > { %11491 = vst [vmem:[#allocation30_spill] sm:$0xff] %v9681_v63  ;;  %v2895_v53 = vsel %vm564_vm0, %v9681_v63, 0  ;;  %v9701_v8 = vpack.c.bf16 %v2304_v17, %v2303_v1  ;;  %v2309_v49 = vmul.f32 0.17677669, %v6974_v22 }
 0x320   : > { %7021 = vmatmul.mubr.msk.bf16.vlgmr.msra.gmra.mxu1 %vm564_vm0, %v9683_v56  ;;  %v1846_v42 = vpop.f32.mrf.mxu1  ;;  %v2264_v2 = vpop.f32.mrf.mxu0  ;;  %7049 = vmatpush3.bf16.xpose.msra.mxu0 %v2895_v53 }
 0x321   : > { %7031 = vmatpush3.bf16.xpose.msra.mxu1 %v2754_v34  ;;  %7032 = vmatprep.mubr.msk.bf16.mxu1 %vm8121_vm1, %v11482_v44  ;;  %v2307_v59 = vmul.f32 0.17677669, %v2264_v2 }
 0x322   : > { %v6903_v7 = vpop.f32.mrf.mxu1  ;;  %v6975_v38 = vpop.f32.mrf.mxu0  ;;  %7042 = vmatprep.subr.bf16.mxu1 %v11482_v44  ;;  %7060 = vmatprep.subr.bf16.mxu0 %v11482_v44 }
 0x323   : > { %v9741_v14 = vpack.c.bf16 %v6903_v7, %v6902_v24  ;;  %v2310_v26 = vmul.f32 0.17677669, %v6975_v38 }
 0x324   : > { %v1849_v60 = vpop.f32.mrf.mxu1  ;;  %v2267_v57 = vpop.f32.mrf.mxu0 }
 0x325   : > { %v9703_v23 = vpack.c.bf16 %v1849_v60, %v1846_v42  ;;  %v2308_v40 = vmul.f32 0.17677669, %v2267_v57  ;;  %11495 = vst [vmem:[#allocation34_spill] sm:$0xff] %v9741_v14  ;;  %v3036_v61 = vsel %vm564_vm0, %v9741_v14, 0  ;;  %v9752_v18 = vpack.c.bf16 %v2310_v26, %v2309_v49 }
 0x327   : > { %11493 = vst [vmem:[#allocation32_spill] sm:$0xff] %v9703_v23  ;;  %7051 = vmatmul.mubr.msk.bf16.vlgmr.msra.gmra.mxu0 %vm564_vm0, %v9701_v8  ;;  %v2989_v55 = vsel %vm564_vm0, %v9703_v23, 0  ;;  %v9725_v58 = vpack.c.bf16 %v2308_v40, %v2307_v59 }
 0x328   : > { %7033 = vmatmul.mubr.msk.bf16.vlgmr.msra.gmra.mxu1 %vm564_vm0, %v9705_v43  ;;  %7061 = vmatpush3.bf16.xpose.msra.mxu0 %v2989_v55 }
 0x329   : > { %7043 = vmatpush3.bf16.xpose.msra.mxu1 %v2848_v29  ;;  %7044 = vmatprep.mubr.msk.bf16.mxu1 %vm8121_vm1, %v11482_v44 }
 0x32a   : > { %7054 = vmatprep.subr.bf16.mxu1 %v11482_v44  ;;  %7062 = vmatprep.mubr.msk.bf16.mxu0 %vm8121_vm1, %v11482_v44 }
 0x32b   : > { %7072 = vmatprep.subr.bf16.mxu0 %v11482_v44 }
 0x32f   : > { %7063 = vmatmul.mubr.msk.bf16.vlgmr.msra.gmra.mxu0 %vm564_vm0, %v9725_v58 }
 0x330   : > { %7045 = vmatmul.mubr.msk.bf16.vlgmr.msra.gmra.mxu1 %vm564_vm0, %v9727_v48  ;;  %7074 = vmatprep.mubr.msk.bf16.mxu0 %vm8121_vm1, %v11482_v44 }
 0x331   : > { %7055 = vmatpush3.bf16.xpose.msra.mxu1 %v2942_v11  ;;  %7056 = vmatprep.mubr.msk.bf16.mxu1 %vm8121_vm1, %v11482_v44 }
 0x332   : > { %7066 = vmatprep.subr.bf16.mxu1 %v11482_v44 }
 0x338   : > { %7057 = vmatmul.mubr.msk.bf16.vlgmr.msra.gmra.mxu1 %vm564_vm0, %v9743_v47 }
 0x339   : > { %7067 = vmatpush3.bf16.xpose.msra.mxu1 %v3036_v61  ;;  %7068 = vmatprep.mubr.msk.bf16.mxu1 %vm8121_vm1, %v11482_v44 }
 0x33a   : > { %7078 = vmatprep.subr.bf16.mxu1 %v11482_v44 }
 0x340   : > { %7069 = vmatmul.mubr.msk.bf16.vlgmr.msra.gmra.mxu1 %vm564_vm0, %v9752_v18 }
 0x341   : > { %7080 = vmatprep.mubr.msk.bf16.mxu1 %vm8121_vm1, %v11482_v44 }
 0x357   : > { %v6910_v6 = vpop.f32.mrf.mxu1 }
 0x359   : > { %v1943_v35 = vpop.f32.mrf.mxu1 }
 0x35b   : > { %v6911_v51 = vpop.f32.mrf.mxu1 }
 0x35c   : > { %v2087_v32 = vpack.c.bf16 %v6911_v51, %v6910_v6 }
 0x35d   : > { %v1946_v54 = vpop.f32.mrf.mxu1 }
 0x35e   : > { %v3124_v24 = vsel %vm564_vm0, %v2087_v32, 0  ;;  %v2086_v53 = vpack.c.bf16 %v1946_v54, %v1943_v35  ;;  %4505 = vrot.lane.b32.xlu1 %v2087_v32, %s8122_s27 }
 0x35f   : > { %v6914_v22 = vpop.f32.mrf.mxu1  ;;  %7079 = vmatpush3.bf16.xpose.msra.mxu1 %v3124_v24 }
 0x360   : > { %4457 = vrot.lane.b32.xlu0 %v2086_v53, %s8122_s27  ;;  %v3080_v34 = vsel %vm564_vm0, %v2086_v53, 0  ;;  %7090 = vmatprep.subr.bf16.mxu1 %v11482_v44 }
 0x361   : > { %v1959_v42 = vpop.f32.mrf.mxu1  ;;  %7073 = vmatpush3.bf16.xpose.msra.mxu0 %v3080_v34 }
 0x362   : > { %7084 = vmatprep.subr.bf16.mxu0 %v11482_v44 }
 0x363   : > { %v6915_v2 = vpop.f32.mrf.mxu1 }
 0x364   : > { %v2089_v17 = vpack.c.bf16 %v6915_v2, %v6914_v22 }
 0x365   : > { %v1962_v62 = vpop.f32.mrf.mxu1 }
 0x366   : > { %v3212_v7 = vsel %vm564_vm0, %v2089_v17, 0  ;;  %v2088_v38 = vpack.c.bf16 %v1962_v62, %v1959_v42  ;;  %4601 = vrot.lane.b32.xlu0 %v2089_v17, %s8122_s27  ;;  %7081 = vmatmul.mubr.msk.bf16.vlgmr.msra.gmra.mxu1 %vm564_vm0, %v9553_v12 }
 0x367   : > { %v6918_v1 = vpop.f32.mrf.mxu1  ;;  %7091 = vmatpush3.bf16.xpose.msra.mxu1 %v3212_v7  ;;  %7092 = vmatprep.mubr.msk.bf16.mxu1 %vm8121_vm1, %v11482_v44 }
 0x368   : > { %7075 = vmatmul.mubr.msk.bf16.vlgmr.msra.gmra.mxu0 %vm564_vm0, %v9540_v37  ;;  %v3168_v46 = vsel %vm564_vm0, %v2088_v38, 0  ;;  %7102 = vmatprep.subr.bf16.mxu1 %v11482_v44 }
 0x369   : > { %v1975_v60 = vpop.f32.mrf.mxu1  ;;  %7085 = vmatpush3.bf16.xpose.msra.mxu0 %v3168_v46  ;;  %7086 = vmatprep.mubr.msk.bf16.mxu0 %vm8121_vm1, %v11482_v44 }
 0x36a   : > { %4553 = vrot.lane.b32.xlu0 %v2088_v38, %s8122_s27  ;;  %7096 = vmatprep.subr.bf16.mxu0 %v11482_v44 }
 0x36b   : > { %v6919_v12 = vpop.f32.mrf.mxu1 }
 0x36c   : > { %v2091_v57 = vpack.c.bf16 %v6919_v12, %v6918_v1 }
 0x36d   : > { %v1978_v55 = vpop.f32.mrf.mxu1 }
 0x36e   : > { %v3300_v29 = vsel %vm564_vm0, %v2091_v57, 0  ;;  %v2090_v40 = vpack.c.bf16 %v1978_v55, %v1975_v60  ;;  %4697 = vrot.lane.b32.xlu0 %v2091_v57, %s8122_s27  ;;  %7093 = vmatmul.mubr.msk.bf16.vlgmr.msra.gmra.mxu1 %vm564_vm0, %v9585_v21 }
 0x36f   : > { %v6922_v37 = vpop.f32.mrf.mxu1  ;;  %7103 = vmatpush3.bf16.xpose.msra.mxu1 %v3300_v29  ;;  %7104 = vmatprep.mubr.msk.bf16.mxu1 %vm8121_vm1, %v11482_v44 }
 0x370   : > { %4649 = vrot.lane.b32.xlu1 %v2090_v40, %s8122_s27  ;;  %7087 = vmatmul.mubr.msk.bf16.vlgmr.msra.gmra.mxu0 %vm564_vm0, %v9570_v45  ;;  %v3256_v52 = vsel %vm564_vm0, %v2090_v40, 0 }
 0x371   : > { %v1991_v59 = vpop.f32.mrf.mxu1  ;;  %7097 = vmatpush3.bf16.xpose.msra.mxu0 %v3256_v52  ;;  %7114 = vmatprep.subr.bf16.mxu1 %v11482_v44 }
 0x372   : > { %7098 = vmatprep.mubr.msk.bf16.mxu0 %vm8121_vm1, %v11482_v44  ;;  %7108 = vmatprep.subr.bf16.mxu0 %v11482_v44 }
 0x373   : > { %v6923_v21 = vpop.f32.mrf.mxu1 }
 0x374   : > { %v9792_v10 = vpack.c.bf16 %v6923_v21, %v6922_v37 }
 0x375   : > { %v1994_v11 = vpop.f32.mrf.mxu1 }
 0x376   : > { %v3388_v41 = vsel %vm564_vm0, %v9792_v10, 0  ;;  %v2092_v28 = vpack.c.bf16 %v1994_v11, %v1991_v59  ;;  %7105 = vmatmul.mubr.msk.bf16.vlgmr.msra.gmra.mxu1 %vm564_vm0, %v9633_v16 }
 0x377   : > { %v6926_v45 = vpop.f32.mrf.mxu1  ;;  %7115 = vmatpush3.bf16.xpose.msra.mxu1 %v3388_v41  ;;  %7116 = vmatprep.mubr.msk.bf16.mxu1 %vm8121_vm1, %v11482_v44 }
 0x378   : > { %4745 = vrot.lane.b32.xlu1 %v2092_v28, %s8122_s27  ;;  %7099 = vmatmul.mubr.msk.bf16.vlgmr.msra.gmra.mxu0 %vm564_vm0, %v9606_v19  ;;  %v3344_v61 = vsel %vm564_vm0, %v2092_v28, 0 }
 0x379   : > { %v2007_v26 = vpop.f32.mrf.mxu1  ;;  %7109 = vmatpush3.bf16.xpose.msra.mxu0 %v3344_v61  ;;  %7126 = vmatprep.subr.bf16.mxu1 %v11482_v44 }
 0x37a   : > { %7110 = vmatprep.mubr.msk.bf16.mxu0 %vm8121_vm1, %v11482_v44  ;;  %7120 = vmatprep.subr.bf16.mxu0 %v11482_v44 }
 0x37b   : > { %v6927_v16 = vpop.f32.mrf.mxu1 }
 0x37c   : > { %v9808_v49 = vpack.c.bf16 %v6927_v16, %v6926_v45 }
 0x37d   : > { %v2010_v6 = vpop.f32.mrf.mxu1 }
 0x37e   : > { %v3476_v35 = vsel %vm564_vm0, %v9808_v49, 0  ;;  %v9812_v51 = vpack.c.bf16 %v2010_v6, %v2007_v26  ;;  %7117 = vmatmul.mubr.msk.bf16.vlgmr.msra.gmra.mxu1 %vm564_vm0, %v9683_v56 }
 0x37f   : > { %v6930_v19 = vpop.f32.mrf.mxu1  ;;  %7127 = vmatpush3.bf16.xpose.msra.mxu1 %v3476_v35  ;;  %7128 = vmatprep.mubr.msk.bf16.mxu1 %vm8121_vm1, %v11482_v44 }
 0x380   : > { %7111 = vmatmul.mubr.msk.bf16.vlgmr.msra.gmra.mxu0 %vm564_vm0, %v9658_v25  ;;  %v3432_v32 = vsel %vm564_vm0, %v9812_v51, 0  ;;  %7138 = vmatprep.subr.bf16.mxu1 %v11482_v44 }
 0x381   : > { %v2023_v54 = vpop.f32.mrf.mxu1  ;;  %7121 = vmatpush3.bf16.xpose.msra.mxu0 %v3432_v32  ;;  %7122 = vmatprep.mubr.msk.bf16.mxu0 %vm8121_vm1, %v11482_v44 }
 0x382   : > { %7132 = vmatprep.subr.bf16.mxu0 %v11482_v44 }
 0x383   : > { %v6931_v56 = vpop.f32.mrf.mxu1 }
 0x384   : > { %v9826_v24 = vpack.c.bf16 %v6931_v56, %v6930_v19 }
 0x385   : > { %v2026_v53 = vpop.f32.mrf.mxu1 }
 0x386   : > { %v3564_v22 = vsel %vm564_vm0, %v9826_v24, 0  ;;  %v9830_v25 = vpack.c.bf16 %v2026_v53, %v2023_v54  ;;  %7129 = vmatmul.mubr.msk.bf16.vlgmr.msra.gmra.mxu1 %vm564_vm0, %v9705_v43 }
 0x387   : > { %7139 = vmatpush3.bf16.xpose.msra.mxu1 %v3564_v22  ;;  %7140 = vmatprep.mubr.msk.bf16.mxu1 %vm8121_vm1, %v11482_v44 }
 0x388   : > { %v6934_v34 = vpop.f32.mrf.mxu1  ;;  %7123 = vmatmul.mubr.msk.bf16.vlgmr.msra.gmra.mxu0 %vm564_vm0, %v9635_v3  ;;  %v3520_v42 = vsel %vm564_vm0, %v9830_v25, 0  ;;  %7150 = vmatprep.subr.bf16.mxu1 %v11482_v44 }
 0x389   : > { %7133 = vmatpush3.bf16.xpose.msra.mxu0 %v3520_v42  ;;  %7134 = vmatprep.mubr.msk.bf16.mxu0 %vm8121_vm1, %v11482_v44 }
 0x38a   : > { %v2039_v2 = vpop.f32.mrf.mxu1  ;;  %7144 = vmatprep.subr.bf16.mxu0 %v11482_v44 }
 0x38c   : > { %v6935_v43 = vpop.f32.mrf.mxu1 }
 0x38d   : > { %v9844_v17 = vpack.c.bf16 %v6935_v43, %v6934_v34 }
 0x38e   : > { %v2042_v62 = vpop.f32.mrf.mxu1  ;;  %7141 = vmatmul.mubr.msk.bf16.vlgmr.msra.gmra.mxu1 %vm564_vm0, %v9727_v48 }
 0x38f   : > { %v3652_v3 = vsel %vm564_vm0, %v9844_v17, 0  ;;  %v9850_v7 = vpack.c.bf16 %v2042_v62, %v2039_v2  ;;  %7152 = vmatprep.mubr.msk.bf16.mxu1 %vm8121_vm1, %v11482_v44 }
 0x390   : > { %7151 = vmatpush3.bf16.xpose.msra.mxu1 %v3652_v3  ;;  %7135 = vmatmul.mubr.msk.bf16.vlgmr.msra.gmra.mxu0 %vm564_vm0, %v9660_v4 }
 0x391   : > { %v3608_v38 = vsel %vm564_vm0, %v9850_v7, 0  ;;  %7146 = vmatprep.mubr.msk.bf16.mxu0 %vm8121_vm1, %v11482_v44  ;;  %7162 = vmatprep.subr.bf16.mxu1 %v11482_v44 }
 0x392   : > { %7145 = vmatpush3.bf16.xpose.msra.mxu0 %v3608_v38 }
 0x393   : > { %7156 = vmatprep.subr.bf16.mxu0 %v11482_v44 }
 0x397   : > { %7153 = vmatmul.mubr.msk.bf16.vlgmr.msra.gmra.mxu1 %vm564_vm0, %v9743_v47 }
 0x398   : > { %7164 = vmatprep.mubr.msk.bf16.mxu1 %vm8121_vm1, %v11482_v44 }
 0x399   : > { %7147 = vmatmul.mubr.msk.bf16.vlgmr.msra.gmra.mxu0 %vm564_vm0, %v9701_v8 }
 0x39a   : > { %7158 = vmatprep.mubr.msk.bf16.mxu0 %vm8121_vm1, %v11482_v44 }
 0x3a0   : > { %v6938_v4 = vpop.f32.mrf.mxu1 }
 0x3a2   : > { %v2055_v48 = vpop.f32.mrf.mxu1 }
 0x3a4   : > { %v6939_v1 = vpop.f32.mrf.mxu1 }
 0x3a5   : > { %v9870_v46 = vpack.c.bf16 %v6939_v1, %v6938_v4 }
 0x3a6   : > { %v2058_v60 = vpop.f32.mrf.mxu1 }
 0x3a7   : > { %v3740_v12 = vsel %vm564_vm0, %v9870_v46, 0  ;;  %v9874_v47 = vpack.c.bf16 %v2058_v60, %v2055_v48 }
 0x3a8   : > { %v9876_v57 = vpop.f32.mrf.mxu1  ;;  %7163 = vmatpush3.bf16.xpose.msra.mxu1 %v3740_v12 }
 0x3a9   : > { %v3784_v8 = vsel %vm3783_vm2, %v9876_v57, -inf  ;;  %v3696_v55 = vsel %vm564_vm0, %v9874_v47, 0  ;;  %7174 = vmatprep.subr.bf16.mxu1 %v11482_v44 }
 0x3aa   : > { %3785 = vmax.xlane.f32.xlu0 %v3784_v8  ;;  %v6980_v29 = vpop.f32.mrf.mxu1  ;;  %7157 = vmatpush3.bf16.xpose.msra.mxu0 %v3696_v55 }
 0x3ab   : > { %7168 = vmatprep.subr.bf16.mxu0 %v11482_v44 }
 0x3ac   : > { %v9884_v40 = vpop.f32.mrf.mxu1 }
 0x3ad   : > { %v3787_v37 = vsel %vm3783_vm2, %v9884_v40, -inf }
 0x3ae   : > { %3788 = vmax.xlane.f32.xlu1 %v3787_v37  ;;  %v6981_v52 = vpop.f32.mrf.mxu1 }
 0x3af   : > { %7165 = vmatmul.mubr.msk.bf16.vlgmr.msra.gmra.mxu1 %vm564_vm0, %v9752_v18 }
 0x3b0   : > { %v9890_v59 = vpop.f32.mrf.mxu1  ;;  %7176 = vmatprep.mubr.msk.bf16.mxu1 %vm8121_vm1, %v11482_v44 }
 0x3b1   : > { %7159 = vmatmul.mubr.msk.bf16.vlgmr.msra.gmra.mxu0 %vm564_vm0, %v9725_v58  ;;  %v3790_v21 = vsel %vm3783_vm2, %v9890_v59, -inf }
 0x3b2   : > { %3791 = vmax.xlane.f32.xlu0 %v3790_v21  ;;  %v6986_v11 = vpop.f32.mrf.mxu1  ;;  %7170 = vmatprep.mubr.msk.bf16.mxu0 %vm8121_vm1, %v11482_v44 }
 0x3b4   : > { %v9900_v41 = vpop.f32.mrf.mxu1 }
 0x3b5   : > { %v3793_v18 = vsel %vm3783_vm2, %v9900_v41, -inf }
 0x3b6   : > { %3794 = vmax.xlane.f32.xlu1 %v3793_v18  ;;  %v6987_v28 = vpop.f32.mrf.mxu1 }
 0x3b8   : > { %v9904_v45 = vpop.f32.mrf.mxu1 }
 0x3b9   : > { %v3796_v58 = vsel %vm3783_vm2, %v9904_v45, -inf }
 0x3ba   : > { %3797 = vmax.xlane.f32.xlu0 %v3796_v58  ;;  %v6992_v61 = vpop.f32.mrf.mxu1 }
 0x3bc   : > { %v9908_v26 = vpop.f32.mrf.mxu1 }
 0x3bd   : > { %v3799_v16 = vsel %vm3783_vm2, %v9908_v26, -inf }
 0x3be   : > { %3800 = vmax.xlane.f32.xlu1 %v3799_v16  ;;  %v6993_v6 = vpop.f32.mrf.mxu1 }
 0x3c0   : > { %v9912_v35 = vpop.f32.mrf.mxu1 }
 0x3c1   : > { %11496 = vst [vmem:[#allocation35_spill] sm:$0xff] %v9912_v35  ;;  %v3802_v19 = vsel %vm3783_vm2, %v9912_v35, -inf }
 0x3c2   : > { %3803 = vmax.xlane.f32.xlu0 %v3802_v19  ;;  %v6998_v32 = vpop.f32.mrf.mxu1 }
 0x3c4   : > { %v9916_v54 = vpop.f32.mrf.mxu1 }
 0x3c5   : > { %11497 = vst [vmem:[#allocation36_spill] sm:$0xff] %v9916_v54  ;;  %v3805_v56 = vsel %vm3783_vm2, %v9916_v54, -inf }
 0x3c6   : > { %3806 = vmax.xlane.f32.xlu1 %v3805_v56  ;;  %v6999_v53 = vpop.f32.mrf.mxu1 }
 0x3c8   : > { %v9920_v22 = vpop.f32.mrf.mxu1 }
 0x3c9   : > { %v3808_v34 = vsel %vm3783_vm2, %v9920_v22, -inf }
 0x3ca   : > { %3809 = vmax.xlane.f32.xlu0 %v3808_v34  ;;  %v7004_v42 = vpop.f32.mrf.mxu1 }
 0x3cc   : > { %v9924_v2 = vpop.f32.mrf.mxu1 }
 0x3cd   : > { %v3811_v29 = vsel %vm3783_vm2, %v9924_v2, -inf }
 0x3ce   : > { %v7005_v43 = vpop.f32.mrf.mxu1 }
 0x3d0   : > { %v9926_v62 = vpop.f32.mrf.mxu1  ;;  %v9928_v3 = vpop.f32.mrf.mxu0 }
 0x3d1   : > { %11498 = vst [vmem:[#allocation37_spill] sm:$0xff] %v9926_v62  ;;  %v4506_v38 = vpop.permute.xlu1 %4505  ;;  %v3814_v4 = vsel %vm3783_vm2, %v9926_v62, -inf  ;;  %v3832_v48 = vsel %vm3783_vm2, %v9928_v3, -inf }
 0x3d2   : > { %3815 = vmax.xlane.f32.xlu0 %v3814_v4  ;;  %v7010_v1 = vpop.f32.mrf.mxu1  ;;  %3833 = vmax.xlane.f32.xlu1 %v3832_v48  ;;  %v7028_v60 = vpop.f32.mrf.mxu0 }
 0x3d3   : > { %7175 = vmatpush3.bf16.msra.mxu1 %v4506_v38  ;;  %v4458_v12 = vpop.permute.xlu0 %4457 }
 0x3d4   : > { %v9934_v8 = vpop.f32.mrf.mxu1  ;;  %v9936_v55 = vpop.f32.mrf.mxu0  ;;  %7169 = vmatpush3.bf16.msra.mxu0 %v4458_v12  ;;  %7186 = vmatprep.subr.bf16.mxu1 %v11482_v44 }
 0x3d5   : > { %11499 = vst [vmem:[#allocation38_spill] sm:$0xff] %v9934_v8  ;;  %7180 = vmatprep.subr.bf16.mxu0 %v11482_v44  ;;  %v3835_v18 = vsel %vm3783_vm2, %v9936_v55, -inf  ;;  %v3817_v34 = vsel %vm3783_vm2, %v9934_v8, -inf }
 0x3d6   : > { %v7011_v37 = vpop.f32.mrf.mxu1  ;;  %3812 = vmax.xlane.f32.xlu1 %v3811_v29  ;;  %v7029_v52 = vpop.f32.mrf.mxu0 }
 0x3d8   : > { %v9942_v21 = vpop.f32.mrf.mxu1  ;;  %v9944_v11 = vpop.f32.mrf.mxu0 }
 0x3d9   : > { %11500 = vst [vmem:[#allocation39_spill] sm:$0xff] %v9944_v11  ;;  %v3820_v28 = vsel %vm3783_vm2, %v9942_v21, -inf  ;;  %v3844_v19 = vsel %vm3783_vm2, %v9944_v11, -inf }
 0x3da   : > { %3836 = vmax.xlane.f32.xlu1 %v3835_v18  ;;  %v7040_v58 = vpop.f32.mrf.mxu0  ;;  %3821 = vmax.xlane.f32.xlu0 %v3820_v28  ;;  %v7016_v61 = vpop.f32.mrf.mxu1 }
 0x3dc   : > { %v9950_v16 = vpop.f32.mrf.mxu1  ;;  %v9952_v6 = vpop.f32.mrf.mxu0 }
 0x3dd   : > { %11501 = vst [vmem:[#allocation40_spill] sm:$0xff] %v9952_v6  ;;  %v3847_v38 = vsel %vm3783_vm2, %v9952_v6, -inf  ;;  %v3823_v58 = vsel %vm3783_vm2, %v9950_v16, -inf }
 0x3de   : > { %3845 = vmax.xlane.f32.xlu1 %v3844_v19  ;;  %v7017_v32 = vpop.f32.mrf.mxu1  ;;  %v7041_v56 = vpop.f32.mrf.mxu0 }
 0x3e0   : > { %v9956_v53 = vpop.f32.mrf.mxu1 }
 0x3e1   : > { %11502 = vst [vmem:[#allocation41_spill] sm:$0xff] %v9956_v53 }
 0x3e2   : > { %3818 = vmax.xlane.f32.xlu1 %v3817_v34  ;;  %v7022_v42 = vpop.f32.mrf.mxu1  ;;  %v3826_v34 = vsel %vm3783_vm2, %v9956_v53, -inf }
 0x3e4   : > { %v9960_v43 = vpop.f32.mrf.mxu1 }
 0x3e5   : > { %11503 = vst [vmem:[#allocation42_spill] sm:$0xff] %v9960_v43 }
 0x3e6   : > { %3848 = vmax.xlane.f32.xlu1 %v3847_v38  ;;  %v7023_v4 = vpop.f32.mrf.mxu1 }
 0x3e7   : > { %v9964_v48 = vpop.f32.mrf.mxu0 }
 0x3e8   : > { %11504 = vst [vmem:[#allocation43_spill] sm:$0xff] %v9964_v48  ;;  %v9966_v1 = vpop.f32.mrf.mxu1  ;;  %v3856_v60 = vsel %vm3783_vm2, %v9964_v48, -inf }
 0x3e9   : > { %11505 = vst [vmem:[#allocation44_spill] sm:$0xff] %v9966_v1  ;;  %v7052_v12 = vpop.f32.mrf.mxu0 }
 0x3ea   : > { %3857 = vmax.xlane.f32.xlu1 %v3856_v60  ;;  %v7034_v29 = vpop.f32.mrf.mxu1 }
 0x3eb   : > { %v9970_v37 = vpop.f32.mrf.mxu0 }
 0x3ec   : > { %11506 = vst [vmem:[#allocation45_spill] sm:$0xff] %v9970_v37  ;;  %v9972_v52 = vpop.f32.mrf.mxu1  ;;  %v3859_v18 = vsel %vm3783_vm2, %v9970_v37, -inf }
 0x3ed   : > { %11507 = vst [vmem:[#allocation46_spill] sm:$0xff] %v9972_v52  ;;  %v7053_v28 = vpop.f32.mrf.mxu0  ;;  %3860 = vmax.xlane.f32.xlu0 %v3859_v18  ;;  %v3829_v18 = vsel %vm3783_vm2, %v9960_v43, -inf }
 0x3ee   : > { %3824 = vmax.xlane.f32.xlu1 %v3823_v58  ;;  %v7035_v61 = vpop.f32.mrf.mxu1 }
 0x3ef   : > { %v9978_v19 = vpop.f32.mrf.mxu0 }
 0x3f0   : > { %11508 = vst [vmem:[#allocation47_spill] sm:$0xff] %v9978_v19  ;;  %v9980_v32 = vpop.f32.mrf.mxu1  ;;  %v3868_v56 = vsel %vm3783_vm2, %v9978_v19, -inf }
 0x3f1   : > { %11509 = vst [vmem:[#allocation48_spill] sm:$0xff] %v9980_v32  ;;  %v7064_v42 = vpop.f32.mrf.mxu0  ;;  %3827 = vmax.xlane.f32.xlu0 %v3826_v34 }
 0x3f2   : > { %3869 = vmax.xlane.f32.xlu1 %v3868_v56  ;;  %v7046_v38 = vpop.f32.mrf.mxu1 }
 0x3f3   : > { %v9986_v4 = vpop.f32.mrf.mxu0 }
 0x3f4   : > { %11510 = vst [vmem:[#allocation49_spill] sm:$0xff] %v9986_v4  ;;  %v9988_v60 = vpop.f32.mrf.mxu1  ;;  %v3871_v12 = vsel %vm3783_vm2, %v9986_v4, -inf }
 0x3f5   : > { %11511 = vst [vmem:[#allocation50_spill] sm:$0xff] %v9988_v60  ;;  %v7065_v29 = vpop.f32.mrf.mxu0  ;;  %3872 = vmax.xlane.f32.xlu0 %v3871_v12 }
 0x3f6   : > { %3830 = vmax.xlane.f32.xlu1 %v3829_v18  ;;  %v7047_v28 = vpop.f32.mrf.mxu1 }
 0x3f8   : > { %v9994_v58 = vpop.f32.mrf.mxu1 }
 0x3f9   : > { %11512 = vst [vmem:[#allocation51_spill] sm:$0xff] %v9994_v58 }
 0x3fa   : > { %v7058_v61 = vpop.f32.mrf.mxu1 }
 0x3fc   : > { %v9996_v34 = vpop.f32.mrf.mxu1 }
 0x3fd   : > { %11513 = vst [vmem:[#allocation52_spill] sm:$0xff] %v9996_v34 }
 0x3fe   : > { %v7059_v56 = vpop.f32.mrf.mxu1 }
 0x400   : > { %v9998_v42 = vpop.f32.mrf.mxu1 }
 0x401   : > { %11514 = vst [vmem:[#allocation53_spill] sm:$0xff] %v9998_v42 }
 0x402   : > { %v7070_v38 = vpop.f32.mrf.mxu1 }
 0x404   : > { %v10000_v19 = vpop.f32.mrf.mxu1 }
 0x405   : > { %11515 = vst [vmem:[#allocation54_spill] sm:$0xff] %v10000_v19 }
 0x406   : > { %v7071_v6 = vpop.f32.mrf.mxu1 }
 0x407   : > { %v3838_v6 = vsel %vm3783_vm2, %v9966_v1, -inf }
 0x426   : > { %v10002_v4 = vpop.f32.mrf.mxu1 }
 0x428   : > { %v10004_v12 = vpop.f32.mrf.mxu0  ;;  %v7082_v29 = vpop.f32.mrf.mxu1 }
 0x429   : > { %v3880_v18 = vsel %vm3783_vm2, %v10004_v12, -inf }
 0x42a   : > { %v7076_v28 = vpop.f32.mrf.mxu0  ;;  %3881 = vmax.xlane.f32.xlu0 %v3880_v18  ;;  %v10008_v61 = vpop.f32.mrf.mxu1 }
 0x42c   : > { %v10010_v11 = vpop.f32.mrf.mxu0  ;;  %v7083_v56 = vpop.f32.mrf.mxu1 }
 0x42d   : > { %v3883_v38 = vsel %vm3783_vm2, %v10010_v11, -inf  ;;  %v3841_v56 = vsel %vm3783_vm2, %v9972_v52, -inf }
 0x42e   : > { %v7077_v23 = vpop.f32.mrf.mxu0  ;;  %3884 = vmax.xlane.f32.xlu1 %v3883_v38  ;;  %3839 = vmax.xlane.f32.xlu0 %v3838_v6  ;;  %v10016_v29 = vpop.f32.mrf.mxu1  ;;  %v3850_v38 = vsel %vm3783_vm2, %v9980_v32, -inf  ;;  %v3853_v6 = vsel %vm3783_vm2, %v9988_v60, -inf }
 0x42f   : > { %11516 = vst [vmem:[#allocation55_spill] sm:$0xff] %v10016_v29 }
 0x430   : > { %v10018_v63 = vpop.f32.mrf.mxu0  ;;  %v7094_v28 = vpop.f32.mrf.mxu1 }
 0x431   : > { %v3892_v18 = vsel %vm3783_vm2, %v10018_v63, -inf }
 0x432   : > { %v7088_v43 = vpop.f32.mrf.mxu0  ;;  %3893 = vmax.xlane.f32.xlu0 %v3892_v18  ;;  %3842 = vmax.xlane.f32.xlu1 %v3841_v56  ;;  %v10024_v36 = vpop.f32.mrf.mxu1 }
 0x433   : > { %11517 = vst [vmem:[#allocation56_spill] sm:$0xff] %v10024_v36  ;;  %v3901_v5 = vsel %vm3783_vm2, %v10024_v36, -inf  ;;  %v10138_v36 = vpop.permute.xlu0 %4601 }
 0x434   : > { %v10026_v1 = vpop.f32.mrf.mxu0  ;;  %v7095_v23 = vpop.f32.mrf.mxu1  ;;  %11534 = vst [vmem:[#allocation73_spill] sm:$0xff] %v10138_v36 }
 0x435   : > { %v3895_v18 = vsel %vm3783_vm2, %v10026_v1, -inf }
 0x436   : > { %v7089_v28 = vpop.f32.mrf.mxu0  ;;  %3851 = vmax.xlane.f32.xlu1 %v3850_v38  ;;  %3854 = vmax.xlane.f32.xlu0 %v3853_v6  ;;  %v10032_v53 = vpop.f32.mrf.mxu1  ;;  %v3862_v6 = vsel %vm3783_vm2, %v9994_v58, -inf }
 0x437   : > { %11518 = vst [vmem:[#allocation57_spill] sm:$0xff] %v10032_v53  ;;  %v3865_v28 = vsel %vm3783_vm2, %v9996_v34, -inf }
 0x438   : > { %v10034_v52 = vpop.f32.mrf.mxu0  ;;  %v7106_v43 = vpop.f32.mrf.mxu1 }
 0x439   : > { %v3904_v56 = vsel %vm3783_vm2, %v10034_v52, -inf }
 0x43a   : > { %v7100_v23 = vpop.f32.mrf.mxu0  ;;  %3896 = vmax.xlane.f32.xlu1 %v3895_v18  ;;  %3905 = vmax.xlane.f32.xlu0 %v3904_v56  ;;  %v10040_v32 = vpop.f32.mrf.mxu1 }
 0x43b   : > { %11519 = vst [vmem:[#allocation58_spill] sm:$0xff] %v10040_v32 }
 0x43c   : > { %v10042_v60 = vpop.f32.mrf.mxu0  ;;  %v7107_v38 = vpop.f32.mrf.mxu1 }
 0x43d   : > { %v3907_v56 = vsel %vm3783_vm2, %v10042_v60, -inf }
 0x43e   : > { %v7101_v43 = vpop.f32.mrf.mxu0  ;;  %3863 = vmax.xlane.f32.xlu1 %v3862_v6  ;;  %3866 = vmax.xlane.f32.xlu0 %v3865_v28  ;;  %v10048_v8 = vpop.f32.mrf.mxu1 }
 0x43f   : > { %11520 = vst [vmem:[#allocation59_spill] sm:$0xff] %v10048_v8  ;;  %v3886_v43 = vsel %vm3783_vm2, %v10002_v4, -inf }
 0x440   : > { %v10050_v31 = vpop.f32.mrf.mxu0  ;;  %v7118_v18 = vpop.f32.mrf.mxu1 }
 0x441   : > { %v3916_v23 = vsel %vm3783_vm2, %v10050_v31, -inf }
 0x442   : > { %v7112_v38 = vpop.f32.mrf.mxu0  ;;  %3908 = vmax.xlane.f32.xlu1 %v3907_v56  ;;  %3917 = vmax.xlane.f32.xlu0 %v3916_v23  ;;  %v10056_v58 = vpop.f32.mrf.mxu1 }
 0x443   : > { %11521 = vst [vmem:[#allocation60_spill] sm:$0xff] %v10056_v58  ;;  %v3898_v38 = vsel %vm3783_vm2, %v10016_v29, -inf  ;;  %v3877_v29 = vsel %vm3783_vm2, %v10000_v19, -inf }
 0x444   : > { %v10058_v34 = vpop.f32.mrf.mxu0  ;;  %v7119_v6 = vpop.f32.mrf.mxu1 }
 0x445   : > { %v3919_v28 = vsel %vm3783_vm2, %v10058_v34, -inf }
 0x446   : > { %v7113_v18 = vpop.f32.mrf.mxu0  ;;  %3920 = vmax.xlane.f32.xlu1 %v3919_v28  ;;  %3887 = vmax.xlane.f32.xlu0 %v3886_v43  ;;  %v10064_v37 = vpop.f32.mrf.mxu1  ;;  %v3889_v43 = vsel %vm3783_vm2, %v10008_v61, -inf }
 0x447   : > { %11522 = vst [vmem:[#allocation61_spill] sm:$0xff] %v10064_v37  ;;  %v3910_v18 = vsel %vm3783_vm2, %v10032_v53, -inf }
 0x448   : > { %v10066_v14 = vpop.f32.mrf.mxu0  ;;  %v7130_v56 = vpop.f32.mrf.mxu1 }
 0x449   : > { %v3928_v23 = vsel %vm3783_vm2, %v10066_v14, -inf }
 0x44a   : > { %v7124_v6 = vpop.f32.mrf.mxu0  ;;  %3929 = vmax.xlane.f32.xlu1 %v3928_v23  ;;  %3899 = vmax.xlane.f32.xlu0 %v3898_v38  ;;  %v10072_v62 = vpop.f32.mrf.mxu1 }
 0x44b   : > { %11523 = vst [vmem:[#allocation62_spill] sm:$0xff] %v10072_v62 }
 0x44c   : > { %v10074_v9 = vpop.f32.mrf.mxu0  ;;  %v7131_v28 = vpop.f32.mrf.mxu1 }
 0x44d   : > { %11524 = vst [vmem:[#allocation63_spill] sm:$0xff] %v10074_v9  ;;  %v3931_v38 = vsel %vm3783_vm2, %v10074_v9, -inf }
 0x44e   : > { %v7125_v56 = vpop.f32.mrf.mxu0  ;;  %3890 = vmax.xlane.f32.xlu1 %v3889_v43  ;;  %3911 = vmax.xlane.f32.xlu0 %v3910_v18  ;;  %v10080_v48 = vpop.f32.mrf.mxu1 }
 0x44f   : > { %11525 = vst [vmem:[#allocation64_spill] sm:$0xff] %v10080_v48 }
 0x450   : > { %v10082_v30 = vpop.f32.mrf.mxu0  ;;  %v7142_v23 = vpop.f32.mrf.mxu1 }
 0x451   : > { %11526 = vst [vmem:[#allocation65_spill] sm:$0xff] %v10082_v30  ;;  %v3940_v56 = vsel %vm3783_vm2, %v10082_v30, -inf }
 0x452   : > { %v7136_v6 = vpop.f32.mrf.mxu0  ;;  %3932 = vmax.xlane.f32.xlu1 %v3931_v38  ;;  %v10086_v28 = vpop.f32.mrf.mxu1 }
 0x454   : > { %v10088_v54 = vpop.f32.mrf.mxu0  ;;  %v7143_v27 = vpop.f32.mrf.mxu1 }
 0x455   : > { %11527 = vst [vmem:[#allocation66_spill] sm:$0xff] %v10088_v54 }
 0x456   : > { %v7137_v43 = vpop.f32.mrf.mxu0  ;;  %3941 = vmax.xlane.f32.xlu1 %v3940_v56 }
 0x457   : > { %v10092_v18 = vpop.f32.mrf.mxu1  ;;  %v3943_v43 = vsel %vm3783_vm2, %v10088_v54, -inf }
 0x459   : > { %v10094_v53 = vpop.f32.mrf.mxu0  ;;  %v7154_v23 = vpop.f32.mrf.mxu1 }
 0x45a   : > { %11528 = vst [vmem:[#allocation67_spill] sm:$0xff] %v10094_v53  ;;  %3902 = vmax.xlane.f32.xlu1 %v3901_v5  ;;  %v3952_v38 = vsel %vm3783_vm2, %v10094_v53, -inf  ;;  %v3913_v5 = vsel %vm3783_vm2, %v10040_v32, -inf  ;;  %v3925_v53 = vsel %vm3783_vm2, %v10056_v58, -inf }
 0x45b   : > { %3953 = vmax.xlane.f32.xlu0 %v3952_v38  ;;  %v7148_v6 = vpop.f32.mrf.mxu0  ;;  %v10100_v27 = vpop.f32.mrf.mxu1  ;;  %v3922_v38 = vsel %vm3783_vm2, %v10048_v8, -inf }
 0x45c   : > { %v10112_v6 = vpop.permute.xlu1 %4649 }
 0x45d   : > { %v10104_v56 = vpop.f32.mrf.mxu0  ;;  %v7155_v30 = vpop.f32.mrf.mxu1 }
 0x45e   : > { %11529 = vst [vmem:[#allocation68_spill] sm:$0xff] %v10104_v56  ;;  %3944 = vmax.xlane.f32.xlu1 %v3943_v43  ;;  %v3955_v23 = vsel %vm3783_vm2, %v10104_v56, -inf }
 0x45f   : > { %v7149_v9 = vpop.f32.mrf.mxu0  ;;  %3956 = vmax.xlane.f32.xlu0 %v3955_v23 }
 0x460   : > { %v10116_v30 = vpop.permute.xlu1 %4745  ;;  %v3874_v9 = vsel %vm3783_vm2, %v9998_v42, -inf }
 0x461   : > { %11530 = vst [vmem:[#allocation69_spill] sm:$0xff] %v10116_v30 }
 0x462   : > { %3914 = vmax.xlane.f32.xlu1 %v3913_v5 }
 0x463   : > { %3923 = vmax.xlane.f32.xlu0 %v3922_v38 }
 0x464   : > { %v10120_v43 = vpop.xlane.xlu1 %3788 }
 0x466   : > { %3926 = vmax.xlane.f32.xlu1 %v3925_v53 }
 0x468   : > { %v10124_v5 = vpop.xlane.xlu1 %3794 }
 0x46a   : > { %3875 = vmax.xlane.f32.xlu1 %v3874_v9 }
 0x46c   : > { %v10132_v58 = vpop.xlane.xlu1 %3800 }
 0x46f   : > { %v10122_v23 = vpop.f32.mrf.mxu1 }
 0x471   : > { %v10126_v56 = vpop.f32.mrf.mxu0  ;;  %v7166_v54 = vpop.f32.mrf.mxu1 }
 0x472   : > { %11531 = vst [vmem:[#allocation70_spill] sm:$0xff] %v10126_v56  ;;  %v3964_v38 = vsel %vm3783_vm2, %v10126_v56, -inf  ;;  %v10140_v54 = vpop.xlane.xlu1 %3806 }
 0x473   : > { %v7160_v8 = vpop.f32.mrf.mxu0  ;;  %3965 = vmax.xlane.f32.xlu0 %v3964_v38  ;;  %v10130_v53 = vpop.f32.mrf.mxu1  ;;  %11535 = vst [vmem:[#allocation74_spill] sm:$0xff] %v10140_v54 }
 0x474   : > { %11532 = vst [vmem:[#allocation71_spill] sm:$0xff] %v10130_v53  ;;  %v3934_v8 = vsel %vm3783_vm2, %v10064_v37, -inf  ;;  %v10146_v38 = vpop.permute.xlu0 %4553 }
 0x475   : > { %v10134_v42 = vpop.f32.mrf.mxu0  ;;  %v7167_v9 = vpop.f32.mrf.mxu1 }
 0x476   : > { %11533 = vst [vmem:[#allocation72_spill] sm:$0xff] %v10134_v42  ;;  %v3967_v32 = vsel %vm3783_vm2, %v10134_v42, -inf  ;;  %v10148_v56 = vpop.xlane.xlu1 %3833  ;;  %v3937_v9 = vsel %vm3783_vm2, %v10072_v62, -inf }
 0x477   : > { %v7161_v30 = vpop.f32.mrf.mxu0  ;;  %3968 = vmax.xlane.f32.xlu0 %v3967_v32 }
 0x478   : > { %v10154_v32 = vpop.permute.xlu0 %4697 }
 0x479   : > { %11536 = vst [vmem:[#allocation75_spill] sm:$0xff] %v10154_v32 }
 0x47a   : > { %v10156_v30 = vpop.xlane.xlu1 %3812 }
 0x47b   : > { %3935 = vmax.xlane.f32.xlu0 %v3934_v8  ;;  %4841 = vrot.lane.b32.xlu1 %v9812_v51, %s8122_s27 }
 0x47c   : > { %v3786_v8 = vpop.xlane.xlu0 %3785 }
 0x47e   : > { %v10162_v51 = vpop.xlane.xlu1 %3836 }
 0x47f   : > { %3938 = vmax.xlane.f32.xlu0 %v3937_v9  ;;  %4889 = vrot.lane.b32.xlu1 %v9808_v49, %s8122_s27 }
 0x480   : > { %v10164_v42 = vpop.xlane.xlu0 %3791 }
 0x482   : > { %v10168_v49 = vpop.xlane.xlu1 %3845 }
 0x483   : > { %4985 = vrot.lane.b32.xlu1 %v9826_v24, %s8122_s27  ;;  %11537 = vst [vmem:[#allocation76_spill] sm:$0xff] %v10168_v49 }
 0x484   : > { %v3798_v9 = vpop.xlane.xlu0 %3797 }
 0x486   : > { %v10174_v24 = vpop.xlane.xlu1 %3818 }
 0x487   : > { %5033 = vrot.lane.b32.xlu1 %v9850_v7, %s8122_s27  ;;  %11538 = vst [vmem:[#allocation77_spill] sm:$0xff] %v10174_v24 }
 0x488   : > { %v10172_v62 = vpop.xlane.xlu0 %3803 }
 0x48a   : > { %v10180_v32 = vpop.xlane.xlu1 %3848 }
 0x48b   : > { %5081 = vrot.lane.b32.xlu1 %v9844_v17, %s8122_s27  ;;  %11540 = vst [vmem:[#allocation79_spill] sm:$0xff] %v10180_v32 }
 0x48c   : > { %v3810_v7 = vpop.xlane.xlu0 %3809 }
 0x48e   : > { %v10184_v17 = vpop.xlane.xlu1 %3857 }
 0x48f   : > { %5129 = vrot.lane.b32.xlu1 %v9874_v47, %s8122_s27  ;;  %11541 = vst [vmem:[#allocation80_spill] sm:$0xff] %v10184_v17 }
 0x490   : > { %v10178_v37 = vpop.xlane.xlu0 %3815 }
 0x491   : > { %11539 = vst [vmem:[#allocation78_spill] sm:$0xff] %v10178_v37 }
 0x492   : > { %v10188_v54 = vpop.xlane.xlu1 %3824 }
 0x494   : > { %v10182_v36 = vpop.xlane.xlu0 %3821 }
 0x495   : > { %4793 = vrot.lane.b32.xlu0 %v9792_v10, %s8122_s27  ;;  %v3946_v10 = vsel %vm3783_vm2, %v10080_v48, -inf }
 0x496   : > { %v10192_v33 = vpop.xlane.xlu1 %3869 }
 0x497   : > { %11544 = vst [vmem:[#allocation83_spill] sm:$0xff] %v10192_v33  ;;  %v3949_v33 = vsel %vm3783_vm2, %v10086_v28, -inf }
 0x498   : > { %v10186_v49 = vpop.xlane.xlu0 %3860 }
 0x499   : > { %11542 = vst [vmem:[#allocation81_spill] sm:$0xff] %v10186_v49 }
 0x49a   : > { %v10198_v37 = vpop.xlane.xlu1 %3830 }
 0x49b   : > { %11546 = vst [vmem:[#allocation85_spill] sm:$0xff] %v10198_v37 }
 0x49c   : > { %v10190_v47 = vpop.xlane.xlu0 %3827 }
 0x49d   : > { %11543 = vst [vmem:[#allocation82_spill] sm:$0xff] %v10190_v47 }
 0x4a0   : > { %v10194_v24 = vpop.xlane.xlu0 %3872 }
 0x4a1   : > { %11545 = vst [vmem:[#allocation84_spill] sm:$0xff] %v10194_v24 }
 0x4b3   : > { %v3882_v32 = vpop.xlane.xlu0 %3881  ;;  %3947 = vmax.xlane.f32.xlu1 %v3946_v10  ;;  %v3973_v10 = vsel %vm3783_vm2, %v10130_v53, -inf }
 0x4b4   : > { %v3976_v17 = vmax.f32 %v3786_v8, %v3882_v32  ;;  %3878 = vmax.xlane.f32.xlu0 %v3877_v29 }
 0x4b6   : > { %v4008_v49 = vsub.f32 %v9876_v57, %v3976_v17  ;;  %v4104_v47 = vsub.f32 %v10004_v12, %v3976_v17  ;;  %v3958_v57 = vsel %vm3783_vm2, %v10092_v18, -inf }
 0x4b7   : > { %v3885_v24 = vpop.xlane.xlu1 %3884  ;;  %v10206_v35 = vpop.xlane.xlu0 %3839  ;;  %3950 = vmax.xlane.f32.xlu1 %v3949_v33  ;;  %v3961_v33 = vsel %vm3783_vm2, %v10100_v27, -inf }
 0x4b8   : > { %v4040_v48 = vmul.f32 1.442695, %v4008_v49  ;;  %v3977_v37 = vmax.f32 %v10120_v43, %v3885_v24  ;;  %v4136_v13 = vmul.f32 1.442695, %v4104_v47 }
 0x4ba   : > { %v4009_v19 = vsub.f32 %v9884_v40, %v3977_v37  ;;  %v4105_v32 = vsub.f32 %v10010_v11, %v3977_v37  ;;  %7645 = vpow2.f32 %v4040_v48  ;;  %v3970_v37 = vsel %vm3783_vm2, %v10122_v23, -inf }
 0x4bb   : > { %v3894_v29 = vpop.xlane.xlu0 %3893  ;;  %v10213_v12 = vpop.xlane.xlu1 %3842  ;;  %3959 = vmax.xlane.f32.xlu1 %v3958_v57  ;;  %7647 = vpow2.f32 %v4136_v13 }
 0x4bc   : > { %v4042_v8 = vmul.f32 1.442695, %v4009_v19  ;;  %v4138_v17 = vmul.f32 1.442695, %v4105_v32  ;;  %v3980_v11 = vmax.f32 %v3798_v9, %v3894_v29 }
 0x4be   : > { %7649 = vpow2.f32 %v4042_v8  ;;  %v4108_v48 = vsub.f32 %v10018_v63, %v3980_v11  ;;  %v4012_v29 = vsub.f32 %v9904_v45, %v3980_v11 }
 0x4bf   : > { %7651 = vpow2.f32 %v4138_v17  ;;  %v10217_v43 = vpop.xlane.xlu1 %3851  ;;  %v10219_v40 = vpop.xlane.xlu0 %3854  ;;  %3962 = vmax.xlane.f32.xlu1 %v3961_v33 }
 0x4c0   : > { %v4144_v8 = vmul.f32 1.442695, %v4108_v48  ;;  %v4048_v45 = vmul.f32 1.442695, %v4012_v29 }
 0x4c3   : > { %v3897_v49 = vpop.xlane.xlu1 %3896  ;;  %v3906_v24 = vpop.xlane.xlu0 %3905  ;;  %3971 = vmax.xlane.f32.xlu1 %v3970_v37 }
 0x4c4   : > { %v3981_v13 = vmax.f32 %v10132_v58, %v3897_v49  ;;  %v3984_v19 = vmax.f32 %v3810_v7, %v3906_v24 }
 0x4c6   : > { %v4109_v47 = vsub.f32 %v10026_v1, %v3981_v13  ;;  %v4013_v32 = vsub.f32 %v9908_v26, %v3981_v13  ;;  %v4112_v58 = vsub.f32 %v10034_v52, %v3984_v19  ;;  %v4016_v52 = vsub.f32 %v9920_v22, %v3984_v19 }
 0x4c7   : > { %v10229_v57 = vpop.xlane.xlu1 %3863  ;;  %v10231_v9 = vpop.xlane.xlu0 %3866  ;;  %3974 = vmax.xlane.f32.xlu1 %v3973_v10 }
 0x4c8   : > { %v4146_v17 = vmul.f32 1.442695, %v4109_v47  ;;  %v10234_v63 = vpop.eup %7645  ;;  %v4050_v26 = vmul.f32 1.442695, %v4013_v32  ;;  %v4152_v48 = vmul.f32 1.442695, %v4112_v58 }
 0x4c9   : > { %v10237_v7 = vpop.eup %7647 }
 0x4ca   : > { %4937 = vrot.lane.b32.xlu0 %v9830_v25, %s8122_s27  ;;  %7653 = vpow2.f32 %v4146_v17 }
 0x4cb   : > { %v10241_v1 = vpop.eup %7649  ;;  %v3909_v33 = vpop.xlane.xlu1 %3908  ;;  %7655 = vpow2.f32 %v4144_v8 }
 0x4cc   : > { %v3918_v37 = vpop.xlane.xlu0 %3917  ;;  %v10243_v49 = vpop.eup %7651  ;;  %v3985_v11 = vmax.f32 %v10156_v30, %v3909_v33  ;;  %7657 = vpow2.f32 %v4050_v26 }
 0x4cd   : > { %v3988_v24 = vmax.f32 %v10182_v36, %v3918_v37  ;;  %v4440_v25 = vpack.c.bf16 %v10243_v49, %v10237_v7  ;;  %7659 = vpow2.f32 %v4048_v45 }
 0x4ce   : > { %v4017_v47 = vsub.f32 %v9924_v2, %v3985_v11  ;;  %v4113_v10 = vsub.f32 %v10042_v60, %v3985_v11  ;;  %5273 = vrot.lane.b32.xlu0 %v9538_v39, %s8122_s27  ;;  %v4056_v2 = vmul.f32 1.442695, %v4016_v52  ;;  %7661 = vpow2.f32 %v4152_v48 }
 0x4cf   : > { %v4020_v30 = vsub.f32 %v9942_v21, %v3988_v24  ;;  %7171 = vmatmul.mubr.msk.bf16.vlgmr.msra.gmra.mxu0 %vm3783_vm2, %v4440_v25  ;;  %v3921_v36 = vpop.xlane.xlu1 %3920  ;;  %v4116_v8 = vsub.f32 %v10050_v31, %v3988_v24 }
 0x4d0   : > { %v3888_v22 = vpop.xlane.xlu0 %3887  ;;  %v4058_v19 = vmul.f32 1.442695, %v4017_v47  ;;  %v4154_v32 = vmul.f32 1.442695, %v4113_v10  ;;  %7181 = vmatpush3.bf16.msra.mxu0 %v10146_v38  ;;  %v3989_v29 = vmax.f32 %v10188_v54, %v3921_v36  ;;  %7182 = vmatprep.mubr.msk.bf16.mxu0 %vm8121_vm1, %v11482_v44  ;;  %v11589_v10 = vld [vmem:[#allocation61_spill] sm:$0xff] }
 0x4d1   : > { %7192 = vmatprep.subr.bf16.mxu0 %v11482_v44  ;;  %v3978_v60 = vmax.f32 %v10164_v42, %v3888_v22  ;;  %v4064_v38 = vmul.f32 1.442695, %v4020_v30 }
 0x4d2   : > { %7663 = vpow2.f32 %v4058_v19  ;;  %v4021_v39 = vsub.f32 %v9950_v16, %v3989_v29  ;;  %v4117_v21 = vsub.f32 %v10058_v34, %v3989_v29  ;;  %5369 = vrot.lane.b32.xlu0 %v9566_v20, %s8122_s27  ;;  %v4160_v20 = vmul.f32 1.442695, %v4116_v8 }
 0x4d3   : > { %7665 = vpow2.f32 %v4154_v32  ;;  %v3930_v54 = vpop.xlane.xlu1 %3929  ;;  %v4106_v26 = vsub.f32 %v10002_v4, %v3978_v60  ;;  %v4010_v4 = vsub.f32 %v9890_v59, %v3978_v60  ;;  %v11550_v32 = vld [vmem:[#allocation24_spill] sm:$0xff] }
 0x4d4   : > { %v4066_v17 = vmul.f32 1.442695, %v4021_v39  ;;  %7667 = vpow2.f32 %v4056_v2  ;;  %v4162_v58 = vmul.f32 1.442695, %v4117_v21  ;;  %v3992_v16 = vmax.f32 %v10148_v56, %v3930_v54  ;;  %v3900_v33 = vpop.xlane.xlu0 %3899  ;;  %v11551_v2 = vld [vmem:[#allocation63_spill] sm:$0xff] }
 0x4d5   : > { %v4140_v45 = vmul.f32 1.442695, %v4106_v26  ;;  %v11552_v54 = vld [vmem:[#allocation31_spill] sm:$0xff] }
 0x4d6   : > { %7669 = vpow2.f32 %v4066_v17  ;;  %5465 = vrot.lane.b32.xlu0 %v9604_v50, %s8122_s27  ;;  %v4024_v11 = vsub.f32 %v9928_v3, %v3992_v16  ;;  %v4120_v59 = vsub.f32 %v10066_v14, %v3992_v16  ;;  %v4044_v14 = vmul.f32 1.442695, %v4010_v4 }
 0x4d7   : > { %7671 = vpow2.f32 %v4064_v38  ;;  %v3891_v34 = vpop.xlane.xlu1 %3890  ;;  %v10273_v42 = vpop.eup %7653 }
 0x4d8   : > { %v3979_v37 = vmax.f32 %v10124_v5, %v3891_v34  ;;  %5177 = vrot.lane.b32.xlu1 %v9870_v46, %s8122_s27  ;;  %v10278_v31 = vpop.eup %7655  ;;  %7673 = vpow2.f32 %v4162_v58  ;;  %v3982_v5 = vmax.f32 %v10172_v62, %v3900_v33  ;;  %v4072_v25 = vmul.f32 1.442695, %v4024_v11  ;;  %v3912_v19 = vpop.xlane.xlu0 %3911  ;;  %v11556_v11 = vld [vmem:[#allocation69_spill] sm:$0xff] }
 0x4d9   : > { %v4442_v56 = vpack.c.bf16 %v10273_v42, %v10278_v31  ;;  %v10288_v46 = vpop.eup %7657  ;;  %7675 = vpow2.f32 %v4160_v20  ;;  %v4168_v36 = vmul.f32 1.442695, %v4120_v59  ;;  %v11553_v20 = vld [vmem:[#allocation78_spill] sm:$0xff] }
 0x4da   : > { %v4107_v50 = vsub.f32 %v10008_v61, %v3979_v37  ;;  %5561 = vrot.lane.b32.xlu0 %v9655_v15, %s8122_s27  ;;  %v10295_v15 = vpop.eup %7659  ;;  %v4011_v3 = vsub.f32 %v9900_v41, %v3979_v37  ;;  %7677 = vpow2.f32 %v4140_v45  ;;  %v11548_v41 = vld [vmem:[#allocation35_spill] sm:$0xff]  ;;  %v3986_v33 = vmax.f32 %v11553_v20, %v3912_v19  ;;  %v11554_v37 = vld [vmem:[#allocation74_spill] sm:$0xff] }
 0x4db   : > { %v3933_v24 = vpop.xlane.xlu1 %3932  ;;  %7183 = vmatmul.mubr.msk.bf16.vlgmr.msra.gmra.mxu0 %vm3783_vm2, %v4442_v56  ;;  %v10301_v62 = vpop.eup %7661  ;;  %v4014_v47 = vsub.f32 %v11548_v41, %v3982_v5 }
 0x4dc   : > { %v4142_v52 = vmul.f32 1.442695, %v4107_v50  ;;  %v3993_v61 = vmax.f32 %v10162_v51, %v3933_v24  ;;  %5225 = vrot.lane.b32.xlu1 %v9458_v0, %s8122_s27  ;;  %7193 = vmatpush3.bf16.msra.mxu0 %v10112_v6  ;;  %v11547_v51 = vld [vmem:[#allocation29_spill] sm:$0xff]  ;;  %v4046_v29 = vmul.f32 1.442695, %v4011_v3  ;;  %v11559_v3 = vld [vmem:[#allocation56_spill] sm:$0xff] }
 0x4dd   : > { %7194 = vmatprep.mubr.msk.bf16.mxu0 %vm8121_vm1, %v11482_v44  ;;  %7204 = vmatprep.subr.bf16.mxu0 %v11482_v44  ;;  %v4052_v17 = vmul.f32 1.442695, %v4014_v47  ;;  %v11555_v50 = vld [vmem:[#allocation25_spill] sm:$0xff] }
 0x4de   : > { %v4025_v48 = vsub.f32 %v9936_v55, %v3993_v61  ;;  %5657 = vrot.lane.b32.xlu0 %v11547_v51, %s8122_s27  ;;  %7679 = vpow2.f32 %v4142_v52  ;;  %v11549_v55 = vld [vmem:[#allocation55_spill] sm:$0xff]  ;;  %v4121_v39 = vsub.f32 %v11551_v2, %v3993_v61  ;;  %v11558_v52 = vld [vmem:[#allocation36_spill] sm:$0xff] }
 0x4df   : > { %v10307_v0 = vpop.eup %7663  ;;  %v10310_v6 = vpop.xlane.xlu1 %3941  ;;  %v4110_v22 = vsub.f32 %v11549_v55, %v3982_v5  ;;  %7681 = vpow2.f32 %v4044_v14  ;;  %v11557_v5 = vld [vmem:[#allocation80_spill] sm:$0xff] }
 0x4e0   : > { %v10314_v30 = vpop.eup %7665  ;;  %5321 = vrot.lane.b32.xlu1 %v11550_v32, %s8122_s27  ;;  %v4074_v38 = vmul.f32 1.442695, %v4025_v48  ;;  %7683 = vpow2.f32 %v4072_v25  ;;  %v4170_v56 = vmul.f32 1.442695, %v4121_v39  ;;  %v11560_v48 = vld [vmem:[#allocation33_spill] sm:$0xff]  ;;  %v11561_v25 = vld [vmem:[#allocation43_spill] sm:$0xff] }
 0x4e1   : > { %v4444_v21 = vpack.c.bf16 %v10314_v30, %v10301_v62  ;;  %v10322_v60 = vpop.eup %7667  ;;  %7685 = vpow2.f32 %v4168_v36  ;;  %v4148_v34 = vmul.f32 1.442695, %v4110_v22  ;;  %v11562_v22 = vld [vmem:[#allocation27_spill] sm:$0xff]  ;;  %v11563_v32 = vld [vmem:[#allocation37_spill] sm:$0xff] }
 0x4e2   : > { %5753 = vrot.lane.b32.xlu0 %v11552_v54, %s8122_s27  ;;  %7687 = vpow2.f32 %v4046_v29  ;;  %v4018_v29 = vsub.f32 %v11563_v32, %v3986_v33  ;;  %v11564_v39 = vld [vmem:[#allocation57_spill] sm:$0xff] }
 0x4e3   : > { %v10326_v8 = vpop.eup %7669  ;;  %v3903_v58 = vpop.xlane.xlu1 %3902  ;;  %7195 = vmatmul.mubr.msk.bf16.vlgmr.msra.gmra.mxu0 %vm3783_vm2, %v4444_v21  ;;  %7689 = vpow2.f32 %v4074_v38  ;;  %v4114_v21 = vsub.f32 %v11564_v39, %v3986_v33  ;;  %v11565_v38 = vld [vmem:[#allocation81_spill] sm:$0xff] }
 0x4e4   : > { %v10330_v16 = vpop.eup %7671  ;;  %v3983_v4 = vmax.f32 %v11554_v37, %v3903_v58  ;;  %v3954_v45 = vpop.xlane.xlu0 %3953  ;;  %5417 = vrot.lane.b32.xlu1 %v11555_v50, %s8122_s27  ;;  %7205 = vmatpush3.bf16.msra.mxu0 %v11556_v11  ;;  %7691 = vpow2.f32 %v4052_v17  ;;  %v11566_v17 = vld [vmem:[#allocation34_spill] sm:$0xff]  ;;  %v11569_v11 = vld [vmem:[#allocation77_spill] sm:$0xff] }
 0x4e5   : > { %v10339_v24 = vmax.f32 %v11557_v5, %v3954_v45  ;;  %7206 = vmatprep.mubr.msk.bf16.mxu0 %vm8121_vm1, %v11482_v44  ;;  %7216 = vmatprep.subr.bf16.mxu0 %v11482_v44  ;;  %v10350_v51 = vpop.eup %7673  ;;  %7693 = vpow2.f32 %v4148_v34  ;;  %v11567_v45 = vld [vmem:[#allocation45_spill] sm:$0xff]  ;;  %v11568_v50 = vld [vmem:[#allocation26_spill] sm:$0xff] }
 0x4e6   : > { %v4015_v61 = vsub.f32 %v11558_v52, %v3983_v4  ;;  %v4111_v14 = vsub.f32 %v11559_v3, %v3983_v4  ;;  %5849 = vrot.lane.b32.xlu0 %v11560_v48, %s8122_s27  ;;  %v10358_v19 = vpop.eup %7675  ;;  %7695 = vpow2.f32 %v4170_v56  ;;  %v4060_v56 = vmul.f32 1.442695, %v4018_v29  ;;  %v11570_v48 = vld [vmem:[#allocation82_spill] sm:$0xff]  ;;  %v11573_v39 = vld [vmem:[#allocation41_spill] sm:$0xff] }
 0x4e7   : > { %v4032_v41 = vsub.f32 %v11561_v25, %v10339_v24  ;;  %v10354_v47 = vpop.xlane.xlu1 %3944  ;;  %v4446_v58 = vpack.c.bf16 %v10350_v51, %v10358_v19  ;;  %v10369_v34 = vpop.eup %7677  ;;  %v4156_v3 = vmul.f32 1.442695, %v4114_v21  ;;  %v11575_v21 = vld [vmem:[#allocation85_spill] sm:$0xff] }
 0x4e8   : > { %v4054_v36 = vmul.f32 1.442695, %v4015_v61  ;;  %v4150_v55 = vmul.f32 1.442695, %v4111_v14  ;;  %5513 = vrot.lane.b32.xlu1 %v11562_v22, %s8122_s27  ;;  %v3957_v2 = vpop.xlane.xlu0 %3956  ;;  %v11572_v22 = vld [vmem:[#allocation58_spill] sm:$0xff] }
 0x4e9   : > { %v10363_v54 = vmax.f32 %v11565_v38, %v3957_v2  ;;  %v4088_v20 = vmul.f32 1.442695, %v4032_v41 }
 0x4ea   : > { %7697 = vpow2.f32 %v4054_v36  ;;  %5945 = vrot.lane.b32.xlu0 %v11566_v17, %s8122_s27  ;;  %v11571_v36 = vld [vmem:[#allocation38_spill] sm:$0xff]  ;;  %v11574_v17 = vld [vmem:[#allocation73_spill] sm:$0xff] }
 0x4eb   : > { %7699 = vpow2.f32 %v4150_v55  ;;  %v3915_v37 = vpop.xlane.xlu1 %3914  ;;  %v10371_v4 = vpop.eup %7679  ;;  %v4033_v33 = vsub.f32 %v11567_v45, %v10363_v54  ;;  %7207 = vmatmul.mubr.msk.bf16.vlgmr.msra.gmra.mxu0 %vm3783_vm2, %v4446_v58 }
 0x4ec   : > { %5609 = vrot.lane.b32.xlu1 %v11568_v50, %s8122_s27  ;;  %v3987_v5 = vmax.f32 %v11569_v11, %v3915_v37  ;;  %v3924_v52 = vpop.xlane.xlu0 %3923  ;;  %v4441_v61 = vpack.c.bf16 %v10371_v4, %v10369_v34  ;;  %7218 = vmatprep.mubr.msk.bf16.mxu0 %vm8121_vm1, %v11482_v44  ;;  %v10384_v41 = vpop.eup %7681  ;;  %7701 = vpow2.f32 %v4088_v20  ;;  %v11576_v37 = vld [vmem:[#allocation28_spill] sm:$0xff]  ;;  %v11577_v11 = vld [vmem:[#allocation42_spill] sm:$0xff] }
 0x4ed   : > { %v4090_v14 = vmul.f32 1.442695, %v4033_v33  ;;  %v3990_v25 = vmax.f32 %v11570_v48, %v3924_v52  ;;  %v10389_v2 = vpop.eup %7683 }
 0x4ee   : > { %v4019_v55 = vsub.f32 %v11571_v36, %v3987_v5  ;;  %v4115_v32 = vsub.f32 %v11572_v22, %v3987_v5  ;;  %7177 = vmatmul.mubr.msk.bf16.vlgmr.msra.gmra.mxu1 %vm3783_vm2, %v4441_v61  ;;  %v10396_v20 = vpop.eup %7685  ;;  %v11578_v36 = vld [vmem:[#allocation30_spill] sm:$0xff] }
 0x4ef   : > { %v3927_v29 = vpop.xlane.xlu1 %3926  ;;  %7703 = vpow2.f32 %v4090_v14  ;;  %v4022_v38 = vsub.f32 %v11573_v39, %v3990_v25  ;;  %7187 = vmatpush3.bf16.msra.mxu1 %v11574_v17  ;;  %7188 = vmatprep.mubr.msk.bf16.mxu1 %vm8121_vm1, %v11482_v44  ;;  %v10401_v50 = vpop.eup %7687 }
 0x4f0   : > { %v3991_v58 = vmax.f32 %v11575_v21, %v3927_v29  ;;  %5705 = vrot.lane.b32.xlu1 %v11576_v37, %s8122_s27  ;;  %7705 = vpow2.f32 %v4060_v56  ;;  %v4062_v45 = vmul.f32 1.442695, %v4019_v55  ;;  %v4158_v33 = vmul.f32 1.442695, %v4115_v32  ;;  %7198 = vmatprep.subr.bf16.mxu1 %v11482_v44  ;;  %v10404_v52 = vpop.eup %7689  ;;  %v11581_v37 = vld [vmem:[#allocation59_spill] sm:$0xff]  ;;  %v11588_v29 = vld [vmem:[#allocation44_spill] sm:$0xff] }
 0x4f1   : > { %7707 = vpow2.f32 %v4156_v3  ;;  %v10408_v14 = vpop.eup %7691  ;;  %v4068_v56 = vmul.f32 1.442695, %v4022_v38  ;;  %v11579_v3 = vld [vmem:[#allocation60_spill] sm:$0xff] }
 0x4f2   : > { %v4023_v5 = vsub.f32 %v11577_v11, %v3991_v58  ;;  %7709 = vpow2.f32 %v4062_v45  ;;  %v10412_v55 = vpop.eup %7693  ;;  %v4119_v32 = vsub.f32 %v11579_v3, %v3991_v58  ;;  %v4118_v45 = vsub.f32 %v11581_v37, %v3990_v25 }
 0x4f3   : > { %v10406_v61 = vpop.xlane.xlu1 %3875  ;;  %7711 = vpow2.f32 %v4158_v33  ;;  %v10414_v22 = vpop.eup %7695  ;;  %v11582_v33 = vld [vmem:[#allocation32_spill] sm:$0xff] }
 0x4f4   : > { %v4070_v48 = vmul.f32 1.442695, %v4023_v5  ;;  %5801 = vrot.lane.b32.xlu1 %v11578_v36, %s8122_s27  ;;  %v4448_v5 = vpack.c.bf16 %v10414_v22, %v10396_v20  ;;  %v11584_v36 = vld [vmem:[#allocation75_spill] sm:$0xff] }
 0x4f6   : > { %7713 = vpow2.f32 %v4070_v48  ;;  %v4166_v48 = vmul.f32 1.442695, %v4119_v32 }
 0x4f7   : > { %v10421_v17 = vpop.eup %7697  ;;  %v4842_v38 = vpop.permute.xlu1 %4841  ;;  %7715 = vpow2.f32 %v4068_v56  ;;  %v4164_v56 = vmul.f32 1.442695, %v4118_v45 }
 0x4f8   : > { %v10423_v21 = vpop.eup %7699  ;;  %7217 = vmatpush3.bf16.msra.mxu0 %v4842_v38  ;;  %5897 = vrot.lane.b32.xlu1 %v11582_v33, %s8122_s27  ;;  %7717 = vpow2.f32 %v4166_v48 }
 0x4f9   : > { %11580 = vst [vmem:[#allocation29_spill] sm:$0xff] %v10423_v21  ;;  %v4443_v11 = vpack.c.bf16 %v10423_v21, %v10412_v55  ;;  %7228 = vmatprep.subr.bf16.mxu0 %v11482_v44  ;;  %v10437_v25 = vpop.eup %7701  ;;  %7719 = vpow2.f32 %v4164_v56 }
 0x4fa   : > { %11583 = vst [vmem:[#allocation35_spill] sm:$0xff] %v10437_v25  ;;  %v11591_v25 = vld [vmem:[#allocation62_spill] sm:$0xff] }
 0x4fb   : > { %7189 = vmatmul.mubr.msk.bf16.vlgmr.msra.gmra.mxu1 %vm3783_vm2, %v4443_v11  ;;  %7219 = vmatmul.mubr.msk.bf16.vlgmr.msra.gmra.mxu0 %vm3783_vm2, %v4448_v5 }
 0x4fc   : > { %7199 = vmatpush3.bf16.msra.mxu1 %v11584_v36  ;;  %v10440_v3 = vpop.xlane.xlu0 %3965  ;;  %7200 = vmatprep.mubr.msk.bf16.mxu1 %vm8121_vm1, %v11482_v44  ;;  %v10444_v38 = vpop.eup %7703 }
 0x4fd   : > { %11585 = vst [vmem:[#allocation55_spill] sm:$0xff] %v10444_v38  ;;  %7210 = vmatprep.subr.bf16.mxu1 %v11482_v44  ;;  %7230 = vmatprep.mubr.msk.bf16.mxu0 %vm8121_vm1, %v11482_v44  ;;  %v10449_v32 = vpop.eup %7705  ;;  %v4296_v38 = vsel %vm3783_vm2, %v10237_v7, 0.0 }
 0x4fe   : > { %v10453_v45 = vpop.eup %7707 }
 0x4ff   : > { %v10455_v33 = vpop.eup %7709 }
 0x500   : > { %11586 = vst [vmem:[#allocation24_spill] sm:$0xff] %v10455_v33  ;;  %v10457_v11 = vpop.xlane.xlu0 %3968  ;;  %v10459_v5 = vpop.eup %7711 }
 0x501   : > { %11587 = vst [vmem:[#allocation63_spill] sm:$0xff] %v10459_v5  ;;  %v4445_v36 = vpack.c.bf16 %v10459_v5, %v10453_v45 }
 0x503   : > { %v10465_v58 = vpop.eup %7713  ;;  %7201 = vmatmul.mubr.msk.bf16.vlgmr.msra.gmra.mxu1 %vm3783_vm2, %v4445_v36 }
 0x504   : > { %v3936_v48 = vpop.xlane.xlu0 %3935  ;;  %v10468_v37 = vpop.eup %7715  ;;  %7212 = vmatprep.mubr.msk.bf16.mxu1 %vm8121_vm1, %v11482_v44 }
 0x505   : > { %v3994_v59 = vmax.f32 %v10206_v35, %v3936_v48  ;;  %v10480_v35 = vpop.eup %7717  ;;  %v11590_v48 = vld [vmem:[#allocation46_spill] sm:$0xff] }
 0x507   : > { %v4026_v26 = vsub.f32 %v11588_v29, %v3994_v59  ;;  %v4122_v13 = vsub.f32 %v11589_v10, %v3994_v59  ;;  %v4203_v29 = vsel %vm3783_vm2, %v10241_v1, 0.0  ;;  %v10486_v10 = vpop.eup %7719 }
 0x508   : > { %v3939_v39 = vpop.xlane.xlu0 %3938 }
 0x509   : > { %v4076_v36 = vmul.f32 1.442695, %v4026_v26  ;;  %v3995_v5 = vmax.f32 %v10213_v12, %v3939_v39  ;;  %4297 = vadd.xlane.f32.xlu0 %v4296_v38  ;;  %v4172_v33 = vmul.f32 1.442695, %v4122_v13  ;;  %v4447_v12 = vpack.c.bf16 %v10480_v35, %v10486_v10  ;;  %v4890_v13 = vpop.permute.xlu1 %4889 }
 0x50a   : > { %v4212_v26 = vsel %vm3783_vm2, %v10295_v15, 0.0  ;;  %v4224_v39 = vsel %vm3783_vm2, %v10322_v60, 0.0  ;;  %v4200_v38 = vsel %vm3783_vm2, %v10234_v63, 0.0 }
 0x50b   : > { %v4027_v53 = vsub.f32 %v11590_v48, %v3995_v5  ;;  %v4123_v21 = vsub.f32 %v11591_v25, %v3995_v5  ;;  %7721 = vpow2.f32 %v4076_v36  ;;  %v4320_v5 = vsel %vm3783_vm2, %v10301_v62, 0.0 }
 0x50c   : > { %v4794_v56 = vpop.permute.xlu0 %4793  ;;  %7723 = vpow2.f32 %v4172_v33  ;;  %v4299_v48 = vsel %vm3783_vm2, %v10243_v49, 0.0  ;;  %v4215_v62 = vsel %vm3783_vm2, %v10288_v46, 0.0 }
 0x50d   : > { %v4078_v59 = vmul.f32 1.442695, %v4027_v53  ;;  %v4174_v7 = vmul.f32 1.442695, %v4123_v21  ;;  %4204 = vadd.xlane.f32.xlu0 %v4203_v29  ;;  %7211 = vmatpush3.bf16.msra.mxu1 %v4794_v56  ;;  %v4308_v53 = vsel %vm3783_vm2, %v10278_v31, 0.0  ;;  %v4986_v29 = vpop.permute.xlu1 %4985 }
 0x50e   : > { %7222 = vmatprep.subr.bf16.mxu1 %v11482_v44 }
 0x50f   : > { %7725 = vpow2.f32 %v4078_v59  ;;  %v4236_v59 = vsel %vm3783_vm2, %v10330_v16, 0.0 }
 0x510   : > { %7727 = vpow2.f32 %v4174_v7  ;;  %7213 = vmatmul.mubr.msk.bf16.vlgmr.msra.gmra.mxu1 %vm3783_vm2, %v4447_v12  ;;  %v11592_v7 = vld [vmem:[#allocation76_spill] sm:$0xff]  ;;  %v4332_v12 = vsel %vm3783_vm2, %v10358_v19, 0.0  ;;  %v4227_v19 = vsel %vm3783_vm2, %v10307_v0, 0.0 }
 0x511   : > { %4213 = vadd.xlane.f32.xlu0 %v4212_v26  ;;  %7223 = vmatpush3.bf16.msra.mxu1 %v4890_v13  ;;  %v3996_v49 = vmax.f32 %v11592_v7, %v10310_v6  ;;  %v11593_v13 = vld [vmem:[#allocation79_spill] sm:$0xff]  ;;  %v4323_v7 = vsel %vm3783_vm2, %v10314_v30, 0.0  ;;  %v4344_v30 = vsel %vm3783_vm2, %v10396_v20, 0.0 }
 0x512   : > { %7224 = vmatprep.mubr.msk.bf16.mxu1 %vm8121_vm1, %v11482_v44  ;;  %7234 = vmatprep.subr.bf16.mxu1 %v11482_v44  ;;  %v3997_v26 = vmax.f32 %v11593_v13, %v10354_v47  ;;  %v4248_v13 = vsel %vm3783_vm2, %v10389_v2, 0.0 }
 0x515   : > { %4309 = vadd.xlane.f32.xlu0 %v4308_v53  ;;  %v4311_v53 = vsel %vm3783_vm2, %v10273_v42, 0.0  ;;  %v4302_v42 = vsel %vm3783_vm2, %v10369_v34, 0.0  ;;  %v4239_v34 = vsel %vm3783_vm2, %v10326_v8, 0.0 }
 0x518   : > { %v10501_v21 = vpop.eup %7721 }
 0x519   : > { %4225 = vadd.xlane.f32.xlu0 %v4224_v39  ;;  %v10503_v25 = vpop.eup %7723  ;;  %v11594_v39 = vld [vmem:[#allocation39_spill] sm:$0xff] }
 0x51c   : > { %v10507_v33 = vpop.eup %7725  ;;  %4201 = vadd.xlane.f32.xlu1 %v4200_v38  ;;  %v4028_v38 = vsub.f32 %v11594_v39, %v3996_v49 }
 0x51d   : > { %v10511_v56 = vpop.eup %7727  ;;  %4321 = vadd.xlane.f32.xlu0 %v4320_v5  ;;  %v4433_v31 = vpack.c.bf16 %v10507_v33, %v10501_v21  ;;  %v4206_v5 = vsel %vm3783_vm2, %v10384_v41, 0.0 }
 0x51e   : > { %v4449_v36 = vpack.c.bf16 %v10511_v56, %v10503_v25 }
 0x520   : > { %7225 = vmatmul.mubr.msk.bf16.vlgmr.msra.gmra.mxu1 %vm3783_vm2, %v4449_v36  ;;  %4300 = vadd.xlane.f32.xlu1 %v4299_v48  ;;  %v11595_v36 = vld [vmem:[#allocation66_spill] sm:$0xff]  ;;  %v4080_v48 = vmul.f32 1.442695, %v4028_v38  ;;  %v11598_v38 = vld [vmem:[#allocation67_spill] sm:$0xff] }
 0x521   : > { %7235 = vmatpush3.bf16.msra.mxu1 %v4986_v29  ;;  %4237 = vadd.xlane.f32.xlu0 %v4236_v59  ;;  %v4125_v6 = vsub.f32 %v11595_v36, %v3997_v26  ;;  %v11596_v29 = vld [vmem:[#allocation65_spill] sm:$0xff] }
 0x522   : > { %7236 = vmatprep.mubr.msk.bf16.mxu1 %vm8121_vm1, %v11482_v44  ;;  %7246 = vmatprep.subr.bf16.mxu1 %v11482_v44  ;;  %v4124_v59 = vsub.f32 %v11596_v29, %v3996_v49  ;;  %7729 = vpow2.f32 %v4080_v48  ;;  %v11597_v49 = vld [vmem:[#allocation68_spill] sm:$0xff]  ;;  %v4218_v29 = vsel %vm3783_vm2, %v10408_v14, 0.0 }
 0x523   : > { %v4178_v47 = vmul.f32 1.442695, %v4125_v6  ;;  %v4129_v39 = vsub.f32 %v11597_v49, %v10363_v54  ;;  %v11599_v6 = vld [vmem:[#allocation84_spill] sm:$0xff]  ;;  %v4335_v54 = vsel %vm3783_vm2, %v10350_v51, 0.0  ;;  %v4209_v51 = vsel %vm3783_vm2, %v10401_v50, 0.0 }
 0x524   : > { %4216 = vadd.xlane.f32.xlu1 %v4215_v62  ;;  %v10542_v62 = vpop.permute.xlu1 %5033 }
 0x525   : > { %4333 = vadd.xlane.f32.xlu0 %v4332_v12  ;;  %v4176_v12 = vmul.f32 1.442695, %v4124_v59  ;;  %7731 = vpow2.f32 %v4178_v47  ;;  %v4186_v36 = vmul.f32 1.442695, %v4129_v39  ;;  %v11600_v59 = vld [vmem:[#allocation83_spill] sm:$0xff]  ;;  %v11603_v39 = vld [vmem:[#allocation70_spill] sm:$0xff] }
 0x527   : > { %7733 = vpow2.f32 %v4176_v12  ;;  %v4314_v12 = vsel %vm3783_vm2, %v10412_v55, 0.0  ;;  %v4305_v55 = vsel %vm3783_vm2, %v10371_v4, 0.0 }
 0x528   : > { %4312 = vadd.xlane.f32.xlu1 %v4311_v53  ;;  %v10550_v53 = vpop.permute.xlu1 %5081  ;;  %7735 = vpow2.f32 %v4186_v36 }
 0x529   : > { %4207 = vadd.xlane.f32.xlu0 %v4206_v5  ;;  %v4128_v5 = vsub.f32 %v11598_v38, %v10339_v24  ;;  %v11601_v24 = vld [vmem:[#allocation40_spill] sm:$0xff] }
 0x52a   : > { %v4029_v47 = vsub.f32 %v11601_v24, %v3997_v26 }
 0x52b   : > { %v4184_v20 = vmul.f32 1.442695, %v4128_v5  ;;  %v11604_v5 = vld [vmem:[#allocation64_spill] sm:$0xff] }
 0x52c   : > { %4228 = vadd.xlane.f32.xlu1 %v4227_v19  ;;  %v10562_v19 = vmax.f32 %v11599_v6, %v10457_v11  ;;  %v10566_v48 = vpop.permute.xlu1 %5129  ;;  %v11602_v11 = vld [vmem:[#allocation72_spill] sm:$0xff] }
 0x52d   : > { %4303 = vadd.xlane.f32.xlu0 %v4302_v42  ;;  %v4004_v42 = vmax.f32 %v11600_v59, %v10440_v3  ;;  %7737 = vpow2.f32 %v4184_v20 }
 0x52f   : > { %v10579_v49 = vpop.eup %7729  ;;  %v4132_v3 = vsub.f32 %v11603_v39, %v4004_v42  ;;  %v11605_v39 = vld [vmem:[#allocation47_spill] sm:$0xff] }
 0x530   : > { %4324 = vadd.xlane.f32.xlu1 %v4323_v7  ;;  %v4133_v7 = vsub.f32 %v11602_v11, %v10562_v19 }
 0x531   : > { %4249 = vadd.xlane.f32.xlu0 %v4248_v13  ;;  %v4192_v59 = vmul.f32 1.442695, %v4132_v3  ;;  %v4036_v3 = vsub.f32 %v11605_v39, %v4004_v42 }
 0x532   : > { %v4194_v38 = vmul.f32 1.442695, %v4133_v7  ;;  %v10591_v6 = vpop.eup %7731 }
 0x534   : > { %4240 = vadd.xlane.f32.xlu1 %v4239_v34  ;;  %v7734_v20 = vpop.eup %7733 }
 0x535   : > { %4345 = vadd.xlane.f32.xlu0 %v4344_v30  ;;  %v4082_v30 = vmul.f32 1.442695, %v4029_v47  ;;  %v4251_v47 = vsel %vm3783_vm2, %v10404_v52, 0.0  ;;  %v4450_v7 = vpack.c.bf16 %v10591_v6, %v7734_v20 }
 0x537   : > { %7739 = vpow2.f32 %v4082_v30  ;;  %v4347_v30 = vsel %vm3783_vm2, %v10414_v22, 0.0 }
 0x538   : > { %4336 = vadd.xlane.f32.xlu1 %v4335_v54  ;;  %v4260_v54 = vsel %vm3783_vm2, %v10579_v49, 0.0  ;;  %7741 = vpow2.f32 %v4194_v38  ;;  %v10618_v38 = vpop.eup %7735 }
 0x539   : > { %4219 = vadd.xlane.f32.xlu0 %v4218_v29  ;;  %7743 = vpow2.f32 %v4192_v59 }
 0x53c   : > { %v3948_v13 = vpop.xlane.xlu1 %3947  ;;  %4210 = vadd.xlane.f32.xlu1 %v4209_v51  ;;  %v4356_v51 = vsel %vm3783_vm2, %v7734_v20, 0.0 }
 0x53d   : > { %4315 = vadd.xlane.f32.xlu0 %v4314_v12  ;;  %v10582_v34 = vpop.xlane.xlu0 %3878  ;;  %v10585_v26 = vmax.f32 %v10217_v43, %v3948_v13 }
 0x53f   : > { %v4126_v36 = vsub.f32 %v11604_v5, %v10585_v26  ;;  %v7738_v5 = vpop.eup %7737 }
 0x540   : > { %v3951_v29 = vpop.xlane.xlu1 %3950  ;;  %4306 = vadd.xlane.f32.xlu1 %v4305_v55  ;;  %v4452_v55 = vpack.c.bf16 %v10618_v38, %v7738_v5 }
 0x541   : > { %4261 = vadd.xlane.f32.xlu0 %v4260_v54  ;;  %v4938_v43 = vpop.permute.xlu0 %4937  ;;  %v10596_v24 = vmax.f32 %v10219_v40, %v3951_v29  ;;  %v4180_v4 = vmul.f32 1.442695, %v4126_v36  ;;  %v4096_v36 = vmul.f32 1.442695, %v4036_v3  ;;  %v4221_v54 = vsel %vm3783_vm2, %v10421_v17, 0.0 }
 0x542   : > { %7229 = vmatpush3.bf16.msra.mxu0 %v4938_v43  ;;  %v4326_v29 = vsel %vm3783_vm2, %v10453_v45, 0.0  ;;  %v11606_v43 = vld [vmem:[#allocation29_spill] sm:$0xff] }
 0x543   : > { %v4127_v11 = vsub.f32 %v10086_v28, %v10596_v24  ;;  %7240 = vmatprep.subr.bf16.mxu0 %v11482_v44  ;;  %7745 = vpow2.f32 %v4180_v4 }
 0x544   : > { %v3960_v12 = vpop.xlane.xlu1 %3959  ;;  %4252 = vadd.xlane.f32.xlu1 %v4251_v47  ;;  %v4317_v47 = vsel %vm3783_vm2, %v11606_v43, 0.0  ;;  %v4338_v43 = vsel %vm3783_vm2, %v10486_v10, 0.0 }
 0x545   : > { %v4182_v40 = vmul.f32 1.442695, %v4127_v11  ;;  %4357 = vadd.xlane.f32.xlu0 %v4356_v51  ;;  %7231 = vmatmul.mubr.msk.bf16.vlgmr.msra.gmra.mxu0 %vm3783_vm2, %v4450_v7  ;;  %v10607_v13 = vmax.f32 %v10229_v57, %v3960_v12  ;;  %v4230_v57 = vsel %vm3783_vm2, %v10449_v32, 0.0 }
 0x546   : > { %7241 = vmatpush3.bf16.msra.mxu0 %v10542_v62  ;;  %7242 = vmatprep.mubr.msk.bf16.mxu0 %vm8121_vm1, %v11482_v44 }
 0x547   : > { %v4130_v28 = vsub.f32 %v10092_v18, %v10607_v13  ;;  %7252 = vmatprep.subr.bf16.mxu0 %v11482_v44  ;;  %7747 = vpow2.f32 %v4182_v40 }
 0x548   : > { %v3963_v42 = vpop.xlane.xlu1 %3962  ;;  %4348 = vadd.xlane.f32.xlu1 %v4347_v30  ;;  %7749 = vpow2.f32 %v4096_v36  ;;  %v4368_v30 = vsel %vm3783_vm2, %v7738_v5, 0.0  ;;  %v11609_v5 = vld [vmem:[#allocation48_spill] sm:$0xff] }
 0x549   : > { %4231 = vadd.xlane.f32.xlu0 %v4230_v57  ;;  %v10623_v62 = vmax.f32 %v10231_v9, %v3963_v42  ;;  %v4188_v18 = vmul.f32 1.442695, %v4130_v28 }
 0x54b   : > { %v4131_v22 = vsub.f32 %v10100_v27, %v10623_v62  ;;  %v10639_v27 = vpop.eup %7739  ;;  %7751 = vpow2.f32 %v4188_v18  ;;  %v4359_v18 = vsel %vm3783_vm2, %v10591_v6, 0.0  ;;  %v11610_v6 = vld [vmem:[#allocation49_spill] sm:$0xff] }
 0x54c   : > { %v3972_v20 = vpop.xlane.xlu1 %3971  ;;  %4222 = vadd.xlane.f32.xlu1 %v4221_v54  ;;  %v10646_v4 = vpop.eup %7741  ;;  %v4263_v3 = vsel %vm3783_vm2, %v10639_v27, 0.0 }
 0x54d   : > { %v4190_v59 = vmul.f32 1.442695, %v4131_v22  ;;  %4327 = vadd.xlane.f32.xlu0 %v4326_v29  ;;  %7243 = vmatmul.mubr.msk.bf16.vlgmr.msra.gmra.mxu0 %vm3783_vm2, %v4452_v55  ;;  %v10634_v9 = vmax.f32 %v10406_v61, %v3972_v20  ;;  %v11607_v61 = vld [vmem:[#allocation35_spill] sm:$0xff]  ;;  %v7744_v51 = vpop.eup %7743  ;;  %v4030_v22 = vsub.f32 %v11609_v5, %v10585_v26  ;;  %v4242_v55 = vsel %vm3783_vm2, %v10468_v37, 0.0  ;;  %v11611_v20 = vld [vmem:[#allocation24_spill] sm:$0xff] }
 0x54e   : > { %7253 = vmatpush3.bf16.msra.mxu0 %v10566_v48  ;;  %7254 = vmatprep.mubr.msk.bf16.mxu0 %vm8121_vm1, %v11482_v44  ;;  %v4272_v48 = vsel %vm3783_vm2, %v11607_v61, 0.0  ;;  %v4454_v39 = vpack.c.bf16 %v10646_v4, %v7744_v51  ;;  %v4037_v26 = vsub.f32 %v11610_v6, %v10562_v19  ;;  %v11612_v19 = vpack.c.bf16 %v10241_v1, %v10234_v63  ;;  %v11615_v1 = vld [vmem:[#allocation55_spill] sm:$0xff] }
 0x54f   : > { %v4134_v45 = vsub.f32 %v10122_v23, %v10634_v9  ;;  %7264 = vmatprep.subr.bf16.mxu0 %v11482_v44  ;;  %7753 = vpow2.f32 %v4190_v59  ;;  %v11608_v23 = vld [vmem:[#allocation71_spill] sm:$0xff]  ;;  %v4233_v59 = vsel %vm3783_vm2, %v11611_v20, 0.0  ;;  %v4245_v6 = vsel %vm3783_vm2, %v10465_v58, 0.0 }
 0x550   : > { %4318 = vadd.xlane.f32.xlu1 %v4317_v47  ;;  %v3975_v11 = vpop.xlane.xlu1 %3974  ;;  %v10658_v28 = vpop.eup %7745 }
 0x551   : > { %4273 = vadd.xlane.f32.xlu0 %v4272_v48  ;;  %v10651_v7 = vmax.f32 %v10582_v34, %v3975_v11  ;;  %v4196_v12 = vmul.f32 1.442695, %v4134_v45 }
 0x553   : > { %v4135_v40 = vsub.f32 %v11608_v23, %v10651_v7  ;;  %7755 = vpow2.f32 %v4196_v12  ;;  %v4098_v12 = vmul.f32 1.442695, %v4037_v26  ;;  %v11613_v23 = vld [vmem:[#allocation63_spill] sm:$0xff]  ;;  %v4350_v26 = vsel %vm3783_vm2, %v10503_v25, 0.0 }
 0x554   : > { %4264 = vadd.xlane.f32.xlu1 %v4263_v3  ;;  %v5178_v57 = vpop.permute.xlu1 %5177  ;;  %v10661_v42 = vpop.eup %7747  ;;  %v4329_v10 = vsel %vm3783_vm2, %v11613_v23, 0.0  ;;  %v4275_v3 = vsel %vm3783_vm2, %v11615_v1, 0.0 }
 0x555   : > { %v4198_v34 = vmul.f32 1.442695, %v4135_v40  ;;  %4369 = vadd.xlane.f32.xlu0 %v4368_v30  ;;  %7255 = vmatmul.mubr.msk.bf16.vlgmr.msra.gmra.mxu0 %vm3783_vm2, %v4454_v39  ;;  %v4451_v36 = vpack.c.bf16 %v10661_v42, %v10658_v28  ;;  %v10678_v29 = vpop.eup %7749  ;;  %v11614_v40 = vld [vmem:[#allocation51_spill] sm:$0xff] }
 0x556   : > { %7266 = vmatprep.mubr.msk.bf16.mxu0 %vm8121_vm1, %v11482_v44  ;;  %v4034_v39 = vsub.f32 %v11614_v40, %v10607_v13  ;;  %v4284_v63 = vsel %vm3783_vm2, %v10678_v29, 0.0  ;;  %v4383_v40 = vsel %vm3783_vm2, %v10646_v4, 0.0 }
 0x557   : > { %7757 = vpow2.f32 %v4198_v34  ;;  %7237 = vmatmul.mubr.msk.bf16.vlgmr.msra.gmra.mxu1 %vm3783_vm2, %v4451_v36  ;;  %v4380_v34 = vsel %vm3783_vm2, %v7744_v51, 0.0  ;;  %v4371_v51 = vsel %vm3783_vm2, %v10618_v38, 0.0 }
 0x558   : > { %4360 = vadd.xlane.f32.xlu1 %v4359_v18  ;;  %v5226_v54 = vpop.permute.xlu1 %5225  ;;  %7247 = vmatpush3.bf16.msra.mxu1 %v10550_v53  ;;  %v10686_v45 = vpop.eup %7751  ;;  %v4084_v53 = vmul.f32 1.442695, %v4030_v22  ;;  %v4092_v13 = vmul.f32 1.442695, %v4034_v39  ;;  %v11623_v39 = vpack.c.bf16 %v10421_v17, %v10408_v14  ;;  %v4257_v14 = vsel %vm3783_vm2, %v10507_v33, 0.0 }
 0x559   : > { %4243 = vadd.xlane.f32.xlu0 %v4242_v55  ;;  %7265 = vmatpush3.bf16.msra.mxu0 %v5226_v54  ;;  %v5274_v22 = vpop.permute.xlu0 %5273  ;;  %v11617_v55 = vld [vmem:[#allocation53_spill] sm:$0xff]  ;;  %v4374_v17 = vsel %vm3783_vm2, %v10686_v45, 0.0 }
 0x55a   : > { %7248 = vmatprep.mubr.msk.bf16.mxu1 %vm8121_vm1, %v11482_v44  ;;  %7276 = vmatprep.subr.bf16.mxu0 %v11482_v44  ;;  %7759 = vpow2.f32 %v4084_v53  ;;  %v4038_v54 = vsub.f32 %v11617_v55, %v10634_v9 }
 0x55b   : > { %7258 = vmatprep.subr.bf16.mxu1 %v11482_v44  ;;  %7761 = vpow2.f32 %v4098_v12 }
 0x55c   : > { %4234 = vadd.xlane.f32.xlu1 %v4233_v59  ;;  %v5322_v47 = vpop.permute.xlu1 %5321  ;;  %v10690_v48 = vpop.eup %7753  ;;  %7763 = vpow2.f32 %v4092_v13  ;;  %v4100_v9 = vmul.f32 1.442695, %v4038_v54  ;;  %v11625_v13 = vpack.c.bf16 %v10404_v52, %v10389_v2 }
 0x55d   : > { %4339 = vadd.xlane.f32.xlu0 %v4338_v43  ;;  %7267 = vmatmul.mubr.msk.bf16.vlgmr.msra.gmra.mxu0 %vm3783_vm2, %v11612_v19  ;;  %v4453_v11 = vpack.c.bf16 %v10690_v48, %v10686_v45  ;;  %v11619_v43 = vpack.c.bf16 %v10307_v0, %v10322_v60  ;;  %v5370_v19 = vpop.permute.xlu0 %5369  ;;  %v11621_v60 = vld [vmem:[#allocation52_spill] sm:$0xff] }
 0x55e   : > { %7277 = vmatpush3.bf16.msra.mxu0 %v5322_v47  ;;  %7278 = vmatprep.mubr.msk.bf16.mxu0 %vm8121_vm1, %v11482_v44  ;;  %v4341_v47 = vsel %vm3783_vm2, %v10480_v35, 0.0  ;;  %7765 = vpow2.f32 %v4100_v9  ;;  %v4035_v35 = vsub.f32 %v11621_v60, %v10623_v62 }
 0x55f   : > { %7288 = vmatprep.subr.bf16.mxu0 %v11482_v44  ;;  %7249 = vmatmul.mubr.msk.bf16.vlgmr.msra.gmra.mxu1 %vm3783_vm2, %v4453_v11  ;;  %v11620_v11 = vpack.c.bf16 %v10401_v50, %v10384_v41  ;;  %v4362_v50 = vsel %vm3783_vm2, %v10658_v28, 0.0 }
 0x560   : > { %4330 = vadd.xlane.f32.xlu1 %v4329_v10  ;;  %7259 = vmatpush3.bf16.msra.mxu1 %v5178_v57  ;;  %v10713_v30 = vpop.eup %7755  ;;  %v5418_v18 = vpop.permute.xlu1 %5417  ;;  %v11616_v57 = vpack.c.bf16 %v10288_v46, %v10295_v15  ;;  %v4254_v46 = vsel %vm3783_vm2, %v10501_v21, 0.0  ;;  %v11618_v15 = vld [vmem:[#allocation50_spill] sm:$0xff]  ;;  %v11622_v10 = vpack.c.bf16 %v10326_v8, %v10330_v16  ;;  %v4094_v62 = vmul.f32 1.442695, %v4035_v35 }
 0x561   : > { %4285 = vadd.xlane.f32.xlu0 %v4284_v63  ;;  %7260 = vmatprep.mubr.msk.bf16.mxu1 %vm8121_vm1, %v11482_v44  ;;  %v4031_v38 = vsub.f32 %v11618_v15, %v10596_v24  ;;  %v5466_v28 = vpop.permute.xlu0 %5465  ;;  %v11624_v16 = vld [vmem:[#allocation54_spill] sm:$0xff] }
 0x562   : > { %7270 = vmatprep.subr.bf16.mxu1 %v11482_v44  ;;  %v4039_v4 = vsub.f32 %v11624_v16, %v10651_v7  ;;  %v7515_v16 = vld [vmem:[#allocation13 + $0x8] sm:$0xff]  }
 0x563   : > { %v4086_v24 = vmul.f32 1.442695, %v4031_v38 }
 0x564   : > { %4276 = vadd.xlane.f32.xlu1 %v4275_v3  ;;  %v10716_v36 = vpop.eup %7757  ;;  %v5514_v53 = vpop.permute.xlu1 %5513  ;;  %v4102_v7 = vmul.f32 1.442695, %v4039_v4 }
 0x565   : > { %4381 = vadd.xlane.f32.xlu0 %v4380_v34  ;;  %7279 = vmatmul.mubr.msk.bf16.vlgmr.msra.gmra.mxu0 %vm3783_vm2, %v11616_v57  ;;  %v4455_v5 = vpack.c.bf16 %v10716_v36, %v10713_v30  ;;  %7767 = vpow2.f32 %v4086_v24  ;;  %v4353_v34 = vsel %vm3783_vm2, %v10511_v56, 0.0  ;;  %v11626_v57 = vpack.c.bf16 %v11611_v20, %v10449_v32 }
 0x566   : > { %7289 = vmatpush3.bf16.msra.mxu0 %v5418_v18  ;;  %7290 = vmatprep.mubr.msk.bf16.mxu0 %vm8121_vm1, %v11482_v44  ;;  %7769 = vpow2.f32 %v4094_v62  ;;  %v5562_v18 = vpop.permute.xlu0 %5561  ;;  %v4434_v56 = vpack.c.bf16 %v10639_v27, %v10579_v49  ;;  %v4386_v32 = vsel %vm3783_vm2, %v10713_v30, 0.0  ;;  %v11627_v49 = vpack.c.bf16 %v10465_v58, %v10468_v37 }
 0x567   : > { %7300 = vmatprep.subr.bf16.mxu0 %v11482_v44  ;;  %7261 = vmatmul.mubr.msk.bf16.vlgmr.msra.gmra.mxu1 %vm3783_vm2, %v4455_v5  ;;  %v10743_v59 = vpop.eup %7759  ;;  %7771 = vpow2.f32 %v4102_v7  ;;  %v4365_v5 = vsel %vm3783_vm2, %v10661_v42, 0.0  ;;  %v11628_v30 = vpack.c.bf16 %v11615_v1, %v11607_v61  ;;  %v4377_v37 = vsel %vm3783_vm2, %v10690_v48, 0.0 }
 0x568   : > { %4372 = vadd.xlane.f32.xlu1 %v4371_v51  ;;  %7271 = vmatpush3.bf16.msra.mxu1 %v5274_v22  ;;  %v10754_v25 = vpop.eup %7761  ;;  %v4266_v0 = vsel %vm3783_vm2, %v10743_v59, 0.0  ;;  %v5610_v23 = vpop.permute.xlu1 %5609 }
 0x569   : > { %4255 = vadd.xlane.f32.xlu0 %v4254_v46  ;;  %7272 = vmatprep.mubr.msk.bf16.mxu1 %vm8121_vm1, %v11482_v44  ;;  %v4287_v41 = vsel %vm3783_vm2, %v10754_v25, 0.0  ;;  %v10771_v12 = vpop.eup %7763  ;;  %v4438_v48 = vpack.c.bf16 %v10754_v25, %v10678_v29 }
 0x56a   : > { %7282 = vmatprep.subr.bf16.mxu1 %v11482_v44  ;;  %v4278_v8 = vsel %vm3783_vm2, %v10771_v12, 0.0  ;;  %v5658_v22 = vpop.permute.xlu0 %5657 }
 0x56b   : > { %v10797_v63 = vpop.eup %7765 }
 0x56c   : > { %4246 = vadd.xlane.f32.xlu1 %v4245_v6  ;;  %v5706_v3 = vpop.permute.xlu1 %5705  ;;  %v4290_v2 = vsel %vm3783_vm2, %v10797_v63, 0.0 }
 0x56d   : > { %4351 = vadd.xlane.f32.xlu0 %v4350_v26  ;;  %7291 = vmatmul.mubr.msk.bf16.vlgmr.msra.gmra.mxu0 %vm3783_vm2, %v11619_v43 }
 0x56e   : > { %7301 = vmatpush3.bf16.msra.mxu0 %v5514_v53  ;;  %7302 = vmatprep.mubr.msk.bf16.mxu0 %vm8121_vm1, %v11482_v44  ;;  %v5754_v55 = vpop.permute.xlu0 %5753 }
 0x56f   : > { %7312 = vmatprep.subr.bf16.mxu0 %v11482_v44  ;;  %7273 = vmatmul.mubr.msk.bf16.vlgmr.msra.gmra.mxu1 %vm3783_vm2, %v11620_v11 }
 0x570   : > { %4342 = vadd.xlane.f32.xlu1 %v4341_v47  ;;  %7283 = vmatpush3.bf16.msra.mxu1 %v5370_v19  ;;  %v5802_v20 = vpop.permute.xlu1 %5801 }
 0x571   : > { %4267 = vadd.xlane.f32.xlu0 %v4266_v0  ;;  %7284 = vmatprep.mubr.msk.bf16.mxu1 %vm8121_vm1, %v11482_v44 }
 0x572   : > { %7294 = vmatprep.subr.bf16.mxu1 %v11482_v44  ;;  %v7768_v45 = vpop.eup %7767  ;;  %v5850_v15 = vpop.permute.xlu0 %5849 }
 0x573   : > { %v4269_v52 = vsel %vm3783_vm2, %v7768_v45, 0.0  ;;  %v7770_v51 = vpop.eup %7769  ;;  %v4435_v33 = vpack.c.bf16 %v7768_v45, %v10743_v59 }
 0x574   : > { %4288 = vadd.xlane.f32.xlu1 %v4287_v41  ;;  %v4281_v27 = vsel %vm3783_vm2, %v7770_v51, 0.0  ;;  %v5898_v42 = vpop.permute.xlu1 %5897  ;;  %v7772_v54 = vpop.eup %7771  ;;  %v4437_v26 = vpack.c.bf16 %v7770_v51, %v10771_v12 }
 0x575   : > { %4363 = vadd.xlane.f32.xlu0 %v4362_v50  ;;  %7303 = vmatmul.mubr.msk.bf16.vlgmr.msra.gmra.mxu0 %vm3783_vm2, %v11622_v10  ;;  %v4293_v46 = vsel %vm3783_vm2, %v7772_v54, 0.0  ;;  %v4439_v25 = vpack.c.bf16 %v7772_v54, %v10797_v63 }
 0x576   : > { %7313 = vmatpush3.bf16.msra.mxu0 %v5610_v23  ;;  %7314 = vmatprep.mubr.msk.bf16.mxu0 %vm8121_vm1, %v11482_v44  ;;  %v5946_v38 = vpop.permute.xlu0 %5945 }
 0x577   : > { %7324 = vmatprep.subr.bf16.mxu0 %v11482_v44  ;;  %7285 = vmatmul.mubr.msk.bf16.vlgmr.msra.gmra.mxu1 %vm3783_vm2, %v11623_v39 }
 0x578   : > { %4384 = vadd.xlane.f32.xlu1 %v4383_v40  ;;  %7295 = vmatpush3.bf16.msra.mxu1 %v5466_v28 }
 0x579   : > { %4279 = vadd.xlane.f32.xlu0 %v4278_v8  ;;  %7296 = vmatprep.mubr.msk.bf16.mxu1 %vm8121_vm1, %v11482_v44 }
 0x57a   : > { %7306 = vmatprep.subr.bf16.mxu1 %v11482_v44 }
 0x57c   : > { %4258 = vadd.xlane.f32.xlu1 %v4257_v14  ;;  %v7516_v14 = vld [vmem:[#allocation13] sm:$0xff]  }
 0x57d   : > { %4375 = vadd.xlane.f32.xlu0 %v4374_v17  ;;  %7315 = vmatmul.mubr.msk.bf16.vlgmr.msra.gmra.mxu0 %vm3783_vm2, %v11625_v13 }
 0x57e   : > { %7325 = vmatpush3.bf16.msra.mxu0 %v5706_v3  ;;  %7326 = vmatprep.mubr.msk.bf16.mxu0 %vm8121_vm1, %v11482_v44 }
 0x57f   : > { %7336 = vmatprep.subr.bf16.mxu0 %v11482_v44  ;;  %7297 = vmatmul.mubr.msk.bf16.vlgmr.msra.gmra.mxu1 %vm3783_vm2, %v11626_v57 }
 0x580   : > { %4354 = vadd.xlane.f32.xlu1 %v4353_v34  ;;  %7307 = vmatpush3.bf16.msra.mxu1 %v5562_v18 }
 0x581   : > { %4291 = vadd.xlane.f32.xlu0 %v4290_v2  ;;  %7308 = vmatprep.mubr.msk.bf16.mxu1 %vm8121_vm1, %v11482_v44 }
 0x582   : > { %7318 = vmatprep.subr.bf16.mxu1 %v11482_v44 }
 0x584   : > { %4270 = vadd.xlane.f32.xlu1 %v4269_v52 }
 0x585   : > { %4387 = vadd.xlane.f32.xlu0 %v4386_v32  ;;  %7327 = vmatmul.mubr.msk.bf16.vlgmr.msra.gmra.mxu0 %vm3783_vm2, %v4434_v56 }
 0x586   : > { %7337 = vmatpush3.bf16.msra.mxu0 %v5802_v20  ;;  %7338 = vmatprep.mubr.msk.bf16.mxu0 %vm8121_vm1, %v11482_v44 }
 0x587   : > { %7348 = vmatprep.subr.bf16.mxu0 %v11482_v44  ;;  %7309 = vmatmul.mubr.msk.bf16.vlgmr.msra.gmra.mxu1 %vm3783_vm2, %v11627_v49 }
 0x588   : > { %4366 = vadd.xlane.f32.xlu1 %v4365_v5  ;;  %7319 = vmatpush3.bf16.msra.mxu1 %v5658_v22 }
 0x589   : > { %7320 = vmatprep.mubr.msk.bf16.mxu1 %vm8121_vm1, %v11482_v44  ;;  %7330 = vmatprep.subr.bf16.mxu1 %v11482_v44 }
 0x58c   : > { %4282 = vadd.xlane.f32.xlu1 %v4281_v27 }
 0x58d   : > { %7339 = vmatmul.mubr.msk.bf16.vlgmr.msra.gmra.mxu0 %vm3783_vm2, %v11628_v30 }
 0x58e   : > { %7349 = vmatpush3.bf16.msra.mxu0 %v5898_v42  ;;  %7350 = vmatprep.mubr.msk.bf16.mxu0 %vm8121_vm1, %v11482_v44 }
 0x58f   : > { %v10842_v58 = vpop.f32.mrf.mxu0  ;;  %7321 = vmatmul.mubr.msk.bf16.vlgmr.msra.gmra.mxu1 %vm3783_vm2, %v4433_v31  ;;  %v4389_v31 = vsel %vm3783_vm2, %v10716_v36, 0.0  ;;  %7360 = vmatprep.subr.bf16.mxu0 %v7515_v16 }
 0x590   : > { %4378 = vadd.xlane.f32.xlu1 %v4377_v37  ;;  %7331 = vmatpush3.bf16.msra.mxu1 %v5754_v55 }
 0x591   : > { %v7172_v61 = vpop.f32.mrf.mxu0  ;;  %7332 = vmatprep.mubr.msk.bf16.mxu1 %vm8121_vm1, %v11482_v44  ;;  %7342 = vmatprep.subr.bf16.mxu1 %v11482_v44 }
 0x592   : > { %v10868_v6 = vpop.xlane.xlu0 %4297 }
 0x593   : > { %v10853_v1 = vpop.f32.mrf.mxu0 }
 0x594   : > { %4294 = vadd.xlane.f32.xlu1 %v4293_v46 }
 0x595   : > { %v7173_v21 = vpop.f32.mrf.mxu0  ;;  %7351 = vmatmul.mubr.msk.bf16.vlgmr.msra.gmra.mxu0 %vm3783_vm2, %v4438_v48 }
 0x596   : > { %v10876_v53 = vpop.xlane.xlu0 %4204  ;;  %7361 = vmatpush3.bf16.msra.mxu0 %v7515_v16 }
 0x597   : > { %7333 = vmatmul.mubr.msk.bf16.vlgmr.msra.gmra.mxu1 %vm3783_vm2, %v4435_v33  ;;  %7362 = vmatprep.subr.bf16.mxu0 %v7516_v14 }
 0x598   : > { %4390 = vadd.xlane.f32.xlu1 %v4389_v31  ;;  %7343 = vmatpush3.bf16.msra.mxu1 %v5850_v15 }
 0x599   : > { %7344 = vmatprep.mubr.msk.bf16.mxu1 %vm8121_vm1, %v11482_v44  ;;  %7354 = vmatprep.subr.bf16.mxu1 %v11482_v44 }
 0x59a   : > { %v10888_v0 = vpop.xlane.xlu0 %4213  ;;  %7363 = vmatpush3.bf16.msra.mxu0 %v7516_v14 }
 0x59b   : > { %v10866_v29 = vpop.f32.mrf.mxu0 }
 0x59d   : > { %v7184_v9 = vpop.f32.mrf.mxu0 }
 0x59e   : > { %v10896_v12 = vpop.xlane.xlu0 %4309 }
 0x59f   : > { %v10871_v59 = vpop.f32.mrf.mxu0  ;;  %7345 = vmatmul.mubr.msk.bf16.vlgmr.msra.gmra.mxu1 %vm3783_vm2, %v4437_v26 }
 0x5a0   : > { %7355 = vmatpush3.bf16.msra.mxu1 %v5946_v38  ;;  %7356 = vmatprep.mubr.msk.bf16.mxu1 %vm8121_vm1, %v11482_v44 }
 0x5a1   : > { %v7185_v36 = vpop.f32.mrf.mxu0 }
 0x5a2   : > { %v10904_v8 = vpop.xlane.xlu0 %4225 }
 0x5a3   : > { %v10878_v43 = vpop.f32.mrf.mxu0 }
 0x5a5   : > { %v10880_v24 = vpop.xlane.xlu1 %4201  ;;  %v7196_v47 = vpop.f32.mrf.mxu0 }
 0x5a6   : > { %v10912_v3 = vpop.xlane.xlu0 %4321 }
 0x5a7   : > { %v10883_v19 = vpop.f32.mrf.mxu0  ;;  %7357 = vmatmul.mubr.msk.bf16.vlgmr.msra.gmra.mxu1 %vm3783_vm2, %v4439_v25 }
 0x5a9   : > { %v10886_v11 = vpop.xlane.xlu1 %4300  ;;  %v7197_v60 = vpop.f32.mrf.mxu0 }
 0x5aa   : > { %v10920_v52 = vpop.xlane.xlu0 %4237 }
 0x5ab   : > { %v10890_v44 = vpop.f32.mrf.mxu0 }
 0x5ac   : > { %11629 = vst [vmem:[#allocation31_spill] sm:$0xff] %v10890_v44 }
 0x5ad   : > { %v10892_v35 = vpop.xlane.xlu1 %4216  ;;  %v7208_v41 = vpop.f32.mrf.mxu0 }
 0x5ae   : > { %v10894_v50 = vpop.f32.mrf.mxu1  ;;  %v10928_v51 = vpop.xlane.xlu0 %4333 }
 0x5af   : > { %v10898_v23 = vpop.f32.mrf.mxu0 }
 0x5b0   : > { %v7178_v10 = vpop.f32.mrf.mxu1 }
 0x5b1   : > { %v7209_v62 = vpop.f32.mrf.mxu0  ;;  %v10900_v40 = vpop.xlane.xlu1 %4312 }
 0x5b2   : > { %v10902_v28 = vpop.f32.mrf.mxu1  ;;  %v10932_v27 = vpop.xlane.xlu0 %4207 }
 0x5b4   : > { %v7179_v39 = vpop.f32.mrf.mxu1 }
 0x5b5   : > { %v10906_v4 = vpop.xlane.xlu1 %4228 }
 0x5b6   : > { %v10940_v54 = vpop.xlane.xlu0 %4303 }
 0x5b9   : > { %v10914_v34 = vpop.xlane.xlu1 %4324 }
 0x5ba   : > { %v10944_v48 = vpop.xlane.xlu0 %4249 }
 0x5bb   : > { %v10908_v17 = vpop.f32.mrf.mxu1  ;;  %v10910_v63 = vpop.f32.mrf.mxu0 }
 0x5bc   : > { %11630 = vst [vmem:[#allocation78_spill] sm:$0xff] %v10910_v63 }
 0x5bd   : > { %v7190_v13 = vpop.f32.mrf.mxu1  ;;  %v7220_v7 = vpop.f32.mrf.mxu0 }
 0x5be   : > { %v10922_v56 = vpop.xlane.xlu1 %4240  ;;  %v10950_v33 = vpop.xlane.xlu0 %4345 }
 0x5bf   : > { %v10916_v45 = vpop.f32.mrf.mxu1  ;;  %v10918_v18 = vpop.f32.mrf.mxu0 }
 0x5c0   : > { %11631 = vst [vmem:[#allocation74_spill] sm:$0xff] %v10918_v18 }
 0x5c1   : > { %v7191_v57 = vpop.f32.mrf.mxu1  ;;  %v7221_v2 = vpop.f32.mrf.mxu0 }
 0x5c2   : > { %v10930_v22 = vpop.xlane.xlu1 %4336  ;;  %v10956_v36 = vpop.xlane.xlu0 %4219 }
 0x5c3   : > { %v10924_v32 = vpop.f32.mrf.mxu1 }
 0x5c4   : > { %11632 = vst [vmem:[#allocation25_spill] sm:$0xff] %v10924_v32 }
 0x5c5   : > { %v7202_v20 = vpop.f32.mrf.mxu1 }
 0x5c6   : > { %v10934_v42 = vpop.xlane.xlu1 %4210  ;;  %v10960_v25 = vpop.xlane.xlu0 %4315 }
 0x5c7   : > { %v10926_v5 = vpop.f32.mrf.mxu1 }
 0x5c8   : > { %11633 = vst [vmem:[#allocation69_spill] sm:$0xff] %v10926_v5 }
 0x5c9   : > { %v7203_v49 = vpop.f32.mrf.mxu1 }
 0x5ca   : > { %v10942_v61 = vpop.xlane.xlu1 %4306  ;;  %v10964_v41 = vpop.xlane.xlu0 %4261 }
 0x5ce   : > { %v10946_v15 = vpop.xlane.xlu1 %4252  ;;  %v10968_v62 = vpop.xlane.xlu0 %4357 }
 0x5d0   : > { %v10936_v30 = vpop.f32.mrf.mxu1 }
 0x5d1   : > { %11634 = vst [vmem:[#allocation80_spill] sm:$0xff] %v10936_v30 }
 0x5d2   : > { %v7214_v55 = vpop.f32.mrf.mxu1  ;;  %v10952_v31 = vpop.xlane.xlu1 %4348 }
 0x5d3   : > { %v10972_v16 = vpop.xlane.xlu0 %4231 }
 0x5d4   : > { %v10938_v37 = vpop.f32.mrf.mxu1 }
 0x5d5   : > { %11635 = vst [vmem:[#allocation36_spill] sm:$0xff] %v10938_v37 }
 0x5d6   : > { %v7215_v46 = vpop.f32.mrf.mxu1  ;;  %v10958_v47 = vpop.xlane.xlu1 %4222 }
 0x5d7   : > { %v10976_v13 = vpop.xlane.xlu0 %4327 }
 0x5da   : > { %v10962_v60 = vpop.xlane.xlu1 %4318 }
 0x5db   : > { %v10984_v49 = vpop.xlane.xlu0 %4273 }
 0x5de   : > { %v10966_v10 = vpop.xlane.xlu1 %4264 }
 0x5e0   : > { %v10948_v21 = vpop.f32.mrf.mxu1 }
 0x5e1   : > { %11636 = vst [vmem:[#allocation56_spill] sm:$0xff] %v10948_v21  ;;  %v10992_v21 = vpop.xlane.xlu0 %4369 }
 0x5e2   : > { %v7226_v38 = vpop.f32.mrf.mxu1  ;;  %v10970_v39 = vpop.xlane.xlu1 %4360 }
 0x5e4   : > { %v10954_v9 = vpop.f32.mrf.mxu1 }
 0x5e5   : > { %11637 = vst [vmem:[#allocation33_spill] sm:$0xff] %v10954_v9  ;;  %v4392_v9 = vadd.f32 %v10868_v6, %v10880_v24 }
 0x5e6   : > { %v7227_v26 = vpop.f32.mrf.mxu1  ;;  %v10974_v14 = vpop.xlane.xlu1 %4234 }
 0x5e7   : > { %7773 = vrcp.f32 %v4392_v9 }
 0x5ea   : > { %v10980_v57 = vpop.xlane.xlu1 %4330 }
 0x5ee   : > { %v10986_v46 = vpop.xlane.xlu1 %4276 }
 0x5f2   : > { %v10998_v63 = vpop.xlane.xlu1 %4372 }
 0x5f4   : > { %v7774_v44 = vpop.eup %7773 }
 0x605   : > { %v10978_v7 = vpop.f32.mrf.mxu0 }
 0x606   : > { %11638 = vst [vmem:[#allocation43_spill] sm:$0xff] %v10978_v7 }
 0x607   : > { %v7232_v2 = vpop.f32.mrf.mxu0 }
 0x608   : > { %v4393_v2 = vadd.f32 %v10886_v11, %v10876_v53 }
 0x609   : > { %v10982_v20 = vpop.f32.mrf.mxu0 }
 0x60a   : > { %11639 = vst [vmem:[#allocation27_spill] sm:$0xff] %v10982_v20  ;;  %7775 = vrcp.f32 %v4393_v2  ;;  %v11002_v20 = vpop.xlane.xlu0 %4243 }
 0x60b   : > { %v7233_v55 = vpop.f32.mrf.mxu0 }
 0x60d   : > { %v10988_v38 = vpop.f32.mrf.mxu0 }
 0x60e   : > { %11640 = vst [vmem:[#allocation37_spill] sm:$0xff] %v10988_v38  ;;  %v11004_v38 = vpop.xlane.xlu1 %4246  ;;  %v11012_v53 = vpop.xlane.xlu0 %4339 }
 0x60f   : > { %v7244_v26 = vpop.f32.mrf.mxu0 }
 0x611   : > { %v10994_v37 = vpop.f32.mrf.mxu0 }
 0x612   : > { %11641 = vst [vmem:[#allocation57_spill] sm:$0xff] %v10994_v37 }
 0x613   : > { %v7245_v30 = vpop.f32.mrf.mxu0 }
 0x614   : > { %v11014_v30 = vpop.xlane.xlu1 %4342 }
 0x615   : > { %v11000_v55 = vpop.f32.mrf.mxu0 }
 0x616   : > { %11642 = vst [vmem:[#allocation81_spill] sm:$0xff] %v11000_v55 }
 0x617   : > { %v7256_v26 = vpop.f32.mrf.mxu0  ;;  %v11006_v6 = vpop.f32.mrf.mxu1 }
 0x618   : > { %11643 = vst [vmem:[#allocation34_spill] sm:$0xff] %v11006_v6 }
 0x619   : > { %v11008_v24 = vpop.f32.mrf.mxu0  ;;  %v7238_v37 = vpop.f32.mrf.mxu1 }
 0x61a   : > { %11644 = vst [vmem:[#allocation45_spill] sm:$0xff] %v11008_v24  ;;  %v7776_v37 = vpop.eup %7775 }
 0x61b   : > { %v7257_v18 = vpop.f32.mrf.mxu0  ;;  %v11010_v7 = vpop.f32.mrf.mxu1 }
 0x61c   : > { %11645 = vst [vmem:[#allocation26_spill] sm:$0xff] %v11010_v7  ;;  %v4397_v18 = vadd.f32 %v10900_v40, %v10892_v35  ;;  %v11022_v7 = vpop.xlane.xlu0 %4285 }
 0x61d   : > { %v5265_v11 = vpop.f32.mrf.mxu0  ;;  %v7239_v9 = vpop.f32.mrf.mxu1  ;;  %11647 = vst [vmem:[#allocation82_spill] sm:$0xff] %v11022_v7 }
 0x61e   : > { %v5266_v55 = vadd.f32 %v5265_v11, %v10842_v58  ;;  %v4394_v9 = vadd.f32 %v10940_v54, %v10932_v27  ;;  %7777 = vrcp.f32 %v4397_v18  ;;  %v4400_v18 = vadd.f32 %v10912_v3, %v10904_v8 }
 0x61f   : > { %v7268_v2 = vpop.f32.mrf.mxu0  ;;  %v11017_v26 = vpop.f32.mrf.mxu1 }
 0x620   : > { %11646 = vst [vmem:[#allocation77_spill] sm:$0xff] %v11017_v26  ;;  %v11026_v2 = vpop.xlane.xlu1 %4288  ;;  %v6024_v58 = vmul.f32 %v7774_v44, %v5266_v55  ;;  %7779 = vrcp.f32 %v4394_v9  ;;  %v11037_v44 = vpop.xlane.xlu0 %4381 }
 0x621   : > { %v5268_v5 = vpop.f32.mrf.mxu0  ;;  %v7250_v24 = vpop.f32.mrf.mxu1 }
 0x622   : > { %v5269_v6 = vadd.f32 %v5268_v5, %v10853_v1  ;;  %v4395_v1 = vadd.f32 %v10942_v61, %v10934_v42  ;;  %v4396_v24 = vadd.f32 %v10896_v12, %v10888_v0  ;;  %v4401_v0 = vadd.f32 %v10914_v34, %v10906_v4 }
 0x623   : > { %v7269_v32 = vpop.f32.mrf.mxu0  ;;  %v11028_v26 = vpop.f32.mrf.mxu1  ;;  %v4398_v61 = vadd.f32 %v10960_v25, %v10956_v36 }
 0x624   : > { %v6025_v11 = vmul.f32 %v7776_v37, %v5269_v6  ;;  %7781 = vrcp.f32 %v4395_v1  ;;  %v11039_v54 = vpop.xlane.xlu1 %4384  ;;  %v4399_v6 = vadd.f32 %v10962_v60, %v10958_v47  ;;  %v4405_v47 = vadd.f32 %v10930_v22, %v10922_v56 }
 0x625   : > { %v5361_v5 = vpop.f32.mrf.mxu0  ;;  %v7251_v40 = vpop.f32.mrf.mxu1  ;;  %7783 = vrcp.f32 %v4396_v24  ;;  %v4402_v24 = vadd.f32 %v10976_v13, %v10972_v16 }
 0x626   : > { %v6056_v35 = vpack.c.bf16 %v6025_v11, %v6024_v58  ;;  %7785 = vrcp.f32 %v4401_v0  ;;  %v11051_v58 = vpop.xlane.xlu0 %4255 }
 0x627   : > { %v7280_v32 = vpop.f32.mrf.mxu0  ;;  %v11034_v7 = vpop.f32.mrf.mxu1  ;;  %7787 = vrcp.f32 %v4398_v61 }
 0x628   : > { %7364 = vmatprep.mubr.msk.bf16.mxu0 %vm564_vm0, %v6056_v35  ;;  %v11053_v4 = vpop.xlane.xlu1 %4258  ;;  %7789 = vrcp.f32 %v4399_v6  ;;  %v5362_v35 = vadd.f32 %v5361_v5, %v10866_v29 }
 0x629   : > { %v5364_v27 = vpop.f32.mrf.mxu0  ;;  %v7262_v42 = vpop.f32.mrf.mxu1  ;;  %7791 = vrcp.f32 %v4400_v18 }
 0x62a   : > { %v5365_v25 = vadd.f32 %v5364_v27, %v10871_v59  ;;  %v4403_v42 = vadd.f32 %v10980_v57, %v10974_v14  ;;  %v11064_v0 = vpop.xlane.xlu0 %4351  ;;  %7793 = vrcp.f32 %v4405_v47 }
 0x62b   : > { %v7281_v12 = vpop.f32.mrf.mxu0  ;;  %v11045_v55 = vpop.f32.mrf.mxu1  ;;  %7795 = vrcp.f32 %v4402_v24 }
 0x62c   : > { %v7778_v60 = vpop.eup %7777  ;;  %v11071_v22 = vpop.xlane.xlu1 %4354  ;;  %7797 = vrcp.f32 %v4403_v42 }
 0x62d   : > { %v5457_v37 = vpop.f32.mrf.mxu0  ;;  %v7263_v9 = vpop.f32.mrf.mxu1  ;;  %v6029_v16 = vmul.f32 %v7778_v60, %v5365_v25 }
 0x62e   : > { %v7780_v32 = vpop.eup %7779  ;;  %v11080_v25 = vpop.xlane.xlu0 %4267 }
 0x62f   : > { %v7292_v11 = vpop.f32.mrf.mxu0  ;;  %v5313_v34 = vpop.f32.mrf.mxu1 }
 0x630   : > { %v5314_v8 = vadd.f32 %v5313_v34, %v10894_v50  ;;  %v4404_v50 = vadd.f32 %v10928_v51, %v10920_v52  ;;  %v4413_v52 = vadd.f32 %v10970_v39, %v10966_v10  ;;  %v4409_v34 = vadd.f32 %v10952_v31, %v10946_v15 }
 0x631   : > { %v5460_v36 = vpop.f32.mrf.mxu0  ;;  %v7274_v1 = vpop.f32.mrf.mxu1  ;;  %v5458_v10 = vadd.f32 %v5457_v37, %v10878_v43  ;;  %v4407_v15 = vadd.f32 %v11014_v30, %v11004_v38 }
 0x632   : > { %v7782_v56 = vpop.eup %7781  ;;  %v6026_v5 = vmul.f32 %v7780_v32, %v5314_v8  ;;  %7799 = vrcp.f32 %v4404_v50  ;;  %v5461_v9 = vadd.f32 %v5460_v36, %v10883_v19  ;;  %v11086_v8 = vpop.xlane.xlu1 %4270  ;;  %v11648_v50 = vld [vmem:[#allocation25_spill] sm:$0xff] }
 0x633   : > { %v7293_v3 = vpop.f32.mrf.mxu0  ;;  %v5316_v40 = vpop.f32.mrf.mxu1 }
 0x634   : > { %v5317_v59 = vadd.f32 %v5316_v40, %v10902_v28  ;;  %v7784_v29 = vpop.eup %7783  ;;  %v4412_v28 = vadd.f32 %v10968_v62, %v10964_v41  ;;  %v4406_v62 = vadd.f32 %v11012_v53, %v11002_v20  ;;  %v4408_v20 = vadd.f32 %v10950_v33, %v10944_v48  ;;  %v4364_v38 = vpop.xlane.xlu0 %4363 }
 0x635   : > { %v11067_v27 = vpop.f32.mrf.mxu0  ;;  %v7275_v13 = vpop.f32.mrf.mxu1  ;;  %v6028_v14 = vmul.f32 %v7784_v29, %v5362_v35  ;;  %v4417_v48 = vadd.f32 %v10998_v63, %v10986_v46  ;;  %v11650_v46 = vld [vmem:[#allocation69_spill] sm:$0xff] }
 0x636   : > { %v6027_v12 = vmul.f32 %v7782_v56, %v5317_v59  ;;  %v7786_v41 = vpop.eup %7785  ;;  %7801 = vrcp.f32 %v4412_v28  ;;  %v4367_v33 = vpop.xlane.xlu1 %4366 }
 0x637   : > { %v7304_v61 = vpop.f32.mrf.mxu0  ;;  %v5409_v57 = vpop.f32.mrf.mxu1  ;;  %v6058_v51 = vpack.c.bf16 %v6029_v16, %v6028_v14  ;;  %7803 = vrcp.f32 %v4413_v52  ;;  %v6033_v53 = vmul.f32 %v7786_v41, %v5461_v9 }
 0x638   : > { %v6057_v6 = vpack.c.bf16 %v6027_v12, %v6026_v5  ;;  %v5410_v1 = vadd.f32 %v5409_v57, %v10908_v17  ;;  %v7788_v39 = vpop.eup %7787  ;;  %7805 = vrcp.f32 %v4409_v34 }
 0x639   : > { %v5556_v18 = vpop.f32.mrf.mxu0  ;;  %v7286_v11 = vpop.f32.mrf.mxu1  ;;  %7807 = vrcp.f32 %v4406_v62 }
 0x63a   : > { %7365 = vmatmul.mubr.msk.bf16.vlgmr.msra.gmra.mxu0 %vm564_vm0, %v6057_v6  ;;  %v7790_v36 = vpop.eup %7789  ;;  %v6030_v37 = vmul.f32 %v7788_v39, %v5410_v1  ;;  %7809 = vrcp.f32 %v4407_v15  ;;  %v5557_v59 = vadd.f32 %v5556_v18, %v10898_v23  ;;  %v4411_v23 = vadd.f32 %v11071_v22, %v11053_v4  ;;  %v11651_v11 = vld [vmem:[#allocation43_spill] sm:$0xff]  ;;  %v11652_v4 = vld [vmem:[#allocation82_spill] sm:$0xff] }
 0x63b   : > { %v7305_v47 = vpop.f32.mrf.mxu0  ;;  %v5412_v19 = vpop.f32.mrf.mxu1  ;;  %7368 = vmatprep.mubr.msk.bf16.mxu0 %vm564_vm0, %v6058_v51  ;;  %7811 = vrcp.f32 %v4408_v20  ;;  %v4420_v22 = vadd.f32 %v11037_v44, %v11652_v4  ;;  %v11653_v39 = vld [vmem:[#allocation74_spill] sm:$0xff] }
 0x63c   : > { %v5413_v17 = vadd.f32 %v5412_v19, %v10916_v45  ;;  %v7792_v43 = vpop.eup %7791  ;;  %v4416_v45 = vadd.f32 %v10992_v21, %v10984_v49  ;;  %v4410_v21 = vadd.f32 %v11064_v0, %v11051_v58  ;;  %v11649_v49 = vld [vmem:[#allocation31_spill] sm:$0xff]  ;;  %v4280_v58 = vpop.xlane.xlu0 %4279 }
 0x63d   : > { %v11093_v31 = vpop.f32.mrf.mxu0  ;;  %v7287_v3 = vpop.f32.mrf.mxu1  ;;  %v6032_v35 = vmul.f32 %v7792_v43, %v5458_v10  ;;  %v5554_v5 = vadd.f32 %v11067_v27, %v11649_v49  ;;  %v4421_v10 = vadd.f32 %v11039_v54, %v11026_v2 }
 0x63e   : > { %v6031_v60 = vmul.f32 %v7790_v36, %v5413_v17  ;;  %v7794_v29 = vpop.eup %7793  ;;  %7813 = vrcp.f32 %v4416_v45  ;;  %v11112_v51 = vpop.xlane.xlu1 %4282  ;;  %v11654_v17 = vld [vmem:[#allocation27_spill] sm:$0xff]  ;;  %v11655_v3 = vld [vmem:[#allocation80_spill] sm:$0xff] }
 0x63f   : > { %v7316_v24 = vpop.f32.mrf.mxu0  ;;  %v5505_v40 = vpop.f32.mrf.mxu1  ;;  %v6060_v42 = vpack.c.bf16 %v6033_v53, %v6032_v35  ;;  %7815 = vrcp.f32 %v4417_v48  ;;  %v6037_v28 = vmul.f32 %v7794_v29, %v5557_v59  ;;  %v11657_v48 = vld [vmem:[#allocation36_spill] sm:$0xff] }
 0x640   : > { %v6059_v30 = vpack.c.bf16 %v6031_v60, %v6030_v37  ;;  %v5506_v16 = vadd.f32 %v5505_v40, %v11648_v50  ;;  %v7796_v63 = vpop.eup %7795  ;;  %7817 = vrcp.f32 %v4410_v21  ;;  %v4414_v60 = vadd.f32 %v4364_v38, %v11080_v25  ;;  %v11656_v24 = vld [vmem:[#allocation78_spill] sm:$0xff] }
 0x641   : > { %v5652_v32 = vpop.f32.mrf.mxu0  ;;  %v7298_v56 = vpop.f32.mrf.mxu1  ;;  %7819 = vrcp.f32 %v4411_v23  ;;  %v5650_v35 = vadd.f32 %v11093_v31, %v11656_v24 }
 0x642   : > { %7369 = vmatmul.mubr.msk.bf16.gmra.mxu0 %vm564_vm0, %v6059_v30  ;;  %v7798_v57 = vpop.eup %7797  ;;  %v6034_v0 = vmul.f32 %v7796_v63, %v5506_v16  ;;  %v5653_v15 = vadd.f32 %v5652_v32, %v11653_v39  ;;  %7821 = vrcp.f32 %v4420_v22  ;;  %v4376_v30 = vpop.xlane.xlu0 %4375  ;;  %v4415_v32 = vadd.f32 %v4367_v33, %v11086_v8 }
 0x643   : > { %v7317_v13 = vpop.f32.mrf.mxu0  ;;  %v5508_v12 = vpop.f32.mrf.mxu1  ;;  %7372 = vmatprep.mubr.msk.bf16.mxu0 %vm564_vm0, %v6060_v42  ;;  %7823 = vrcp.f32 %v4421_v10 }
 0x644   : > { %v5509_v61 = vadd.f32 %v5508_v12, %v11650_v46  ;;  %v7800_v18 = vpop.eup %7799  ;;  %v4379_v25 = vpop.xlane.xlu1 %4378  ;;  %7825 = vrcp.f32 %v4414_v60 }
 0x645   : > { %v5745_v14 = vpop.f32.mrf.mxu0  ;;  %v7299_v6 = vpop.f32.mrf.mxu1  ;;  %v6036_v9 = vmul.f32 %v7800_v18, %v5554_v5  ;;  %v11658_v5 = vld [vmem:[#allocation37_spill] sm:$0xff]  ;;  %7827 = vrcp.f32 %v4415_v32  ;;  %v11660_v18 = vld [vmem:[#allocation56_spill] sm:$0xff]  ;;  %v4419_v22 = vadd.f32 %v4379_v25, %v11112_v51  ;;  %v11665_v25 = vld [vmem:[#allocation26_spill] sm:$0xff] }
 0x646   : > { %v6035_v52 = vmul.f32 %v7798_v57, %v5509_v61  ;;  %v5746_v34 = vadd.f32 %v5745_v14, %v11651_v11  ;;  %v7802_v62 = vpop.eup %7801  ;;  %v11659_v61 = vld [vmem:[#allocation57_spill] sm:$0xff]  ;;  %v4292_v6 = vpop.xlane.xlu0 %4291 }
 0x647   : > { %v7328_v27 = vpop.f32.mrf.mxu0  ;;  %v5601_v1 = vpop.f32.mrf.mxu1  ;;  %v6062_v19 = vpack.c.bf16 %v6037_v28, %v6036_v9  ;;  %v11663_v51 = vld [vmem:[#allocation45_spill] sm:$0xff] }
 0x648   : > { %v6061_v47 = vpack.c.bf16 %v6035_v52, %v6034_v0  ;;  %v7804_v53 = vpop.eup %7803  ;;  %v5602_v43 = vadd.f32 %v5601_v1, %v11655_v3  ;;  %v11126_v40 = vmul.f32 %v7802_v62, %v5746_v34  ;;  %v4418_v27 = vadd.f32 %v4376_v30, %v4280_v58  ;;  %v4295_v9 = vpop.xlane.xlu1 %4294  ;;  %v11662_v58 = vld [vmem:[#allocation81_spill] sm:$0xff] }
 0x649   : > { %v5748_v41 = vpop.f32.mrf.mxu0  ;;  %v7310_v20 = vpop.f32.mrf.mxu1 }
 0x64a   : > { %v5749_v36 = vadd.f32 %v5748_v41, %v11654_v17  ;;  %7373 = vmatmul.mubr.msk.bf16.gmra.mxu0 %vm564_vm0, %v6061_v47  ;;  %v7806_v44 = vpop.eup %7805  ;;  %v11661_v47 = vld [vmem:[#allocation33_spill] sm:$0xff]  ;;  %7829 = vrcp.f32 %v4418_v27  ;;  %v4388_v3 = vpop.xlane.xlu0 %4387 }
 0x64b   : > { %v7329_v37 = vpop.f32.mrf.mxu0  ;;  %v5604_v54 = vpop.f32.mrf.mxu1  ;;  %7376 = vmatprep.mubr.msk.bf16.mxu0 %vm564_vm0, %v6062_v19  ;;  %v6041_v38 = vmul.f32 %v7806_v44, %v5653_v15  ;;  %7831 = vrcp.f32 %v4419_v22  ;;  %v4422_v30 = vadd.f32 %v4388_v3, %v4292_v6 }
 0x64c   : > { %v11128_v2 = vmul.f32 %v7804_v53, %v5749_v36  ;;  %v7808_v45 = vpop.eup %7807  ;;  %v5605_v42 = vadd.f32 %v5604_v54, %v11657_v48  ;;  %v4391_v60 = vpop.xlane.xlu1 %4390 }
 0x64d   : > { %v5841_v59 = vpop.f32.mrf.mxu0  ;;  %v7810_v56 = vpop.eup %7809  ;;  %v6038_v13 = vmul.f32 %v7808_v45, %v5602_v43  ;;  %7833 = vrcp.f32 %v4422_v30 }
 0x64e   : > { %v6066_v31 = vpack.c.bf16 %v11128_v2, %v11126_v40  ;;  %v7311_v50 = vpop.f32.mrf.mxu1  ;;  %v7812_v16 = vpop.eup %7811  ;;  %v6039_v29 = vmul.f32 %v7810_v56, %v5605_v42  ;;  %v5842_v12 = vadd.f32 %v5841_v59, %v11658_v5  ;;  %v11664_v2 = vld [vmem:[#allocation34_spill] sm:$0xff]  ;;  %v4423_v56 = vadd.f32 %v4391_v60, %v4295_v9 }
 0x64f   : > { %v7340_v21 = vpop.f32.mrf.mxu0  ;;  %v6040_v49 = vmul.f32 %v7812_v16, %v5650_v35  ;;  %v7814_v23 = vpop.eup %7813 }
 0x650   : > { %v5697_v8 = vpop.f32.mrf.mxu1  ;;  %v6063_v33 = vpack.c.bf16 %v6039_v29, %v6038_v13  ;;  %v7816_v28 = vpop.eup %7815  ;;  %v6048_v11 = vmul.f32 %v7814_v23, %v5842_v12  ;;  %7835 = vrcp.f32 %v4423_v56 }
 0x651   : > { %v5844_v63 = vpop.f32.mrf.mxu0  ;;  %v6064_v46 = vpack.c.bf16 %v6041_v38, %v6040_v49  ;;  %v5698_v0 = vadd.f32 %v5697_v8, %v11660_v18  ;;  %v7818_v4 = vpop.eup %7817  ;;  %v11666_v8 = vld [vmem:[#allocation77_spill] sm:$0xff] }
 0x652   : > { %v5845_v14 = vadd.f32 %v5844_v63, %v11659_v61  ;;  %v7322_v57 = vpop.f32.mrf.mxu1  ;;  %7377 = vmatmul.mubr.msk.bf16.gmra.mxu0 %vm564_vm0, %v6063_v33  ;;  %v7820_v10 = vpop.eup %7819 }
 0x653   : > { %v7341_v52 = vpop.f32.mrf.mxu0  ;;  %7380 = vmatprep.mubr.msk.bf16.mxu0 %vm564_vm0, %v6064_v46  ;;  %v6042_v15 = vmul.f32 %v7818_v4, %v5698_v0  ;;  %v7822_v44 = vpop.eup %7821 }
 0x654   : > { %v6049_v34 = vmul.f32 %v7816_v28, %v5845_v14  ;;  %v5700_v1 = vpop.f32.mrf.mxu1  ;;  %v7824_v40 = vpop.eup %7823 }
 0x655   : > { %v5701_v41 = vadd.f32 %v5700_v1, %v11661_v47  ;;  %v5937_v62 = vpop.f32.mrf.mxu0  ;;  %v7826_v59 = vpop.eup %7825 }
 0x656   : > { %v6068_v19 = vpack.c.bf16 %v6049_v34, %v6048_v11  ;;  %v7323_v39 = vpop.f32.mrf.mxu1  ;;  %v5938_v20 = vadd.f32 %v5937_v62, %v11662_v58  ;;  %v7828_v50 = vpop.eup %7827 }
 0x657   : > { %v6043_v17 = vmul.f32 %v7820_v10, %v5701_v41  ;;  %v7352_v36 = vpop.f32.mrf.mxu0 }
 0x658   : > { %v5793_v53 = vpop.f32.mrf.mxu1  ;;  %v6052_v32 = vmul.f32 %v7822_v44, %v5938_v20 }
 0x659   : > { %v6065_v43 = vpack.c.bf16 %v6043_v17, %v6042_v15  ;;  %v5940_v37 = vpop.f32.mrf.mxu0  ;;  %v5794_v54 = vadd.f32 %v5793_v53, %v11664_v2 }
 0x65a   : > { %v5941_v24 = vadd.f32 %v5940_v37, %v11663_v51  ;;  %v7334_v35 = vpop.f32.mrf.mxu1 }
 0x65b   : > { %v7353_v45 = vpop.f32.mrf.mxu0  ;;  %7381 = vmatmul.mubr.msk.bf16.gmra.mxu0 %vm564_vm0, %v6065_v43  ;;  %v6046_v29 = vmul.f32 %v7826_v59, %v5794_v54 }
 0x65c   : > { %v6053_v48 = vmul.f32 %v7824_v40, %v5941_v24  ;;  %v5796_v42 = vpop.f32.mrf.mxu1  ;;  %7384 = vmatprep.mubr.msk.bf16.mxu0 %vm564_vm0, %v6066_v31  ;;  %v7830_v31 = vpop.eup %7829 }
 0x65d   : > { %v5797_v38 = vadd.f32 %v5796_v42, %v11665_v25  ;;  %v7832_v46 = vpop.eup %7831 }
 0x65e   : > { %v6070_v16 = vpack.c.bf16 %v6053_v48, %v6052_v32  ;;  %v7335_v13 = vpop.f32.mrf.mxu1  ;;  %v7834_v27 = vpop.eup %7833 }
 0x65f   : > { %v6047_v21 = vmul.f32 %v7828_v50, %v5797_v38  ;;  %v7836_v11 = vpop.eup %7835 }
 0x660   : > { %v5889_v49 = vpop.f32.mrf.mxu1 }
 0x661   : > { %v6067_v5 = vpack.c.bf16 %v6047_v21, %v6046_v29  ;;  %v5890_v33 = vadd.f32 %v5889_v49, %v11666_v8 }
 0x662   : > { %v7346_v12 = vpop.f32.mrf.mxu1 }
 0x663   : > { %7385 = vmatmul.mubr.msk.bf16.gmra.mxu0 %vm564_vm0, %v6067_v5  ;;  %v6050_v14 = vmul.f32 %v7830_v31, %v5890_v33 }
 0x664   : > { %v5892_v63 = vpop.f32.mrf.mxu1  ;;  %7388 = vmatprep.mubr.msk.bf16.mxu0 %vm564_vm0, %v6068_v19 }
 0x665   : > { %v5893_v23 = vadd.f32 %v5892_v63, %v11028_v26 }
 0x666   : > { %v7347_v61 = vpop.f32.mrf.mxu1 }
 0x667   : > { %v6051_v57 = vmul.f32 %v7832_v46, %v5893_v23 }
 0x668   : > { %v5985_v28 = vpop.f32.mrf.mxu1 }
 0x669   : > { %v6069_v6 = vpack.c.bf16 %v6051_v57, %v6050_v14  ;;  %v5986_v0 = vadd.f32 %v5985_v28, %v11034_v7  ;;  %v11160_v7 = vld [vmem:[%s11320_s9] ss:$0 sm:$0xff] }
 0x66a   : > { %v7358_v18 = vpop.f32.mrf.mxu1 }
 0x66b   : > { %7389 = vmatmul.mubr.msk.bf16.gmra.mxu0 %vm564_vm0, %v6069_v6  ;;  %v6054_v34 = vmul.f32 %v7834_v27, %v5986_v0 }
 0x66c   : > { %v5988_v52 = vpop.f32.mrf.mxu1  ;;  %7392 = vmatprep.mubr.msk.bf16.mxu0 %vm564_vm0, %v6070_v16 }
 0x66d   : > { %v5989_v9 = vadd.f32 %v5988_v52, %v11045_v55 }
 0x66e   : > { %v7359_v26 = vpop.f32.mrf.mxu1 }
 0x66f   : > { %v6055_v1 = vmul.f32 %v7836_v11, %v5989_v9 }
 0x671   : > { %v6071_v4 = vpack.c.bf16 %v6055_v1, %v6054_v34 }
 0x673   : > { %7393 = vmatmul.mubr.msk.bf16.gmra.mxu0 %vm564_vm0, %v6071_v4 }
 0x6fa   : > { %v7366_v22 = vpop.f32.mrf.mxu0 }
 0x6fb   : > { %v6186_v47 = vadd.f32 %v7366_v22, %v11160_v7 }
 0x6fc   : > { %v6177_v41 = vpop.f32.mrf.mxu0 }
 0x6fd   : > { %6306 = vst.msk [vmem:[%s11164_s23 + $0x10] sm:$0xff] %vm564_vm0, %v6186_v47  ;;  %v6178_v55 = vadd.f32 %v11160_v7, %v6177_v41 }
 0x6fe   : > { %v7367_v62 = vpop.f32.mrf.mxu0 }
 0x6ff   : > { %6304 = vst.msk [vmem:[%s11164_s23] sm:$0xff] %vm564_vm0, %v6178_v55  ;;  %v6189_v10 = vadd.f32 %v7367_v62, %v11160_v7 }
 0x700   : > { %v6180_v19 = vpop.f32.mrf.mxu0 }
 0x701   : > { %6307 = vst.msk [vmem:[%s11164_s23 + $0x18] sm:$0xff] %vm564_vm0, %v6189_v10  ;;  %v6181_v39 = vadd.f32 %v11160_v7, %v6180_v19 }
 0x702   : > { %v7370_v15 = vpop.f32.mrf.mxu0 }
 0x703   : > { %6305 = vst.msk [vmem:[%s11164_s23 + $0x8] sm:$0xff] %vm564_vm0, %v6181_v39  ;;  %v6202_v17 = vadd.f32 %v7370_v15, %v11160_v7 }
 0x704   : > { %v6193_v36 = vpop.f32.mrf.mxu0 }
 0x705   : > { %6310 = vst.msk [vmem:[%s11164_s23 + $0x30] sm:$0xff] %vm564_vm0, %v6202_v17  ;;  %v6194_v58 = vadd.f32 %v11160_v7, %v6193_v36 }
 0x706   : > { %v7371_v20 = vpop.f32.mrf.mxu0 }
 0x707   : > { %6308 = vst.msk [vmem:[%s11164_s23 + $0x20] sm:$0xff] %vm564_vm0, %v6194_v58  ;;  %v6205_v53 = vadd.f32 %v7371_v20, %v11160_v7 }
 0x708   : > { %v6196_v3 = vpop.f32.mrf.mxu0 }
 0x709   : > { %6311 = vst.msk [vmem:[%s11164_s23 + $0x38] sm:$0xff] %vm564_vm0, %v6205_v53  ;;  %v6197_v43 = vadd.f32 %v11160_v7, %v6196_v3 }
 0x70a   : > { %v7374_v37 = vpop.f32.mrf.mxu0 }
 0x70b   : > { %6309 = vst.msk [vmem:[%s11164_s23 + $0x28] sm:$0xff] %vm564_vm0, %v6197_v43  ;;  %v6218_v44 = vadd.f32 %v7374_v37, %v11160_v7 }
 0x70c   : > { %v6209_v60 = vpop.f32.mrf.mxu0 }
 0x70d   : > { %6314 = vst.msk [vmem:[%s11164_s23 + $0x50] sm:$0xff] %vm564_vm0, %v6218_v44  ;;  %v6210_v51 = vadd.f32 %v11160_v7, %v6209_v60 }
 0x70e   : > { %v7375_v24 = vpop.f32.mrf.mxu0 }
 0x70f   : > { %6312 = vst.msk [vmem:[%s11164_s23 + $0x40] sm:$0xff] %vm564_vm0, %v6210_v51  ;;  %v6221_v35 = vadd.f32 %v7375_v24, %v11160_v7 }
 0x710   : > { %v6212_v40 = vpop.f32.mrf.mxu0 }
 0x711   : > { %6315 = vst.msk [vmem:[%s11164_s23 + $0x58] sm:$0xff] %vm564_vm0, %v6221_v35  ;;  %v6213_v2 = vadd.f32 %v11160_v7, %v6212_v40 }
 0x712   : > { %v7378_v54 = vpop.f32.mrf.mxu0 }
 0x713   : > { %6313 = vst.msk [vmem:[%s11164_s23 + $0x48] sm:$0xff] %vm564_vm0, %v6213_v2  ;;  %v6234_v45 = vadd.f32 %v7378_v54, %v11160_v7 }
 0x714   : > { %v6225_v30 = vpop.f32.mrf.mxu0 }
 0x715   : > { %6318 = vst.msk [vmem:[%s11164_s23 + $0x70] sm:$0xff] %vm564_vm0, %v6234_v45  ;;  %v6226_v32 = vadd.f32 %v11160_v7, %v6225_v30 }
 0x716   : > { %v7379_v48 = vpop.f32.mrf.mxu0 }
 0x717   : > { %6316 = vst.msk [vmem:[%s11164_s23 + $0x60] sm:$0xff] %vm564_vm0, %v6226_v32  ;;  %v6237_v42 = vadd.f32 %v7379_v48, %v11160_v7 }
 0x718   : > { %v6228_v59 = vpop.f32.mrf.mxu0 }
 0x719   : > { %6319 = vst.msk [vmem:[%s11164_s23 + $0x78] sm:$0xff] %vm564_vm0, %v6237_v42  ;;  %v6229_v56 = vadd.f32 %v11160_v7, %v6228_v59 }
 0x71b   : > { %v7382_v25 = vpop.f32.mrf.mxu0  ;;  %6317 = vst.msk [vmem:[%s11164_s23 + $0x68] sm:$0xff] %vm564_vm0, %v6229_v56 }
 0x71c   : > { %v6250_v38 = vadd.f32 %v7382_v25, %v11160_v7 }
 0x71d   : > { %v6241_v50 = vpop.f32.mrf.mxu0 }
 0x71e   : > { %6322 = vst.msk [vmem:[%s11164_s23 + $0x90] sm:$0xff] %vm564_vm0, %v6250_v38  ;;  %v6242_v16 = vadd.f32 %v11160_v7, %v6241_v50 }
 0x71f   : > { %v7383_v13 = vpop.f32.mrf.mxu0 }
 0x720   : > { %6320 = vst.msk [vmem:[%s11164_s23 + $0x80] sm:$0xff] %vm564_vm0, %v6242_v16  ;;  %v6253_v29 = vadd.f32 %v7383_v13, %v11160_v7 }
 0x721   : > { %v6244_v21 = vpop.f32.mrf.mxu0 }
 0x722   : > { %6323 = vst.msk [vmem:[%s11164_s23 + $0x98] sm:$0xff] %vm564_vm0, %v6253_v29  ;;  %v6245_v49 = vadd.f32 %v11160_v7, %v6244_v21 }
 0x723   : > { %v7386_v5 = vpop.f32.mrf.mxu0 }
 0x724   : > { %6321 = vst.msk [vmem:[%s11164_s23 + $0x88] sm:$0xff] %vm564_vm0, %v6245_v49  ;;  %v6266_v12 = vadd.f32 %v7386_v5, %v11160_v7 }
 0x725   : > { %v6257_v8 = vpop.f32.mrf.mxu0 }
 0x726   : > { %6326 = vst.msk [vmem:[%s11164_s23 + $0xb0] sm:$0xff] %vm564_vm0, %v6266_v12  ;;  %v6258_v33 = vadd.f32 %v11160_v7, %v6257_v8 }
 0x727   : > { %v7387_v63 = vpop.f32.mrf.mxu0 }
 0x728   : > { %6324 = vst.msk [vmem:[%s11164_s23 + $0xa0] sm:$0xff] %vm564_vm0, %v6258_v33  ;;  %v6269_v31 = vadd.f32 %v7387_v63, %v11160_v7 }
 0x729   : > { %v6260_v23 = vpop.f32.mrf.mxu0 }
 0x72a   : > { %6327 = vst.msk [vmem:[%s11164_s23 + $0xb8] sm:$0xff] %vm564_vm0, %v6269_v31  ;;  %v6261_v46 = vadd.f32 %v11160_v7, %v6260_v23 }
 0x72b   : > { %v7390_v61 = vpop.f32.mrf.mxu0 }
 0x72c   : > { %6325 = vst.msk [vmem:[%s11164_s23 + $0xa8] sm:$0xff] %vm564_vm0, %v6261_v46  ;;  %v6282_v14 = vadd.f32 %v7390_v61, %v11160_v7 }
 0x72d   : > { %v6273_v57 = vpop.f32.mrf.mxu0 }
 0x72e   : > { %6330 = vst.msk [vmem:[%s11164_s23 + $0xd0] sm:$0xff] %vm564_vm0, %v6282_v14  ;;  %v6274_v28 = vadd.f32 %v11160_v7, %v6273_v57 }
 0x72f   : > { %v7391_v6 = vpop.f32.mrf.mxu0 }
 0x730   : > { %6328 = vst.msk [vmem:[%s11164_s23 + $0xc0] sm:$0xff] %vm564_vm0, %v6274_v28  ;;  %v6285_v18 = vadd.f32 %v7391_v6, %v11160_v7 }
 0x731   : > { %v6276_v0 = vpop.f32.mrf.mxu0 }
 0x732   : > { %6331 = vst.msk [vmem:[%s11164_s23 + $0xd8] sm:$0xff] %vm564_vm0, %v6285_v18  ;;  %v6277_v52 = vadd.f32 %v11160_v7, %v6276_v0 }
 0x733   : > { %v7394_v27 = vpop.f32.mrf.mxu0 }
 0x734   : > { %6329 = vst.msk [vmem:[%s11164_s23 + $0xc8] sm:$0xff] %vm564_vm0, %v6277_v52  ;;  %v6298_v9 = vadd.f32 %v7394_v27, %v11160_v7 }
 0x735   : > { %v6289_v11 = vpop.f32.mrf.mxu0 }
 0x736   : > { %6334 = vst.msk [vmem:[%s11164_s23 + $0xf0] sm:$0xff] %vm564_vm0, %v6298_v9  ;;  %v6290_v26 = vadd.f32 %v11160_v7, %v6289_v11 }
 0x737   : > { %v7395_v34 = vpop.f32.mrf.mxu0 }
 0x738   : > { %6332 = vst.msk [vmem:[%s11164_s23 + $0xe0] sm:$0xff] %vm564_vm0, %v6290_v26  ;;  %v6301_v1 = vadd.f32 %v7395_v34, %v11160_v7 }
 0x739   : > { %v6292_v4 = vpop.f32.mrf.mxu0 }
 0x73a   : > { %6335 = vst.msk [vmem:[%s11164_s23 + $0xf8] sm:$0xff] %vm564_vm0, %v6301_v1  ;;  %v6293_v22 = vadd.f32 %v11160_v7, %v6292_v4 }
 0x73c   : > { %6333 = vst.msk [vmem:[%s11164_s23 + $0xe8] sm:$0xff] %vm564_vm0, %v6293_v22 }
 0x73d   : > { %8040 = shalt.err (!%p8037_p9)
}
 0x73e   : > { %s8041_s11 = scalar_lea.hbm %s11261_s6, 4096  ;;  %s8045_s2 = scalar_lea.hbm %s11321_s10, 8192 }
 0x73f   : > { %p8042_p3 = scmp.ne.s32.totalorder %s11261_s6, %s8041_s11  ;;  %p8046_p2 = scmp.lt.s32.totalorder %s11261_s6, %s11321_s10 }
 0x740   : > { %p8047_p10 = scmp.lt.s32.totalorder %s8045_s2, %s8041_s11 }
 0x741   : > { %p8043_p7 = pnand %p8042_p3, %p11667_p5 }
 0x742   : > { %p8048_p0 = por %p8047_p10, %p8046_p2 }
 0x743   : > { %p8044_p12 = pneg %p8043_p7 }
 0x745   : > { %p8049_p13 = pnand %p8048_p0, %p8044_p12 }
 0x747   : > { %8052 = shalt.err (!%p8049_p13)
}
 0x748   : > { %s8124_s27 = smov 128   ;;  %s8125_s30 = smov 8  }
 0x749   : > { %7424 = dma.vmem_to_hbm [thread:$0]  (%p11667_p5), %s11263_s26, 4096, %s11261_s6, %s6337_s19, %s8124_s27, %s8124_s27, %s8125_s30  }
 0x74a PF: > { %s6366_s18 = sand.u32 1, %s8095_s13   ;;  %p11668_p8 = scmp.ne.s32.totalorder %s11430_s21, 0 }
 0x74b   : > { %p11669_p11 = scmp.ge.s32.totalorder %s8107_s16, 2  ;;  %s6367_s23 = scalar_lea.sflag [#allocation4], %s6366_s18 }
 0x74d   : > { %p7450_p1 = pnand %p11669_p11, %p11668_p8 }
 0x74f   : > { %p7451_p4 = pneg %p7450_p1 }
 0x751   : > { %8090 = dma.done.wait (%p7451_p4), %s6367_s23, 4096  }
 0x752   : > { %8092 = vsyncadd (%p7451_p4), %s6367_s23, 4294963200  ;;  %s11670_s16 = sld [smem:[#allocation22_spill]]  ;;  %s11673_s13 = smov %s8099_s14 }
 0x753   : > { %s11671_s17 = sld [smem:[#allocation21_spill]] }
 0x754   : > { %s11672_s15 = sld [smem:[#allocation23_spill]] }
 0x758   : > { %p28_p6 = scmp.ge.s32.totalorder %s11670_s16, 4  }
 0x759   : > { %s11674_s14 = smov %s11671_s17 }
 0x75a   :  { %30 = sbr.rel (!%p28_p6) target bundleno = 16 (0x10), region = 138 }
 0x75f   :  { %6372 = vsyncpa [#allocation3], 1 }
 0x760   :  { %6374 = vsyncpa [#allocation3 + $0x1], 1 }
 0x761   :  { %6375 = vsyncpa [#allocation6], 1 }
 0x762   :  { %6377 = vsyncpa [#allocation6 + $0x1], 1 }
 0x763   :  { %6378 = vsyncpa [#allocation9], 1 }
 0x764   :  { %6379 = vsyncpa [#allocation12], 1 }
 0x765   :  { %6380 = vsyncpa [#allocation4], 1 }
 0x766   :  { %6382 = vsyncpa [#allocation4 + $0x1], 1 }

</bundles_post_ra>
